<compile_context>
chip_gen: v6e
topology: v6e:2x2x1
jax: 0.10.0
libtpu: 0.0.40
codegen_flags: <defaults>
</compile_context>

<pallas_src>
import numpy as np
import jax
import jax.numpy as jnp
from jax import lax
from jax.experimental import pallas as pl
from jax.experimental.pallas import tpu as pltpu

# ----------------------------- hyper params (small, synthetic) -----------------------------
VOCAB = 50
EMBED = 16
HIDDEN = 32
NUM_TAGS = 6
FS_NUM = 0            # forward() concatenates no extra features
B, T = 2, 8
B_PAD = 8             # pack 8 sequences per call: full f32 sublane tile, amortizes launch/DMA
GPAD = 128            # per-gate lane padding: every gate extract starts at a vreg boundary


# ----------------------------------- Pallas kernel -----------------------------------------
def bilstm_crf_kernel(emb2_ref, tags_ref, mask_ref, w_ref,
                      wih_ref, whh_ref, b_ref,
                      wcrf_ref, bcrf_ref,
                      start_ref, end_ref, transT_ref, exptrans_ref,
                      loss_ref):
    Tn, Bn = tags_ref.shape               # (T, B_pad)
    H2 = whh_ref.shape[0]                 # 2H (h layout: [h_fwd | h_bwd])
    H = H2 // 2
    GP = whh_ref.shape[1] // 4            # padded per-gate width (= 128)
    NT = transT_ref.shape[0]

    # -------- batched input projection, hoisted out of the recurrence ---------------------
    # emb2_ref rows for step s are [emb(s) | emb(T-1-s)]; wih_ref block-routes the first E
    # rows to forward-gate lanes and the last E rows to backward-gate lanes, so xp rows
    # [s*Bn:(s+1)*Bn] are directly the fused gate input for step s.  Bias already folded in.
    xp = jnp.dot(emb2_ref[...], wih_ref[...],
                 preferred_element_type=jnp.float32) + b_ref[...]            # (T*B, 4*GP) f32

    # -------- fused bidirectional LSTM recurrence (block-diagonal whh, fully unrolled) ----
    whh = whh_ref[...]                                                        # (2H, 4*GP) bf16
    h_cat = jnp.zeros((Bn, H2), jnp.float32)                                  # [h_f | h_b]
    c_cat = jnp.zeros((Bn, H2), jnp.float32)                                  # [c_f | c_b]
    hs_f = [None] * Tn
    hs_b = [None] * Tn
    for s in range(Tn):
        gates = jnp.dot(h_cat.astype(jnp.bfloat16), whh,
                        preferred_element_type=jnp.float32) \
            + xp[s * Bn:(s + 1) * Bn, :]                                      # (B, 4*GP)
        i_cat = jax.nn.sigmoid(gates[:, 0:H2])
        f_cat = jax.nn.sigmoid(gates[:, GP:GP + H2])
        g_cat = jnp.tanh(gates[:, 2 * GP:2 * GP + H2])
        o_cat = jax.nn.sigmoid(gates[:, 3 * GP:3 * GP + H2])
        c_cat = f_cat * c_cat + i_cat * g_cat
        h_cat = o_cat * jnp.tanh(c_cat)
        hs_f[s] = h_cat[:, :H]            # forward hidden at time s
        hs_b[Tn - 1 - s] = h_cat[:, H:]   # backward hidden at time T-1-s

    # -------- tocrf: single fused (T*B, 2H) @ (2H, NT) matmul ------------------------------
    hcat_all = jnp.concatenate([jnp.concatenate(hs_f, axis=0),
                                jnp.concatenate(hs_b, axis=0)], axis=1)       # (T*B, 2H)
    em2d = jnp.dot(hcat_all.astype(jnp.bfloat16), wcrf_ref[...],
                   preferred_element_type=jnp.float32) + bcrf_ref[...]        # (T*B, NT)
    emis = [em2d[t * Bn:(t + 1) * Bn, :] for t in range(Tn)]                  # T x (B, NT)

    # -------- CRF: gold-path score + forward algorithm (fully unrolled) --------------------
    tags = tags_ref[...]                                                      # (T, B) int32
    m = mask_ref[...]                                                         # (T, B) f32
    start = start_ref[...]                                                    # (1, NT)
    end = end_ref[...]                                                        # (1, NT)
    transT = transT_ref[...]                                                  # transT[j, i] = trans[i, j]
    exp_trans = exptrans_ref[...]                                             # exp(trans[i, j])

    # int32 sequence-length compare (strict 0/1 prefix mask, mask[0] assumed all 1)
    lengths = jnp.sum(m, axis=0).astype(jnp.int32)[:, None]                   # (B, 1)
    iota_nt = lax.broadcasted_iota(jnp.int32, (Bn, NT), 1)

    def onehot(t):
        return (iota_nt == tags[t][:, None]).astype(jnp.float32)              # (B, NT)

    oh_prev = onehot(0)
    num = jnp.sum(oh_prev * (start + emis[0]), axis=-1, keepdims=True)        # (B, 1)
    num = num + jnp.where(lengths == 1,
                          jnp.sum(oh_prev * end, axis=-1, keepdims=True), 0.0)
    score = start + emis[0]                                                   # (B, NT)

    for t in range(1, Tn):
        oh_t = onehot(t)
        m_t = m[t][:, None]                                                   # (B, 1)

        # numerator: transition + emission for the gold path (VPU one-hot gather)
        trans_row = jnp.sum(transT[None, :, :] * oh_prev[:, None, :], axis=-1)    # (B, NT)
        num = num + m_t * jnp.sum(oh_t * (trans_row + emis[t]),
                                  axis=-1, keepdims=True)
        num = num + jnp.where(lengths == t + 1,
                              jnp.sum(oh_t * end, axis=-1, keepdims=True), 0.0)

        # denominator forward step: log-space matmul form (MXU idle during CRF phase)
        mx = jnp.max(score, axis=-1, keepdims=True)                           # (B, 1)
        p = jnp.exp(score - mx)                                               # (B, NT)
        lse = mx + jnp.log(jnp.dot(p, exp_trans,
                                   preferred_element_type=jnp.float32))       # (B, NT)
        score = jnp.where(m_t > 0.0, lse + emis[t], score)
        oh_prev = oh_t

    score = score + end
    mx = jnp.max(score, axis=-1, keepdims=True)
    denom = mx + jnp.log(jnp.sum(jnp.exp(score - mx), axis=-1, keepdims=True))    # (B, 1)

    llh = num - denom                                                         # (B, 1)
    # per-sequence weights: 1/real_B for real rows, 0 for padded replicas -> reduction='mean'
    loss = -jnp.sum(llh * w_ref[...])
    loss_ref[...] = loss[None, None]


def bilstm_crf_loss(emb2_2d, tags_tb, mask_tb, seq_w, kparams):
    n_in = 4 + len(kparams)
    in_specs = [pl.BlockSpec(memory_space=pltpu.MemorySpace.VMEM) for _ in range(n_in)]
    out = pl.pallas_call(
        bilstm_crf_kernel,
        out_shape=jax.ShapeDtypeStruct((1, 1), jnp.float32),
        in_specs=in_specs,
        out_specs=pl.BlockSpec(memory_space=pltpu.MemorySpace.VMEM),
    )(emb2_2d, tags_tb, mask_tb, seq_w, *kparams)
    return out[0, 0]


# ----------------------- wrapper-side weight re-packing for the fused kernel ---------------
def pack_input_weight(wih_f_t, wih_b_t, h, gp):
    """(E,4H)x2 -> (2E, 4*gp): rows 0..E-1 feed forward-gate lanes [0,h), rows E..2E-1 feed
    backward-gate lanes [h,2h) within each gp-wide (lane-padded) gate block, PyTorch order
    [i, f, g, o]."""
    E = wih_f_t.shape[0]
    blocks = []
    for k in range(4):
        blk = jnp.zeros((2 * E, gp), jnp.float32)
        blk = blk.at[:E, 0:h].set(wih_f_t[:, k * h:(k + 1) * h])
        blk = blk.at[E:, h:2 * h].set(wih_b_t[:, k * h:(k + 1) * h])
        blocks.append(blk)
    return jnp.concatenate(blocks, axis=1)


def pack_recurrent_weight(whh_f_t, whh_b_t, h, gp):
    """(H,4H)x2 -> (2H, 4*gp) block-diagonal recurrent weight matching h=[h_f|h_b] layout,
    with each gate block lane-padded to gp."""
    blocks = []
    for k in range(4):
        blk = jnp.zeros((2 * h, gp), jnp.float32)
        blk = blk.at[:h, 0:h].set(whh_f_t[:, k * h:(k + 1) * h])
        blk = blk.at[h:, h:2 * h].set(whh_b_t[:, k * h:(k + 1) * h])
        blocks.append(blk)
    return jnp.concatenate(blocks, axis=1)


def pack_bias(b_f, b_b, h, gp):
    """(4H,)x2 -> (1, 4*gp) bias in the padded gate layout."""
    blocks = []
    for k in range(4):
        blk = jnp.zeros((gp,), jnp.float32)
        blk = blk.at[0:h].set(b_f[k * h:(k + 1) * h])
        blk = blk.at[h:2 * h].set(b_b[k * h:(k + 1) * h])
        blocks.append(blk)
    return jnp.concatenate(blocks)[None, :]


# --------------------------- pure-JAX reference (for verification) ---------------------------
def ref_forward(emb_tbe, tags_tb, mask_tb, params):
    (wih_f, whh_f, b_f, wih_b, whh_b, b_b, wcf, wcb, bc, start, end, trans) = params
    Tn, Bn, _ = emb_tbe.shape
    H = whh_f.shape[0]
    NT = trans.shape[0]

    def lstm(wih, whh, b, reverse):
        h = jnp.zeros((Bn, H), jnp.float32)
        c = jnp.zeros((Bn, H), jnp.float32)
        hs = [None] * Tn
        order = range(Tn - 1, -1, -1) if reverse else range(Tn)
        for t in order:
            g = emb_tbe[t] @ wih + h @ whh + b
            i = jax.nn.sigmoid(g[:, :H]); f = jax.nn.sigmoid(g[:, H:2 * H])
            gg = jnp.tanh(g[:, 2 * H:3 * H]); o = jax.nn.sigmoid(g[:, 3 * H:])
            c = f * c + i * gg
            h = o * jnp.tanh(c)
            hs[t] = h
        return jnp.stack(hs, 0)

    hf = lstm(wih_f, whh_f, b_f, False)
    hb = lstm(wih_b, whh_b, b_b, True)
    emis = hf @ wcf + hb @ wcb + bc                                        # (T, B, NT)

    onehot = jax.nn.one_hot(tags_tb, NT, dtype=jnp.float32)
    m = mask_tb
    num = (onehot[0] * start).sum(-1) + (onehot[0] * emis[0]).sum(-1)
    for t in range(1, Tn):
        num += m[t] * (((onehot[t - 1] @ trans) * onehot[t]).sum(-1)
                       + (onehot[t] * emis[t]).sum(-1))
    seq_ends = m.sum(0).astype(jnp.int32) - 1
    last_tags = tags_tb[seq_ends, jnp.arange(Bn)]
    num += end[0][last_tags]

    score = start + emis[0]
    for t in range(1, Tn):
        nxt = score[:, :, None] + trans + emis[t][:, None, :]
        nxt = jax.scipy.special.logsumexp(nxt, axis=1)
        score = jnp.where(m[t][:, None] > 0, nxt, score)
    denom = jax.scipy.special.logsumexp(score + end, axis=1)
    return -jnp.mean(num - denom)


# ----------------------------------------- main -----------------------------------------
if __name__ == "__main__":
    key = jax.random.PRNGKey(0)
    ks = jax.random.split(key, 16)

    def u(k, shape, scale):
        return jax.random.uniform(k, shape, jnp.float32, -scale, scale)

    # Embedding (padding_idx=0 row zeroed)
    emb_table = (jax.random.normal(ks[0], (VOCAB, EMBED), jnp.float32) * 0.1).at[0].set(0.0)

    k_lstm = 1.0 / np.sqrt(HIDDEN)
    # forward-direction LSTM params (PyTorch shapes: (4H, in), (4H, H), (4H,))
    w_ih_f = u(ks[1], (4 * HIDDEN, EMBED + FS_NUM), k_lstm)
    w_hh_f = u(ks[2], (4 * HIDDEN, HIDDEN), k_lstm)
    b_ih_f = u(ks[3], (4 * HIDDEN,), k_lstm)
    b_hh_f = u(ks[4], (4 * HIDDEN,), k_lstm)
    # backward-direction LSTM params
    w_ih_b = u(ks[5], (4 * HIDDEN, EMBED + FS_NUM), k_lstm)
    w_hh_b = u(ks[6], (4 * HIDDEN, HIDDEN), k_lstm)
    b_ih_b = u(ks[7], (4 * HIDDEN,), k_lstm)
    b_hh_b = u(ks[8], (4 * HIDDEN,), k_lstm)
    # tocrf linear: (NUM_TAGS, 2H), (NUM_TAGS,)
    k_lin = 1.0 / np.sqrt(2 * HIDDEN)
    w_crf = u(ks[9], (NUM_TAGS, 2 * HIDDEN), k_lin)
    b_crf = u(ks[10], (NUM_TAGS,), k_lin)
    # CRF params (torchcrf init: uniform(-0.1, 0.1))
    start_t = u(ks[11], (NUM_TAGS,), 0.1)
    end_t = u(ks[12], (NUM_TAGS,), 0.1)
    trans_t = u(ks[13], (NUM_TAGS, NUM_TAGS), 0.1)

    # reference-layout params (per direction, plain f32 matrices)
    ref_params = (
        w_ih_f.T, w_hh_f.T, (b_ih_f + b_hh_f)[None, :],
        w_ih_b.T, w_hh_b.T, (b_ih_b + b_hh_b)[None, :],
        w_crf[:, :HIDDEN].T, w_crf[:, HIDDEN:].T, b_crf[None, :],
        start_t[None, :], end_t[None, :], trans_t,
    )

    # kernel-layout params: block-routed / gate-padded / block-diagonal packing, bf16 MXU weights
    wih_blk = pack_input_weight(w_ih_f.T, w_ih_b.T, HIDDEN, GPAD)            # (2E, 4*GPAD)
    whh_blk = pack_recurrent_weight(w_hh_f.T, w_hh_b.T, HIDDEN, GPAD)        # (2H, 4*GPAD)
    b_blk = pack_bias(b_ih_f + b_hh_f, b_ih_b + b_hh_b, HIDDEN, GPAD)        # (1, 4*GPAD)
    kernel_params = (
        wih_blk.astype(jnp.bfloat16), whh_blk.astype(jnp.bfloat16), b_blk,
        w_crf.T.astype(jnp.bfloat16), b_crf[None, :],
        start_t[None, :], end_t[None, :], trans_t.T, jnp.exp(trans_t),
    )

    # deterministic example batch: inputs['input_ids'], inputs['tags'], inputs['attention_mask']
    k_ids, k_tags = ks[14], ks[15]
    lengths = jnp.array([T, 5], dtype=jnp.int32)
    pos = jnp.arange(T)[None, :]
    mask_bt = (pos < lengths[:, None]).astype(jnp.float32)                   # (B, T), first col all 1
    ids_bt = jax.random.randint(k_ids, (B, T), 1, VOCAB)
    ids_bt = jnp.where(mask_bt > 0, ids_bt, 0).astype(jnp.int32)
    tags_bt = jax.random.randint(k_tags, (B, T), 0, NUM_TAGS)
    tags_bt = jnp.where(mask_bt > 0, tags_bt, 0).astype(jnp.int32)

    # ---- pack the batch to B_PAD sequences (replicas weighted 0 -> exact mean over real B) ----
    ridx = jnp.arange(B_PAD) % B
    ids_p = ids_bt[ridx]                                                     # (B_PAD, T)
    tags_p = tags_bt[ridx]
    mask_p = mask_bt[ridx]
    seq_w = jnp.where(jnp.arange(B_PAD) < B, 1.0 / B, 0.0)[:, None].astype(jnp.float32)

    # glue: embedding lookup + batch-first -> time-major; fwd/bwd emb concatenated per step
    emb_bt_p = jnp.take(emb_table, ids_p, axis=0)                            # (B_PAD, T, E)
    emb_tm = jnp.transpose(emb_bt_p, (1, 0, 2)).astype(jnp.float32)          # (T, B_PAD, E)
    emb_rev = emb_tm[::-1]                                                   # time-reversed
    emb2_2d = jnp.concatenate([emb_tm, emb_rev], axis=-1)\
        .reshape(T * B_PAD, 2 * EMBED).astype(jnp.bfloat16)                  # (T*B_PAD, 2E)
    tags_tb_p = jnp.transpose(tags_p, (1, 0))                                # (T, B_PAD)
    mask_tb_p = jnp.transpose(mask_p, (1, 0))                                # (T, B_PAD)

    loss = bilstm_crf_loss(emb2_2d, tags_tb_p, mask_tb_p, seq_w, kernel_params)
    loss = jax.block_until_ready(loss)

    # f32 reference on the real (unpadded) batch
    emb_tbe = jnp.transpose(jnp.take(emb_table, ids_bt, axis=0), (1, 0, 2)).astype(jnp.float32)
    tags_tb = jnp.transpose(tags_bt, (1, 0))
    mask_tb = jnp.transpose(mask_bt, (1, 0))
    ref = ref_forward(emb_tbe, tags_tb, mask_tb, ref_params)

    # bf16 MXU operands (f32 accumulate) widen the error budget slightly vs the pure-f32 ref
    np.testing.assert_allclose(np.asarray(loss), np.asarray(ref), rtol=2e-3, atol=2e-2)
    print("KERNEL_OK")
</pallas_src>

<mosaic_0001>
module attributes {stable_mosaic.version = 11 : i64} {
  func.func @bilstm_crf_kernel(%arg0: memref<64x32xbf16, #tpu.memory_space<vmem>>, %arg1: memref<8x8xi32, #tpu.memory_space<vmem>>, %arg2: memref<8x8xf32, #tpu.memory_space<vmem>>, %arg3: memref<8x1xf32, #tpu.memory_space<vmem>>, %arg4: memref<32x512xbf16, #tpu.memory_space<vmem>>, %arg5: memref<64x512xbf16, #tpu.memory_space<vmem>>, %arg6: memref<1x512xf32, #tpu.memory_space<vmem>>, %arg7: memref<64x6xbf16, #tpu.memory_space<vmem>>, %arg8: memref<1x6xf32, #tpu.memory_space<vmem>>, %arg9: memref<1x6xf32, #tpu.memory_space<vmem>>, %arg10: memref<1x6xf32, #tpu.memory_space<vmem>>, %arg11: memref<6x6xf32, #tpu.memory_space<vmem>>, %arg12: memref<6x6xf32, #tpu.memory_space<vmem>>, %arg13: memref<1x1xf32, #tpu.memory_space<vmem>>) attributes {dimension_semantics = [], scalar_prefetch = 0 : i64, scratch_operands = 0 : i64, tpu.core_type = #tpu.core_type<tc>} {
    %c0 = arith.constant 0 : index
    %c0_0 = arith.constant 0 : index
    %0 = vector.load %arg0[%c0, %c0_0] : memref<64x32xbf16, #tpu.memory_space<vmem>>, vector<64x32xbf16>
    %c0_1 = arith.constant 0 : index
    %c0_2 = arith.constant 0 : index
    %1 = vector.load %arg4[%c0_1, %c0_2] : memref<32x512xbf16, #tpu.memory_space<vmem>>, vector<32x512xbf16>
    %cst = arith.constant dense<0.000000e+00> : vector<64x512xf32>
    %2 = tpu.matmul %0, %1, %cst {dimension_numbers = #tpu.dot_dimension_numbers<[1], [0], [0], [1], [0, 0, 1, 1], [], []>} : vector<64x32xbf16>, vector<32x512xbf16>, vector<64x512xf32> -> vector<64x512xf32>
    %c0_3 = arith.constant 0 : index
    %c0_4 = arith.constant 0 : index
    %3 = vector.load %arg6[%c0_3, %c0_4] : memref<1x512xf32, #tpu.memory_space<vmem>>, vector<1x512xf32>
    %4 = vector.broadcast %3 : vector<1x512xf32> to vector<64x512xf32>
    %5 = arith.addf %2, %4 : vector<64x512xf32>
    %c0_5 = arith.constant 0 : index
    %c0_6 = arith.constant 0 : index
    %6 = vector.load %arg5[%c0_5, %c0_6] : memref<64x512xbf16, #tpu.memory_space<vmem>>, vector<64x512xbf16>
    %cst_7 = arith.constant 0.000000e+00 : f32
    %7 = vector.broadcast %cst_7 : f32 to vector<8x64xf32>
    %cst_8 = arith.constant 0.000000e+00 : f32
    %8 = vector.broadcast %cst_8 : f32 to vector<8x64xf32>
    %9 = arith.truncf %7 : vector<8x64xf32> to vector<8x64xbf16>
    %cst_9 = arith.constant dense<0.000000e+00> : vector<8x512xf32>
    %10 = tpu.matmul %9, %6, %cst_9 {dimension_numbers = #tpu.dot_dimension_numbers<[1], [0], [0], [1], [0, 0, 1, 1], [], []>} : vector<8x64xbf16>, vector<64x512xbf16>, vector<8x512xf32> -> vector<8x512xf32>
    %11 = vector.extract_strided_slice %5 {offsets = [0, 0], sizes = [8, 512], strides = [1, 1]} : vector<64x512xf32> to vector<8x512xf32>
    %12 = arith.addf %10, %11 : vector<8x512xf32>
    %13 = vector.extract_strided_slice %12 {offsets = [0, 0], sizes = [8, 64], strides = [1, 1]} : vector<8x512xf32> to vector<8x64xf32>
    %14 = arith.negf %13 : vector<8x64xf32>
    %15 = math.exp %14 : vector<8x64xf32>
    %cst_10 = arith.constant 1.000000e+00 : f32
    %16 = vector.broadcast %cst_10 : f32 to vector<8x64xf32>
    %17 = arith.addf %16, %15 : vector<8x64xf32>
    %18 = arith.divf %16, %17 : vector<8x64xf32>
    %19 = vector.extract_strided_slice %12 {offsets = [0, 128], sizes = [8, 64], strides = [1, 1]} : vector<8x512xf32> to vector<8x64xf32>
    %20 = arith.negf %19 : vector<8x64xf32>
    %21 = math.exp %20 : vector<8x64xf32>
    %cst_11 = arith.constant 1.000000e+00 : f32
    %22 = vector.broadcast %cst_11 : f32 to vector<8x64xf32>
    %23 = arith.addf %22, %21 : vector<8x64xf32>
    %24 = arith.divf %22, %23 : vector<8x64xf32>
    %25 = vector.extract_strided_slice %12 {offsets = [0, 256], sizes = [8, 64], strides = [1, 1]} : vector<8x512xf32> to vector<8x64xf32>
    %26 = math.tanh %25 : vector<8x64xf32>
    %27 = vector.extract_strided_slice %12 {offsets = [0, 384], sizes = [8, 64], strides = [1, 1]} : vector<8x512xf32> to vector<8x64xf32>
    %28 = arith.negf %27 : vector<8x64xf32>
    %29 = math.exp %28 : vector<8x64xf32>
    %cst_12 = arith.constant 1.000000e+00 : f32
    %30 = vector.broadcast %cst_12 : f32 to vector<8x64xf32>
    %31 = arith.addf %30, %29 : vector<8x64xf32>
    %32 = arith.divf %30, %31 : vector<8x64xf32>
    %33 = arith.mulf %24, %8 : vector<8x64xf32>
    %34 = arith.mulf %18, %26 : vector<8x64xf32>
    %35 = arith.addf %33, %34 : vector<8x64xf32>
    %36 = math.tanh %35 : vector<8x64xf32>
    %37 = arith.mulf %32, %36 : vector<8x64xf32>
    %38 = vector.extract_strided_slice %37 {offsets = [0, 0], sizes = [8, 32], strides = [1, 1]} : vector<8x64xf32> to vector<8x32xf32>
    %39 = vector.extract_strided_slice %37 {offsets = [0, 32], sizes = [8, 32], strides = [1, 1]} : vector<8x64xf32> to vector<8x32xf32>
    %40 = arith.truncf %37 : vector<8x64xf32> to vector<8x64xbf16>
    %cst_13 = arith.constant dense<0.000000e+00> : vector<8x512xf32>
    %41 = tpu.matmul %40, %6, %cst_13 {dimension_numbers = #tpu.dot_dimension_numbers<[1], [0], [0], [1], [0, 0, 1, 1], [], []>} : vector<8x64xbf16>, vector<64x512xbf16>, vector<8x512xf32> -> vector<8x512xf32>
    %42 = vector.extract_strided_slice %5 {offsets = [8, 0], sizes = [8, 512], strides = [1, 1]} : vector<64x512xf32> to vector<8x512xf32>
    %43 = arith.addf %41, %42 : vector<8x512xf32>
    %44 = vector.extract_strided_slice %43 {offsets = [0, 0], sizes = [8, 64], strides = [1, 1]} : vector<8x512xf32> to vector<8x64xf32>
    %45 = arith.negf %44 : vector<8x64xf32>
    %46 = math.exp %45 : vector<8x64xf32>
    %cst_14 = arith.constant 1.000000e+00 : f32
    %47 = vector.broadcast %cst_14 : f32 to vector<8x64xf32>
    %48 = arith.addf %47, %46 : vector<8x64xf32>
    %49 = arith.divf %47, %48 : vector<8x64xf32>
    %50 = vector.extract_strided_slice %43 {offsets = [0, 128], sizes = [8, 64], strides = [1, 1]} : vector<8x512xf32> to vector<8x64xf32>
    %51 = arith.negf %50 : vector<8x64xf32>
    %52 = math.exp %51 : vector<8x64xf32>
    %cst_15 = arith.constant 1.000000e+00 : f32
    %53 = vector.broadcast %cst_15 : f32 to vector<8x64xf32>
    %54 = arith.addf %53, %52 : vector<8x64xf32>
    %55 = arith.divf %53, %54 : vector<8x64xf32>
    %56 = vector.extract_strided_slice %43 {offsets = [0, 256], sizes = [8, 64], strides = [1, 1]} : vector<8x512xf32> to vector<8x64xf32>
    %57 = math.tanh %56 : vector<8x64xf32>
    %58 = vector.extract_strided_slice %43 {offsets = [0, 384], sizes = [8, 64], strides = [1, 1]} : vector<8x512xf32> to vector<8x64xf32>
    %59 = arith.negf %58 : vector<8x64xf32>
    %60 = math.exp %59 : vector<8x64xf32>
    %cst_16 = arith.constant 1.000000e+00 : f32
    %61 = vector.broadcast %cst_16 : f32 to vector<8x64xf32>
    %62 = arith.addf %61, %60 : vector<8x64xf32>
    %63 = arith.divf %61, %62 : vector<8x64xf32>
    %64 = arith.mulf %55, %35 : vector<8x64xf32>
    %65 = arith.mulf %49, %57 : vector<8x64xf32>
    %66 = arith.addf %64, %65 : vector<8x64xf32>
    %67 = math.tanh %66 : vector<8x64xf32>
    %68 = arith.mulf %63, %67 : vector<8x64xf32>
    %69 = vector.extract_strided_slice %68 {offsets = [0, 0], sizes = [8, 32], strides = [1, 1]} : vector<8x64xf32> to vector<8x32xf32>
    %70 = vector.extract_strided_slice %68 {offsets = [0, 32], sizes = [8, 32], strides = [1, 1]} : vector<8x64xf32> to vector<8x32xf32>
    %71 = arith.truncf %68 : vector<8x64xf32> to vector<8x64xbf16>
    %cst_17 = arith.constant dense<0.000000e+00> : vector<8x512xf32>
    %72 = tpu.matmul %71, %6, %cst_17 {dimension_numbers = #tpu.dot_dimension_numbers<[1], [0], [0], [1], [0, 0, 1, 1], [], []>} : vector<8x64xbf16>, vector<64x512xbf16>, vector<8x512xf32> -> vector<8x512xf32>
    %73 = vector.extract_strided_slice %5 {offsets = [16, 0], sizes = [8, 512], strides = [1, 1]} : vector<64x512xf32> to vector<8x512xf32>
    %74 = arith.addf %72, %73 : vector<8x512xf32>
    %75 = vector.extract_strided_slice %74 {offsets = [0, 0], sizes = [8, 64], strides = [1, 1]} : vector<8x512xf32> to vector<8x64xf32>
    %76 = arith.negf %75 : vector<8x64xf32>
    %77 = math.exp %76 : vector<8x64xf32>
    %cst_18 = arith.constant 1.000000e+00 : f32
    %78 = vector.broadcast %cst_18 : f32 to vector<8x64xf32>
    %79 = arith.addf %78, %77 : vector<8x64xf32>
    %80 = arith.divf %78, %79 : vector<8x64xf32>
    %81 = vector.extract_strided_slice %74 {offsets = [0, 128], sizes = [8, 64], strides = [1, 1]} : vector<8x512xf32> to vector<8x64xf32>
    %82 = arith.negf %81 : vector<8x64xf32>
    %83 = math.exp %82 : vector<8x64xf32>
    %cst_19 = arith.constant 1.000000e+00 : f32
    %84 = vector.broadcast %cst_19 : f32 to vector<8x64xf32>
    %85 = arith.addf %84, %83 : vector<8x64xf32>
    %86 = arith.divf %84, %85 : vector<8x64xf32>
    %87 = vector.extract_strided_slice %74 {offsets = [0, 256], sizes = [8, 64], strides = [1, 1]} : vector<8x512xf32> to vector<8x64xf32>
    %88 = math.tanh %87 : vector<8x64xf32>
    %89 = vector.extract_strided_slice %74 {offsets = [0, 384], sizes = [8, 64], strides = [1, 1]} : vector<8x512xf32> to vector<8x64xf32>
    %90 = arith.negf %89 : vector<8x64xf32>
    %91 = math.exp %90 : vector<8x64xf32>
    %cst_20 = arith.constant 1.000000e+00 : f32
    %92 = vector.broadcast %cst_20 : f32 to vector<8x64xf32>
    %93 = arith.addf %92, %91 : vector<8x64xf32>
    %94 = arith.divf %92, %93 : vector<8x64xf32>
    %95 = arith.mulf %86, %66 : vector<8x64xf32>
    %96 = arith.mulf %80, %88 : vector<8x64xf32>
    %97 = arith.addf %95, %96 : vector<8x64xf32>
    %98 = math.tanh %97 : vector<8x64xf32>
    %99 = arith.mulf %94, %98 : vector<8x64xf32>
    %100 = vector.extract_strided_slice %99 {offsets = [0, 0], sizes = [8, 32], strides = [1, 1]} : vector<8x64xf32> to vector<8x32xf32>
    %101 = vector.extract_strided_slice %99 {offsets = [0, 32], sizes = [8, 32], strides = [1, 1]} : vector<8x64xf32> to vector<8x32xf32>
    %102 = arith.truncf %99 : vector<8x64xf32> to vector<8x64xbf16>
    %cst_21 = arith.constant dense<0.000000e+00> : vector<8x512xf32>
    %103 = tpu.matmul %102, %6, %cst_21 {dimension_numbers = #tpu.dot_dimension_numbers<[1], [0], [0], [1], [0, 0, 1, 1], [], []>} : vector<8x64xbf16>, vector<64x512xbf16>, vector<8x512xf32> -> vector<8x512xf32>
    %104 = vector.extract_strided_slice %5 {offsets = [24, 0], sizes = [8, 512], strides = [1, 1]} : vector<64x512xf32> to vector<8x512xf32>
    %105 = arith.addf %103, %104 : vector<8x512xf32>
    %106 = vector.extract_strided_slice %105 {offsets = [0, 0], sizes = [8, 64], strides = [1, 1]} : vector<8x512xf32> to vector<8x64xf32>
    %107 = arith.negf %106 : vector<8x64xf32>
    %108 = math.exp %107 : vector<8x64xf32>
    %cst_22 = arith.constant 1.000000e+00 : f32
    %109 = vector.broadcast %cst_22 : f32 to vector<8x64xf32>
    %110 = arith.addf %109, %108 : vector<8x64xf32>
    %111 = arith.divf %109, %110 : vector<8x64xf32>
    %112 = vector.extract_strided_slice %105 {offsets = [0, 128], sizes = [8, 64], strides = [1, 1]} : vector<8x512xf32> to vector<8x64xf32>
    %113 = arith.negf %112 : vector<8x64xf32>
    %114 = math.exp %113 : vector<8x64xf32>
    %cst_23 = arith.constant 1.000000e+00 : f32
    %115 = vector.broadcast %cst_23 : f32 to vector<8x64xf32>
    %116 = arith.addf %115, %114 : vector<8x64xf32>
    %117 = arith.divf %115, %116 : vector<8x64xf32>
    %118 = vector.extract_strided_slice %105 {offsets = [0, 256], sizes = [8, 64], strides = [1, 1]} : vector<8x512xf32> to vector<8x64xf32>
    %119 = math.tanh %118 : vector<8x64xf32>
    %120 = vector.extract_strided_slice %105 {offsets = [0, 384], sizes = [8, 64], strides = [1, 1]} : vector<8x512xf32> to vector<8x64xf32>
    %121 = arith.negf %120 : vector<8x64xf32>
    %122 = math.exp %121 : vector<8x64xf32>
    %cst_24 = arith.constant 1.000000e+00 : f32
    %123 = vector.broadcast %cst_24 : f32 to vector<8x64xf32>
    %124 = arith.addf %123, %122 : vector<8x64xf32>
    %125 = arith.divf %123, %124 : vector<8x64xf32>
    %126 = arith.mulf %117, %97 : vector<8x64xf32>
    %127 = arith.mulf %111, %119 : vector<8x64xf32>
    %128 = arith.addf %126, %127 : vector<8x64xf32>
    %129 = math.tanh %128 : vector<8x64xf32>
    %130 = arith.mulf %125, %129 : vector<8x64xf32>
    %131 = vector.extract_strided_slice %130 {offsets = [0, 0], sizes = [8, 32], strides = [1, 1]} : vector<8x64xf32> to vector<8x32xf32>
    %132 = vector.extract_strided_slice %130 {offsets = [0, 32], sizes = [8, 32], strides = [1, 1]} : vector<8x64xf32> to vector<8x32xf32>
    %133 = arith.truncf %130 : vector<8x64xf32> to vector<8x64xbf16>
    %cst_25 = arith.constant dense<0.000000e+00> : vector<8x512xf32>
    %134 = tpu.matmul %133, %6, %cst_25 {dimension_numbers = #tpu.dot_dimension_numbers<[1], [0], [0], [1], [0, 0, 1, 1], [], []>} : vector<8x64xbf16>, vector<64x512xbf16>, vector<8x512xf32> -> vector<8x512xf32>
    %135 = vector.extract_strided_slice %5 {offsets = [32, 0], sizes = [8, 512], strides = [1, 1]} : vector<64x512xf32> to vector<8x512xf32>
    %136 = arith.addf %134, %135 : vector<8x512xf32>
    %137 = vector.extract_strided_slice %136 {offsets = [0, 0], sizes = [8, 64], strides = [1, 1]} : vector<8x512xf32> to vector<8x64xf32>
    %138 = arith.negf %137 : vector<8x64xf32>
    %139 = math.exp %138 : vector<8x64xf32>
    %cst_26 = arith.constant 1.000000e+00 : f32
    %140 = vector.broadcast %cst_26 : f32 to vector<8x64xf32>
    %141 = arith.addf %140, %139 : vector<8x64xf32>
    %142 = arith.divf %140, %141 : vector<8x64xf32>
    %143 = vector.extract_strided_slice %136 {offsets = [0, 128], sizes = [8, 64], strides = [1, 1]} : vector<8x512xf32> to vector<8x64xf32>
    %144 = arith.negf %143 : vector<8x64xf32>
    %145 = math.exp %144 : vector<8x64xf32>
    %cst_27 = arith.constant 1.000000e+00 : f32
    %146 = vector.broadcast %cst_27 : f32 to vector<8x64xf32>
    %147 = arith.addf %146, %145 : vector<8x64xf32>
    %148 = arith.divf %146, %147 : vector<8x64xf32>
    %149 = vector.extract_strided_slice %136 {offsets = [0, 256], sizes = [8, 64], strides = [1, 1]} : vector<8x512xf32> to vector<8x64xf32>
    %150 = math.tanh %149 : vector<8x64xf32>
    %151 = vector.extract_strided_slice %136 {offsets = [0, 384], sizes = [8, 64], strides = [1, 1]} : vector<8x512xf32> to vector<8x64xf32>
    %152 = arith.negf %151 : vector<8x64xf32>
    %153 = math.exp %152 : vector<8x64xf32>
    %cst_28 = arith.constant 1.000000e+00 : f32
    %154 = vector.broadcast %cst_28 : f32 to vector<8x64xf32>
    %155 = arith.addf %154, %153 : vector<8x64xf32>
    %156 = arith.divf %154, %155 : vector<8x64xf32>
    %157 = arith.mulf %148, %128 : vector<8x64xf32>
    %158 = arith.mulf %142, %150 : vector<8x64xf32>
    %159 = arith.addf %157, %158 : vector<8x64xf32>
    %160 = math.tanh %159 : vector<8x64xf32>
    %161 = arith.mulf %156, %160 : vector<8x64xf32>
    %162 = vector.extract_strided_slice %161 {offsets = [0, 0], sizes = [8, 32], strides = [1, 1]} : vector<8x64xf32> to vector<8x32xf32>
    %163 = vector.extract_strided_slice %161 {offsets = [0, 32], sizes = [8, 32], strides = [1, 1]} : vector<8x64xf32> to vector<8x32xf32>
    %164 = arith.truncf %161 : vector<8x64xf32> to vector<8x64xbf16>
    %cst_29 = arith.constant dense<0.000000e+00> : vector<8x512xf32>
    %165 = tpu.matmul %164, %6, %cst_29 {dimension_numbers = #tpu.dot_dimension_numbers<[1], [0], [0], [1], [0, 0, 1, 1], [], []>} : vector<8x64xbf16>, vector<64x512xbf16>, vector<8x512xf32> -> vector<8x512xf32>
    %166 = vector.extract_strided_slice %5 {offsets = [40, 0], sizes = [8, 512], strides = [1, 1]} : vector<64x512xf32> to vector<8x512xf32>
    %167 = arith.addf %165, %166 : vector<8x512xf32>
    %168 = vector.extract_strided_slice %167 {offsets = [0, 0], sizes = [8, 64], strides = [1, 1]} : vector<8x512xf32> to vector<8x64xf32>
    %169 = arith.negf %168 : vector<8x64xf32>
    %170 = math.exp %169 : vector<8x64xf32>
    %cst_30 = arith.constant 1.000000e+00 : f32
    %171 = vector.broadcast %cst_30 : f32 to vector<8x64xf32>
    %172 = arith.addf %171, %170 : vector<8x64xf32>
    %173 = arith.divf %171, %172 : vector<8x64xf32>
    %174 = vector.extract_strided_slice %167 {offsets = [0, 128], sizes = [8, 64], strides = [1, 1]} : vector<8x512xf32> to vector<8x64xf32>
    %175 = arith.negf %174 : vector<8x64xf32>
    %176 = math.exp %175 : vector<8x64xf32>
    %cst_31 = arith.constant 1.000000e+00 : f32
    %177 = vector.broadcast %cst_31 : f32 to vector<8x64xf32>
    %178 = arith.addf %177, %176 : vector<8x64xf32>
    %179 = arith.divf %177, %178 : vector<8x64xf32>
    %180 = vector.extract_strided_slice %167 {offsets = [0, 256], sizes = [8, 64], strides = [1, 1]} : vector<8x512xf32> to vector<8x64xf32>
    %181 = math.tanh %180 : vector<8x64xf32>
    %182 = vector.extract_strided_slice %167 {offsets = [0, 384], sizes = [8, 64], strides = [1, 1]} : vector<8x512xf32> to vector<8x64xf32>
    %183 = arith.negf %182 : vector<8x64xf32>
    %184 = math.exp %183 : vector<8x64xf32>
    %cst_32 = arith.constant 1.000000e+00 : f32
    %185 = vector.broadcast %cst_32 : f32 to vector<8x64xf32>
    %186 = arith.addf %185, %184 : vector<8x64xf32>
    %187 = arith.divf %185, %186 : vector<8x64xf32>
    %188 = arith.mulf %179, %159 : vector<8x64xf32>
    %189 = arith.mulf %173, %181 : vector<8x64xf32>
    %190 = arith.addf %188, %189 : vector<8x64xf32>
    %191 = math.tanh %190 : vector<8x64xf32>
    %192 = arith.mulf %187, %191 : vector<8x64xf32>
    %193 = vector.extract_strided_slice %192 {offsets = [0, 0], sizes = [8, 32], strides = [1, 1]} : vector<8x64xf32> to vector<8x32xf32>
    %194 = vector.extract_strided_slice %192 {offsets = [0, 32], sizes = [8, 32], strides = [1, 1]} : vector<8x64xf32> to vector<8x32xf32>
    %195 = arith.truncf %192 : vector<8x64xf32> to vector<8x64xbf16>
    %cst_33 = arith.constant dense<0.000000e+00> : vector<8x512xf32>
    %196 = tpu.matmul %195, %6, %cst_33 {dimension_numbers = #tpu.dot_dimension_numbers<[1], [0], [0], [1], [0, 0, 1, 1], [], []>} : vector<8x64xbf16>, vector<64x512xbf16>, vector<8x512xf32> -> vector<8x512xf32>
    %197 = vector.extract_strided_slice %5 {offsets = [48, 0], sizes = [8, 512], strides = [1, 1]} : vector<64x512xf32> to vector<8x512xf32>
    %198 = arith.addf %196, %197 : vector<8x512xf32>
    %199 = vector.extract_strided_slice %198 {offsets = [0, 0], sizes = [8, 64], strides = [1, 1]} : vector<8x512xf32> to vector<8x64xf32>
    %200 = arith.negf %199 : vector<8x64xf32>
    %201 = math.exp %200 : vector<8x64xf32>
    %cst_34 = arith.constant 1.000000e+00 : f32
    %202 = vector.broadcast %cst_34 : f32 to vector<8x64xf32>
    %203 = arith.addf %202, %201 : vector<8x64xf32>
    %204 = arith.divf %202, %203 : vector<8x64xf32>
    %205 = vector.extract_strided_slice %198 {offsets = [0, 128], sizes = [8, 64], strides = [1, 1]} : vector<8x512xf32> to vector<8x64xf32>
    %206 = arith.negf %205 : vector<8x64xf32>
    %207 = math.exp %206 : vector<8x64xf32>
    %cst_35 = arith.constant 1.000000e+00 : f32
    %208 = vector.broadcast %cst_35 : f32 to vector<8x64xf32>
    %209 = arith.addf %208, %207 : vector<8x64xf32>
    %210 = arith.divf %208, %209 : vector<8x64xf32>
    %211 = vector.extract_strided_slice %198 {offsets = [0, 256], sizes = [8, 64], strides = [1, 1]} : vector<8x512xf32> to vector<8x64xf32>
    %212 = math.tanh %211 : vector<8x64xf32>
    %213 = vector.extract_strided_slice %198 {offsets = [0, 384], sizes = [8, 64], strides = [1, 1]} : vector<8x512xf32> to vector<8x64xf32>
    %214 = arith.negf %213 : vector<8x64xf32>
    %215 = math.exp %214 : vector<8x64xf32>
    %cst_36 = arith.constant 1.000000e+00 : f32
    %216 = vector.broadcast %cst_36 : f32 to vector<8x64xf32>
    %217 = arith.addf %216, %215 : vector<8x64xf32>
    %218 = arith.divf %216, %217 : vector<8x64xf32>
    %219 = arith.mulf %210, %190 : vector<8x64xf32>
    %220 = arith.mulf %204, %212 : vector<8x64xf32>
    %221 = arith.addf %219, %220 : vector<8x64xf32>
    %222 = math.tanh %221 : vector<8x64xf32>
    %223 = arith.mulf %218, %222 : vector<8x64xf32>
    %224 = vector.extract_strided_slice %223 {offsets = [0, 0], sizes = [8, 32], strides = [1, 1]} : vector<8x64xf32> to vector<8x32xf32>
    %225 = vector.extract_strided_slice %223 {offsets = [0, 32], sizes = [8, 32], strides = [1, 1]} : vector<8x64xf32> to vector<8x32xf32>
    %226 = arith.truncf %223 : vector<8x64xf32> to vector<8x64xbf16>
    %cst_37 = arith.constant dense<0.000000e+00> : vector<8x512xf32>
    %227 = tpu.matmul %226, %6, %cst_37 {dimension_numbers = #tpu.dot_dimension_numbers<[1], [0], [0], [1], [0, 0, 1, 1], [], []>} : vector<8x64xbf16>, vector<64x512xbf16>, vector<8x512xf32> -> vector<8x512xf32>
    %228 = vector.extract_strided_slice %5 {offsets = [56, 0], sizes = [8, 512], strides = [1, 1]} : vector<64x512xf32> to vector<8x512xf32>
    %229 = arith.addf %227, %228 : vector<8x512xf32>
    %230 = vector.extract_strided_slice %229 {offsets = [0, 0], sizes = [8, 64], strides = [1, 1]} : vector<8x512xf32> to vector<8x64xf32>
    %231 = arith.negf %230 : vector<8x64xf32>
    %232 = math.exp %231 : vector<8x64xf32>
    %cst_38 = arith.constant 1.000000e+00 : f32
    %233 = vector.broadcast %cst_38 : f32 to vector<8x64xf32>
    %234 = arith.addf %233, %232 : vector<8x64xf32>
    %235 = arith.divf %233, %234 : vector<8x64xf32>
    %236 = vector.extract_strided_slice %229 {offsets = [0, 128], sizes = [8, 64], strides = [1, 1]} : vector<8x512xf32> to vector<8x64xf32>
    %237 = arith.negf %236 : vector<8x64xf32>
    %238 = math.exp %237 : vector<8x64xf32>
    %cst_39 = arith.constant 1.000000e+00 : f32
    %239 = vector.broadcast %cst_39 : f32 to vector<8x64xf32>
    %240 = arith.addf %239, %238 : vector<8x64xf32>
    %241 = arith.divf %239, %240 : vector<8x64xf32>
    %242 = vector.extract_strided_slice %229 {offsets = [0, 256], sizes = [8, 64], strides = [1, 1]} : vector<8x512xf32> to vector<8x64xf32>
    %243 = math.tanh %242 : vector<8x64xf32>
    %244 = vector.extract_strided_slice %229 {offsets = [0, 384], sizes = [8, 64], strides = [1, 1]} : vector<8x512xf32> to vector<8x64xf32>
    %245 = arith.negf %244 : vector<8x64xf32>
    %246 = math.exp %245 : vector<8x64xf32>
    %cst_40 = arith.constant 1.000000e+00 : f32
    %247 = vector.broadcast %cst_40 : f32 to vector<8x64xf32>
    %248 = arith.addf %247, %246 : vector<8x64xf32>
    %249 = arith.divf %247, %248 : vector<8x64xf32>
    %250 = arith.mulf %241, %221 : vector<8x64xf32>
    %251 = arith.mulf %235, %243 : vector<8x64xf32>
    %252 = arith.addf %250, %251 : vector<8x64xf32>
    %253 = math.tanh %252 : vector<8x64xf32>
    %254 = arith.mulf %249, %253 : vector<8x64xf32>
    %255 = vector.extract_strided_slice %254 {offsets = [0, 0], sizes = [8, 32], strides = [1, 1]} : vector<8x64xf32> to vector<8x32xf32>
    %256 = vector.extract_strided_slice %254 {offsets = [0, 32], sizes = [8, 32], strides = [1, 1]} : vector<8x64xf32> to vector<8x32xf32>
    %257 = tpu.concatenate %38, %69, %100, %131, %162, %193, %224, %255 in 0 : vector<8x32xf32>, vector<8x32xf32>, vector<8x32xf32>, vector<8x32xf32>, vector<8x32xf32>, vector<8x32xf32>, vector<8x32xf32>, vector<8x32xf32> -> vector<64x32xf32>
    %258 = tpu.concatenate %256, %225, %194, %163, %132, %101, %70, %39 in 0 : vector<8x32xf32>, vector<8x32xf32>, vector<8x32xf32>, vector<8x32xf32>, vector<8x32xf32>, vector<8x32xf32>, vector<8x32xf32>, vector<8x32xf32> -> vector<64x32xf32>
    %259 = tpu.concatenate %257, %258 in 1 : vector<64x32xf32>, vector<64x32xf32> -> vector<64x64xf32>
    %260 = arith.truncf %259 : vector<64x64xf32> to vector<64x64xbf16>
    %c0_41 = arith.constant 0 : index
    %c0_42 = arith.constant 0 : index
    %261 = vector.load %arg7[%c0_41, %c0_42] : memref<64x6xbf16, #tpu.memory_space<vmem>>, vector<64x6xbf16>
    %cst_43 = arith.constant dense<0.000000e+00> : vector<64x6xf32>
    %262 = tpu.matmul %260, %261, %cst_43 {dimension_numbers = #tpu.dot_dimension_numbers<[1], [0], [0], [1], [0, 0, 1, 1], [], []>} : vector<64x64xbf16>, vector<64x6xbf16>, vector<64x6xf32> -> vector<64x6xf32>
    %c0_44 = arith.constant 0 : index
    %c0_45 = arith.constant 0 : index
    %263 = vector.load %arg8[%c0_44, %c0_45] : memref<1x6xf32, #tpu.memory_space<vmem>>, vector<1x6xf32>
    %264 = vector.broadcast %263 : vector<1x6xf32> to vector<64x6xf32>
    %265 = arith.addf %262, %264 : vector<64x6xf32>
    %266 = vector.extract_strided_slice %265 {offsets = [0, 0], sizes = [8, 6], strides = [1, 1]} : vector<64x6xf32> to vector<8x6xf32>
    %267 = vector.extract_strided_slice %265 {offsets = [8, 0], sizes = [8, 6], strides = [1, 1]} : vector<64x6xf32> to vector<8x6xf32>
    %268 = vector.extract_strided_slice %265 {offsets = [16, 0], sizes = [8, 6], strides = [1, 1]} : vector<64x6xf32> to vector<8x6xf32>
    %269 = vector.extract_strided_slice %265 {offsets = [24, 0], sizes = [8, 6], strides = [1, 1]} : vector<64x6xf32> to vector<8x6xf32>
    %270 = vector.extract_strided_slice %265 {offsets = [32, 0], sizes = [8, 6], strides = [1, 1]} : vector<64x6xf32> to vector<8x6xf32>
    %271 = vector.extract_strided_slice %265 {offsets = [40, 0], sizes = [8, 6], strides = [1, 1]} : vector<64x6xf32> to vector<8x6xf32>
    %272 = vector.extract_strided_slice %265 {offsets = [48, 0], sizes = [8, 6], strides = [1, 1]} : vector<64x6xf32> to vector<8x6xf32>
    %273 = vector.extract_strided_slice %265 {offsets = [56, 0], sizes = [8, 6], strides = [1, 1]} : vector<64x6xf32> to vector<8x6xf32>
    %c0_46 = arith.constant 0 : index
    %c0_47 = arith.constant 0 : index
    %274 = vector.load %arg1[%c0_46, %c0_47] : memref<8x8xi32, #tpu.memory_space<vmem>>, vector<8x8xi32>
    %c0_48 = arith.constant 0 : index
    %c0_49 = arith.constant 0 : index
    %275 = vector.load %arg2[%c0_48, %c0_49] : memref<8x8xf32, #tpu.memory_space<vmem>>, vector<8x8xf32>
    %c0_50 = arith.constant 0 : index
    %c0_51 = arith.constant 0 : index
    %276 = vector.load %arg9[%c0_50, %c0_51] : memref<1x6xf32, #tpu.memory_space<vmem>>, vector<1x6xf32>
    %c0_52 = arith.constant 0 : index
    %c0_53 = arith.constant 0 : index
    %277 = vector.load %arg10[%c0_52, %c0_53] : memref<1x6xf32, #tpu.memory_space<vmem>>, vector<1x6xf32>
    %c0_54 = arith.constant 0 : index
    %c0_55 = arith.constant 0 : index
    %278 = vector.load %arg11[%c0_54, %c0_55] : memref<6x6xf32, #tpu.memory_space<vmem>>, vector<6x6xf32>
    %c0_56 = arith.constant 0 : index
    %c0_57 = arith.constant 0 : index
    %279 = vector.load %arg12[%c0_56, %c0_57] : memref<6x6xf32, #tpu.memory_space<vmem>>, vector<6x6xf32>
    %cst_58 = arith.constant dense<0.000000e+00> : vector<8xf32>
    %280 = vector.multi_reduction <add>, %275, %cst_58 [0] : vector<8x8xf32> to vector<8xf32>
    %281 = arith.fptosi %280 : vector<8xf32> to vector<8xi32>
    %282 = vector.shape_cast %281 : vector<8xi32> to vector<8x1xi32>
    %283 = tpu.iota {dimensions = array<i32: 1>} : vector<8x6xi32>
    %284 = vector.extract_strided_slice %274 {offsets = [0, 0], sizes = [1, 8], strides = [1, 1]} : vector<8x8xi32> to vector<1x8xi32>
    %285 = vector.shape_cast %284 : vector<1x8xi32> to vector<8xi32>
    %286 = vector.shape_cast %285 : vector<8xi32> to vector<8x1xi32>
    %287 = vector.broadcast %286 : vector<8x1xi32> to vector<8x6xi32>
    %288 = arith.cmpi eq, %283, %287 : vector<8x6xi32>
    %289 = arith.extui %288 : vector<8x6xi1> to vector<8x6xi32>
    %290 = arith.sitofp %289 : vector<8x6xi32> to vector<8x6xf32>
    %291 = vector.broadcast %276 : vector<1x6xf32> to vector<8x6xf32>
    %292 = arith.addf %291, %266 : vector<8x6xf32>
    %293 = arith.mulf %290, %292 : vector<8x6xf32>
    %cst_59 = arith.constant dense<0.000000e+00> : vector<8xf32>
    %294 = vector.multi_reduction <add>, %293, %cst_59 [1] : vector<8x6xf32> to vector<8xf32>
    %295 = vector.shape_cast %294 : vector<8xf32> to vector<8x1xf32>
    %c1_i32 = arith.constant 1 : i32
    %296 = vector.broadcast %c1_i32 : i32 to vector<8x1xi32>
    %297 = arith.cmpi eq, %282, %296 : vector<8x1xi32>
    %298 = vector.broadcast %277 : vector<1x6xf32> to vector<8x6xf32>
    %299 = arith.mulf %290, %298 : vector<8x6xf32>
    %cst_60 = arith.constant dense<0.000000e+00> : vector<8xf32>
    %300 = vector.multi_reduction <add>, %299, %cst_60 [1] : vector<8x6xf32> to vector<8xf32>
    %301 = vector.shape_cast %300 : vector<8xf32> to vector<8x1xf32>
    %cst_61 = arith.constant 0.000000e+00 : f32
    %302 = vector.broadcast %cst_61 : f32 to vector<8x1xf32>
    %303 = arith.select %297, %301, %302 : vector<8x1xi1>, vector<8x1xf32>
    %304 = arith.addf %295, %303 : vector<8x1xf32>
    %305 = vector.broadcast %276 : vector<1x6xf32> to vector<8x6xf32>
    %306 = arith.addf %305, %266 : vector<8x6xf32>
    %307 = vector.extract_strided_slice %274 {offsets = [1, 0], sizes = [1, 8], strides = [1, 1]} : vector<8x8xi32> to vector<1x8xi32>
    %308 = vector.shape_cast %307 : vector<1x8xi32> to vector<8xi32>
    %309 = vector.shape_cast %308 : vector<8xi32> to vector<8x1xi32>
    %310 = vector.broadcast %309 : vector<8x1xi32> to vector<8x6xi32>
    %311 = arith.cmpi eq, %283, %310 : vector<8x6xi32>
    %312 = arith.extui %311 : vector<8x6xi1> to vector<8x6xi32>
    %313 = arith.sitofp %312 : vector<8x6xi32> to vector<8x6xf32>
    %314 = vector.extract_strided_slice %275 {offsets = [1, 0], sizes = [1, 8], strides = [1, 1]} : vector<8x8xf32> to vector<1x8xf32>
    %315 = vector.shape_cast %314 : vector<1x8xf32> to vector<8xf32>
    %316 = vector.shape_cast %315 : vector<8xf32> to vector<8x1xf32>
    %317 = vector.shape_cast %278 : vector<6x6xf32> to vector<1x6x6xf32>
    %318 = vector.shape_cast %290 : vector<8x6xf32> to vector<8x1x6xf32>
    %319 = vector.broadcast %317 : vector<1x6x6xf32> to vector<8x6x6xf32>
    %320 = vector.broadcast %318 : vector<8x1x6xf32> to vector<8x6x6xf32>
    %321 = arith.mulf %319, %320 : vector<8x6x6xf32>
    %cst_62 = arith.constant dense<0.000000e+00> : vector<8x6xf32>
    %322 = vector.multi_reduction <add>, %321, %cst_62 [2] : vector<8x6x6xf32> to vector<8x6xf32>
    %323 = arith.addf %322, %267 : vector<8x6xf32>
    %324 = arith.mulf %313, %323 : vector<8x6xf32>
    %cst_63 = arith.constant dense<0.000000e+00> : vector<8xf32>
    %325 = vector.multi_reduction <add>, %324, %cst_63 [1] : vector<8x6xf32> to vector<8xf32>
    %326 = vector.shape_cast %325 : vector<8xf32> to vector<8x1xf32>
    %327 = arith.mulf %316, %326 : vector<8x1xf32>
    %328 = arith.addf %304, %327 : vector<8x1xf32>
    %c2_i32 = arith.constant 2 : i32
    %329 = vector.broadcast %c2_i32 : i32 to vector<8x1xi32>
    %330 = arith.cmpi eq, %282, %329 : vector<8x1xi32>
    %331 = vector.broadcast %277 : vector<1x6xf32> to vector<8x6xf32>
    %332 = arith.mulf %313, %331 : vector<8x6xf32>
    %cst_64 = arith.constant dense<0.000000e+00> : vector<8xf32>
    %333 = vector.multi_reduction <add>, %332, %cst_64 [1] : vector<8x6xf32> to vector<8xf32>
    %334 = vector.shape_cast %333 : vector<8xf32> to vector<8x1xf32>
    %cst_65 = arith.constant 0.000000e+00 : f32
    %335 = vector.broadcast %cst_65 : f32 to vector<8x1xf32>
    %336 = arith.select %330, %334, %335 : vector<8x1xi1>, vector<8x1xf32>
    %337 = arith.addf %328, %336 : vector<8x1xf32>
    %cst_66 = arith.constant dense<0xFF800000> : vector<8xf32>
    %338 = vector.multi_reduction <maximumf>, %306, %cst_66 [1] : vector<8x6xf32> to vector<8xf32>
    %339 = vector.shape_cast %338 : vector<8xf32> to vector<8x1xf32>
    %340 = vector.broadcast %339 : vector<8x1xf32> to vector<8x6xf32>
    %341 = arith.subf %306, %340 : vector<8x6xf32>
    %342 = math.exp %341 : vector<8x6xf32>
    %cst_67 = arith.constant dense<0.000000e+00> : vector<8x6xf32>
    %343 = tpu.matmul %342, %279, %cst_67 {dimension_numbers = #tpu.dot_dimension_numbers<[1], [0], [0], [1], [0, 0, 1, 1], [], []>} : vector<8x6xf32>, vector<6x6xf32>, vector<8x6xf32> -> vector<8x6xf32>
    %344 = math.log %343 : vector<8x6xf32>
    %345 = vector.broadcast %339 : vector<8x1xf32> to vector<8x6xf32>
    %346 = arith.addf %345, %344 : vector<8x6xf32>
    %cst_68 = arith.constant 0.000000e+00 : f32
    %347 = vector.broadcast %cst_68 : f32 to vector<8x1xf32>
    %348 = arith.cmpf ogt, %316, %347 : vector<8x1xf32>
    %349 = arith.addf %346, %267 : vector<8x6xf32>
    %350 = vector.shape_cast %348 : vector<8x1xi1> to vector<8x1xi1>
    %351 = vector.broadcast %350 : vector<8x1xi1> to vector<8x6xi1>
    %352 = arith.select %351, %349, %306 : vector<8x6xi1>, vector<8x6xf32>
    %353 = vector.extract_strided_slice %274 {offsets = [2, 0], sizes = [1, 8], strides = [1, 1]} : vector<8x8xi32> to vector<1x8xi32>
    %354 = vector.shape_cast %353 : vector<1x8xi32> to vector<8xi32>
    %355 = vector.shape_cast %354 : vector<8xi32> to vector<8x1xi32>
    %356 = vector.broadcast %355 : vector<8x1xi32> to vector<8x6xi32>
    %357 = arith.cmpi eq, %283, %356 : vector<8x6xi32>
    %358 = arith.extui %357 : vector<8x6xi1> to vector<8x6xi32>
    %359 = arith.sitofp %358 : vector<8x6xi32> to vector<8x6xf32>
    %360 = vector.extract_strided_slice %275 {offsets = [2, 0], sizes = [1, 8], strides = [1, 1]} : vector<8x8xf32> to vector<1x8xf32>
    %361 = vector.shape_cast %360 : vector<1x8xf32> to vector<8xf32>
    %362 = vector.shape_cast %361 : vector<8xf32> to vector<8x1xf32>
    %363 = vector.shape_cast %278 : vector<6x6xf32> to vector<1x6x6xf32>
    %364 = vector.shape_cast %313 : vector<8x6xf32> to vector<8x1x6xf32>
    %365 = vector.broadcast %363 : vector<1x6x6xf32> to vector<8x6x6xf32>
    %366 = vector.broadcast %364 : vector<8x1x6xf32> to vector<8x6x6xf32>
    %367 = arith.mulf %365, %366 : vector<8x6x6xf32>
    %cst_69 = arith.constant dense<0.000000e+00> : vector<8x6xf32>
    %368 = vector.multi_reduction <add>, %367, %cst_69 [2] : vector<8x6x6xf32> to vector<8x6xf32>
    %369 = arith.addf %368, %268 : vector<8x6xf32>
    %370 = arith.mulf %359, %369 : vector<8x6xf32>
    %cst_70 = arith.constant dense<0.000000e+00> : vector<8xf32>
    %371 = vector.multi_reduction <add>, %370, %cst_70 [1] : vector<8x6xf32> to vector<8xf32>
    %372 = vector.shape_cast %371 : vector<8xf32> to vector<8x1xf32>
    %373 = arith.mulf %362, %372 : vector<8x1xf32>
    %374 = arith.addf %337, %373 : vector<8x1xf32>
    %c3_i32 = arith.constant 3 : i32
    %375 = vector.broadcast %c3_i32 : i32 to vector<8x1xi32>
    %376 = arith.cmpi eq, %282, %375 : vector<8x1xi32>
    %377 = vector.broadcast %277 : vector<1x6xf32> to vector<8x6xf32>
    %378 = arith.mulf %359, %377 : vector<8x6xf32>
    %cst_71 = arith.constant dense<0.000000e+00> : vector<8xf32>
    %379 = vector.multi_reduction <add>, %378, %cst_71 [1] : vector<8x6xf32> to vector<8xf32>
    %380 = vector.shape_cast %379 : vector<8xf32> to vector<8x1xf32>
    %cst_72 = arith.constant 0.000000e+00 : f32
    %381 = vector.broadcast %cst_72 : f32 to vector<8x1xf32>
    %382 = arith.select %376, %380, %381 : vector<8x1xi1>, vector<8x1xf32>
    %383 = arith.addf %374, %382 : vector<8x1xf32>
    %cst_73 = arith.constant dense<0xFF800000> : vector<8xf32>
    %384 = vector.multi_reduction <maximumf>, %352, %cst_73 [1] : vector<8x6xf32> to vector<8xf32>
    %385 = vector.shape_cast %384 : vector<8xf32> to vector<8x1xf32>
    %386 = vector.broadcast %385 : vector<8x1xf32> to vector<8x6xf32>
    %387 = arith.subf %352, %386 : vector<8x6xf32>
    %388 = math.exp %387 : vector<8x6xf32>
    %cst_74 = arith.constant dense<0.000000e+00> : vector<8x6xf32>
    %389 = tpu.matmul %388, %279, %cst_74 {dimension_numbers = #tpu.dot_dimension_numbers<[1], [0], [0], [1], [0, 0, 1, 1], [], []>} : vector<8x6xf32>, vector<6x6xf32>, vector<8x6xf32> -> vector<8x6xf32>
    %390 = math.log %389 : vector<8x6xf32>
    %391 = vector.broadcast %385 : vector<8x1xf32> to vector<8x6xf32>
    %392 = arith.addf %391, %390 : vector<8x6xf32>
    %cst_75 = arith.constant 0.000000e+00 : f32
    %393 = vector.broadcast %cst_75 : f32 to vector<8x1xf32>
    %394 = arith.cmpf ogt, %362, %393 : vector<8x1xf32>
    %395 = arith.addf %392, %268 : vector<8x6xf32>
    %396 = vector.shape_cast %394 : vector<8x1xi1> to vector<8x1xi1>
    %397 = vector.broadcast %396 : vector<8x1xi1> to vector<8x6xi1>
    %398 = arith.select %397, %395, %352 : vector<8x6xi1>, vector<8x6xf32>
    %399 = vector.extract_strided_slice %274 {offsets = [3, 0], sizes = [1, 8], strides = [1, 1]} : vector<8x8xi32> to vector<1x8xi32>
    %400 = vector.shape_cast %399 : vector<1x8xi32> to vector<8xi32>
    %401 = vector.shape_cast %400 : vector<8xi32> to vector<8x1xi32>
    %402 = vector.broadcast %401 : vector<8x1xi32> to vector<8x6xi32>
    %403 = arith.cmpi eq, %283, %402 : vector<8x6xi32>
    %404 = arith.extui %403 : vector<8x6xi1> to vector<8x6xi32>
    %405 = arith.sitofp %404 : vector<8x6xi32> to vector<8x6xf32>
    %406 = vector.extract_strided_slice %275 {offsets = [3, 0], sizes = [1, 8], strides = [1, 1]} : vector<8x8xf32> to vector<1x8xf32>
    %407 = vector.shape_cast %406 : vector<1x8xf32> to vector<8xf32>
    %408 = vector.shape_cast %407 : vector<8xf32> to vector<8x1xf32>
    %409 = vector.shape_cast %278 : vector<6x6xf32> to vector<1x6x6xf32>
    %410 = vector.shape_cast %359 : vector<8x6xf32> to vector<8x1x6xf32>
    %411 = vector.broadcast %409 : vector<1x6x6xf32> to vector<8x6x6xf32>
    %412 = vector.broadcast %410 : vector<8x1x6xf32> to vector<8x6x6xf32>
    %413 = arith.mulf %411, %412 : vector<8x6x6xf32>
    %cst_76 = arith.constant dense<0.000000e+00> : vector<8x6xf32>
    %414 = vector.multi_reduction <add>, %413, %cst_76 [2] : vector<8x6x6xf32> to vector<8x6xf32>
    %415 = arith.addf %414, %269 : vector<8x6xf32>
    %416 = arith.mulf %405, %415 : vector<8x6xf32>
    %cst_77 = arith.constant dense<0.000000e+00> : vector<8xf32>
    %417 = vector.multi_reduction <add>, %416, %cst_77 [1] : vector<8x6xf32> to vector<8xf32>
    %418 = vector.shape_cast %417 : vector<8xf32> to vector<8x1xf32>
    %419 = arith.mulf %408, %418 : vector<8x1xf32>
    %420 = arith.addf %383, %419 : vector<8x1xf32>
    %c4_i32 = arith.constant 4 : i32
    %421 = vector.broadcast %c4_i32 : i32 to vector<8x1xi32>
    %422 = arith.cmpi eq, %282, %421 : vector<8x1xi32>
    %423 = vector.broadcast %277 : vector<1x6xf32> to vector<8x6xf32>
    %424 = arith.mulf %405, %423 : vector<8x6xf32>
    %cst_78 = arith.constant dense<0.000000e+00> : vector<8xf32>
    %425 = vector.multi_reduction <add>, %424, %cst_78 [1] : vector<8x6xf32> to vector<8xf32>
    %426 = vector.shape_cast %425 : vector<8xf32> to vector<8x1xf32>
    %cst_79 = arith.constant 0.000000e+00 : f32
    %427 = vector.broadcast %cst_79 : f32 to vector<8x1xf32>
    %428 = arith.select %422, %426, %427 : vector<8x1xi1>, vector<8x1xf32>
    %429 = arith.addf %420, %428 : vector<8x1xf32>
    %cst_80 = arith.constant dense<0xFF800000> : vector<8xf32>
    %430 = vector.multi_reduction <maximumf>, %398, %cst_80 [1] : vector<8x6xf32> to vector<8xf32>
    %431 = vector.shape_cast %430 : vector<8xf32> to vector<8x1xf32>
    %432 = vector.broadcast %431 : vector<8x1xf32> to vector<8x6xf32>
    %433 = arith.subf %398, %432 : vector<8x6xf32>
    %434 = math.exp %433 : vector<8x6xf32>
    %cst_81 = arith.constant dense<0.000000e+00> : vector<8x6xf32>
    %435 = tpu.matmul %434, %279, %cst_81 {dimension_numbers = #tpu.dot_dimension_numbers<[1], [0], [0], [1], [0, 0, 1, 1], [], []>} : vector<8x6xf32>, vector<6x6xf32>, vector<8x6xf32> -> vector<8x6xf32>
    %436 = math.log %435 : vector<8x6xf32>
    %437 = vector.broadcast %431 : vector<8x1xf32> to vector<8x6xf32>
    %438 = arith.addf %437, %436 : vector<8x6xf32>
    %cst_82 = arith.constant 0.000000e+00 : f32
    %439 = vector.broadcast %cst_82 : f32 to vector<8x1xf32>
    %440 = arith.cmpf ogt, %408, %439 : vector<8x1xf32>
    %441 = arith.addf %438, %269 : vector<8x6xf32>
    %442 = vector.shape_cast %440 : vector<8x1xi1> to vector<8x1xi1>
    %443 = vector.broadcast %442 : vector<8x1xi1> to vector<8x6xi1>
    %444 = arith.select %443, %441, %398 : vector<8x6xi1>, vector<8x6xf32>
    %445 = vector.extract_strided_slice %274 {offsets = [4, 0], sizes = [1, 8], strides = [1, 1]} : vector<8x8xi32> to vector<1x8xi32>
    %446 = vector.shape_cast %445 : vector<1x8xi32> to vector<8xi32>
    %447 = vector.shape_cast %446 : vector<8xi32> to vector<8x1xi32>
    %448 = vector.broadcast %447 : vector<8x1xi32> to vector<8x6xi32>
    %449 = arith.cmpi eq, %283, %448 : vector<8x6xi32>
    %450 = arith.extui %449 : vector<8x6xi1> to vector<8x6xi32>
    %451 = arith.sitofp %450 : vector<8x6xi32> to vector<8x6xf32>
    %452 = vector.extract_strided_slice %275 {offsets = [4, 0], sizes = [1, 8], strides = [1, 1]} : vector<8x8xf32> to vector<1x8xf32>
    %453 = vector.shape_cast %452 : vector<1x8xf32> to vector<8xf32>
    %454 = vector.shape_cast %453 : vector<8xf32> to vector<8x1xf32>
    %455 = vector.shape_cast %278 : vector<6x6xf32> to vector<1x6x6xf32>
    %456 = vector.shape_cast %405 : vector<8x6xf32> to vector<8x1x6xf32>
    %457 = vector.broadcast %455 : vector<1x6x6xf32> to vector<8x6x6xf32>
    %458 = vector.broadcast %456 : vector<8x1x6xf32> to vector<8x6x6xf32>
    %459 = arith.mulf %457, %458 : vector<8x6x6xf32>
    %cst_83 = arith.constant dense<0.000000e+00> : vector<8x6xf32>
    %460 = vector.multi_reduction <add>, %459, %cst_83 [2] : vector<8x6x6xf32> to vector<8x6xf32>
    %461 = arith.addf %460, %270 : vector<8x6xf32>
    %462 = arith.mulf %451, %461 : vector<8x6xf32>
    %cst_84 = arith.constant dense<0.000000e+00> : vector<8xf32>
    %463 = vector.multi_reduction <add>, %462, %cst_84 [1] : vector<8x6xf32> to vector<8xf32>
    %464 = vector.shape_cast %463 : vector<8xf32> to vector<8x1xf32>
    %465 = arith.mulf %454, %464 : vector<8x1xf32>
    %466 = arith.addf %429, %465 : vector<8x1xf32>
    %c5_i32 = arith.constant 5 : i32
    %467 = vector.broadcast %c5_i32 : i32 to vector<8x1xi32>
    %468 = arith.cmpi eq, %282, %467 : vector<8x1xi32>
    %469 = vector.broadcast %277 : vector<1x6xf32> to vector<8x6xf32>
    %470 = arith.mulf %451, %469 : vector<8x6xf32>
    %cst_85 = arith.constant dense<0.000000e+00> : vector<8xf32>
    %471 = vector.multi_reduction <add>, %470, %cst_85 [1] : vector<8x6xf32> to vector<8xf32>
    %472 = vector.shape_cast %471 : vector<8xf32> to vector<8x1xf32>
    %cst_86 = arith.constant 0.000000e+00 : f32
    %473 = vector.broadcast %cst_86 : f32 to vector<8x1xf32>
    %474 = arith.select %468, %472, %473 : vector<8x1xi1>, vector<8x1xf32>
    %475 = arith.addf %466, %474 : vector<8x1xf32>
    %cst_87 = arith.constant dense<0xFF800000> : vector<8xf32>
    %476 = vector.multi_reduction <maximumf>, %444, %cst_87 [1] : vector<8x6xf32> to vector<8xf32>
    %477 = vector.shape_cast %476 : vector<8xf32> to vector<8x1xf32>
    %478 = vector.broadcast %477 : vector<8x1xf32> to vector<8x6xf32>
    %479 = arith.subf %444, %478 : vector<8x6xf32>
    %480 = math.exp %479 : vector<8x6xf32>
    %cst_88 = arith.constant dense<0.000000e+00> : vector<8x6xf32>
    %481 = tpu.matmul %480, %279, %cst_88 {dimension_numbers = #tpu.dot_dimension_numbers<[1], [0], [0], [1], [0, 0, 1, 1], [], []>} : vector<8x6xf32>, vector<6x6xf32>, vector<8x6xf32> -> vector<8x6xf32>
    %482 = math.log %481 : vector<8x6xf32>
    %483 = vector.broadcast %477 : vector<8x1xf32> to vector<8x6xf32>
    %484 = arith.addf %483, %482 : vector<8x6xf32>
    %cst_89 = arith.constant 0.000000e+00 : f32
    %485 = vector.broadcast %cst_89 : f32 to vector<8x1xf32>
    %486 = arith.cmpf ogt, %454, %485 : vector<8x1xf32>
    %487 = arith.addf %484, %270 : vector<8x6xf32>
    %488 = vector.shape_cast %486 : vector<8x1xi1> to vector<8x1xi1>
    %489 = vector.broadcast %488 : vector<8x1xi1> to vector<8x6xi1>
    %490 = arith.select %489, %487, %444 : vector<8x6xi1>, vector<8x6xf32>
    %491 = vector.extract_strided_slice %274 {offsets = [5, 0], sizes = [1, 8], strides = [1, 1]} : vector<8x8xi32> to vector<1x8xi32>
    %492 = vector.shape_cast %491 : vector<1x8xi32> to vector<8xi32>
    %493 = vector.shape_cast %492 : vector<8xi32> to vector<8x1xi32>
    %494 = vector.broadcast %493 : vector<8x1xi32> to vector<8x6xi32>
    %495 = arith.cmpi eq, %283, %494 : vector<8x6xi32>
    %496 = arith.extui %495 : vector<8x6xi1> to vector<8x6xi32>
    %497 = arith.sitofp %496 : vector<8x6xi32> to vector<8x6xf32>
    %498 = vector.extract_strided_slice %275 {offsets = [5, 0], sizes = [1, 8], strides = [1, 1]} : vector<8x8xf32> to vector<1x8xf32>
    %499 = vector.shape_cast %498 : vector<1x8xf32> to vector<8xf32>
    %500 = vector.shape_cast %499 : vector<8xf32> to vector<8x1xf32>
    %501 = vector.shape_cast %278 : vector<6x6xf32> to vector<1x6x6xf32>
    %502 = vector.shape_cast %451 : vector<8x6xf32> to vector<8x1x6xf32>
    %503 = vector.broadcast %501 : vector<1x6x6xf32> to vector<8x6x6xf32>
    %504 = vector.broadcast %502 : vector<8x1x6xf32> to vector<8x6x6xf32>
    %505 = arith.mulf %503, %504 : vector<8x6x6xf32>
    %cst_90 = arith.constant dense<0.000000e+00> : vector<8x6xf32>
    %506 = vector.multi_reduction <add>, %505, %cst_90 [2] : vector<8x6x6xf32> to vector<8x6xf32>
    %507 = arith.addf %506, %271 : vector<8x6xf32>
    %508 = arith.mulf %497, %507 : vector<8x6xf32>
    %cst_91 = arith.constant dense<0.000000e+00> : vector<8xf32>
    %509 = vector.multi_reduction <add>, %508, %cst_91 [1] : vector<8x6xf32> to vector<8xf32>
    %510 = vector.shape_cast %509 : vector<8xf32> to vector<8x1xf32>
    %511 = arith.mulf %500, %510 : vector<8x1xf32>
    %512 = arith.addf %475, %511 : vector<8x1xf32>
    %c6_i32 = arith.constant 6 : i32
    %513 = vector.broadcast %c6_i32 : i32 to vector<8x1xi32>
    %514 = arith.cmpi eq, %282, %513 : vector<8x1xi32>
    %515 = vector.broadcast %277 : vector<1x6xf32> to vector<8x6xf32>
    %516 = arith.mulf %497, %515 : vector<8x6xf32>
    %cst_92 = arith.constant dense<0.000000e+00> : vector<8xf32>
    %517 = vector.multi_reduction <add>, %516, %cst_92 [1] : vector<8x6xf32> to vector<8xf32>
    %518 = vector.shape_cast %517 : vector<8xf32> to vector<8x1xf32>
    %cst_93 = arith.constant 0.000000e+00 : f32
    %519 = vector.broadcast %cst_93 : f32 to vector<8x1xf32>
    %520 = arith.select %514, %518, %519 : vector<8x1xi1>, vector<8x1xf32>
    %521 = arith.addf %512, %520 : vector<8x1xf32>
    %cst_94 = arith.constant dense<0xFF800000> : vector<8xf32>
    %522 = vector.multi_reduction <maximumf>, %490, %cst_94 [1] : vector<8x6xf32> to vector<8xf32>
    %523 = vector.shape_cast %522 : vector<8xf32> to vector<8x1xf32>
    %524 = vector.broadcast %523 : vector<8x1xf32> to vector<8x6xf32>
    %525 = arith.subf %490, %524 : vector<8x6xf32>
    %526 = math.exp %525 : vector<8x6xf32>
    %cst_95 = arith.constant dense<0.000000e+00> : vector<8x6xf32>
    %527 = tpu.matmul %526, %279, %cst_95 {dimension_numbers = #tpu.dot_dimension_numbers<[1], [0], [0], [1], [0, 0, 1, 1], [], []>} : vector<8x6xf32>, vector<6x6xf32>, vector<8x6xf32> -> vector<8x6xf32>
    %528 = math.log %527 : vector<8x6xf32>
    %529 = vector.broadcast %523 : vector<8x1xf32> to vector<8x6xf32>
    %530 = arith.addf %529, %528 : vector<8x6xf32>
    %cst_96 = arith.constant 0.000000e+00 : f32
    %531 = vector.broadcast %cst_96 : f32 to vector<8x1xf32>
    %532 = arith.cmpf ogt, %500, %531 : vector<8x1xf32>
    %533 = arith.addf %530, %271 : vector<8x6xf32>
    %534 = vector.shape_cast %532 : vector<8x1xi1> to vector<8x1xi1>
    %535 = vector.broadcast %534 : vector<8x1xi1> to vector<8x6xi1>
    %536 = arith.select %535, %533, %490 : vector<8x6xi1>, vector<8x6xf32>
    %537 = vector.extract_strided_slice %274 {offsets = [6, 0], sizes = [1, 8], strides = [1, 1]} : vector<8x8xi32> to vector<1x8xi32>
    %538 = vector.shape_cast %537 : vector<1x8xi32> to vector<8xi32>
    %539 = vector.shape_cast %538 : vector<8xi32> to vector<8x1xi32>
    %540 = vector.broadcast %539 : vector<8x1xi32> to vector<8x6xi32>
    %541 = arith.cmpi eq, %283, %540 : vector<8x6xi32>
    %542 = arith.extui %541 : vector<8x6xi1> to vector<8x6xi32>
    %543 = arith.sitofp %542 : vector<8x6xi32> to vector<8x6xf32>
    %544 = vector.extract_strided_slice %275 {offsets = [6, 0], sizes = [1, 8], strides = [1, 1]} : vector<8x8xf32> to vector<1x8xf32>
    %545 = vector.shape_cast %544 : vector<1x8xf32> to vector<8xf32>
    %546 = vector.shape_cast %545 : vector<8xf32> to vector<8x1xf32>
    %547 = vector.shape_cast %278 : vector<6x6xf32> to vector<1x6x6xf32>
    %548 = vector.shape_cast %497 : vector<8x6xf32> to vector<8x1x6xf32>
    %549 = vector.broadcast %547 : vector<1x6x6xf32> to vector<8x6x6xf32>
    %550 = vector.broadcast %548 : vector<8x1x6xf32> to vector<8x6x6xf32>
    %551 = arith.mulf %549, %550 : vector<8x6x6xf32>
    %cst_97 = arith.constant dense<0.000000e+00> : vector<8x6xf32>
    %552 = vector.multi_reduction <add>, %551, %cst_97 [2] : vector<8x6x6xf32> to vector<8x6xf32>
    %553 = arith.addf %552, %272 : vector<8x6xf32>
    %554 = arith.mulf %543, %553 : vector<8x6xf32>
    %cst_98 = arith.constant dense<0.000000e+00> : vector<8xf32>
    %555 = vector.multi_reduction <add>, %554, %cst_98 [1] : vector<8x6xf32> to vector<8xf32>
    %556 = vector.shape_cast %555 : vector<8xf32> to vector<8x1xf32>
    %557 = arith.mulf %546, %556 : vector<8x1xf32>
    %558 = arith.addf %521, %557 : vector<8x1xf32>
    %c7_i32 = arith.constant 7 : i32
    %559 = vector.broadcast %c7_i32 : i32 to vector<8x1xi32>
    %560 = arith.cmpi eq, %282, %559 : vector<8x1xi32>
    %561 = vector.broadcast %277 : vector<1x6xf32> to vector<8x6xf32>
    %562 = arith.mulf %543, %561 : vector<8x6xf32>
    %cst_99 = arith.constant dense<0.000000e+00> : vector<8xf32>
    %563 = vector.multi_reduction <add>, %562, %cst_99 [1] : vector<8x6xf32> to vector<8xf32>
    %564 = vector.shape_cast %563 : vector<8xf32> to vector<8x1xf32>
    %cst_100 = arith.constant 0.000000e+00 : f32
    %565 = vector.broadcast %cst_100 : f32 to vector<8x1xf32>
    %566 = arith.select %560, %564, %565 : vector<8x1xi1>, vector<8x1xf32>
    %567 = arith.addf %558, %566 : vector<8x1xf32>
    %cst_101 = arith.constant dense<0xFF800000> : vector<8xf32>
    %568 = vector.multi_reduction <maximumf>, %536, %cst_101 [1] : vector<8x6xf32> to vector<8xf32>
    %569 = vector.shape_cast %568 : vector<8xf32> to vector<8x1xf32>
    %570 = vector.broadcast %569 : vector<8x1xf32> to vector<8x6xf32>
    %571 = arith.subf %536, %570 : vector<8x6xf32>
    %572 = math.exp %571 : vector<8x6xf32>
    %cst_102 = arith.constant dense<0.000000e+00> : vector<8x6xf32>
    %573 = tpu.matmul %572, %279, %cst_102 {dimension_numbers = #tpu.dot_dimension_numbers<[1], [0], [0], [1], [0, 0, 1, 1], [], []>} : vector<8x6xf32>, vector<6x6xf32>, vector<8x6xf32> -> vector<8x6xf32>
    %574 = math.log %573 : vector<8x6xf32>
    %575 = vector.broadcast %569 : vector<8x1xf32> to vector<8x6xf32>
    %576 = arith.addf %575, %574 : vector<8x6xf32>
    %cst_103 = arith.constant 0.000000e+00 : f32
    %577 = vector.broadcast %cst_103 : f32 to vector<8x1xf32>
    %578 = arith.cmpf ogt, %546, %577 : vector<8x1xf32>
    %579 = arith.addf %576, %272 : vector<8x6xf32>
    %580 = vector.shape_cast %578 : vector<8x1xi1> to vector<8x1xi1>
    %581 = vector.broadcast %580 : vector<8x1xi1> to vector<8x6xi1>
    %582 = arith.select %581, %579, %536 : vector<8x6xi1>, vector<8x6xf32>
    %583 = vector.extract_strided_slice %274 {offsets = [7, 0], sizes = [1, 8], strides = [1, 1]} : vector<8x8xi32> to vector<1x8xi32>
    %584 = vector.shape_cast %583 : vector<1x8xi32> to vector<8xi32>
    %585 = vector.shape_cast %584 : vector<8xi32> to vector<8x1xi32>
    %586 = vector.broadcast %585 : vector<8x1xi32> to vector<8x6xi32>
    %587 = arith.cmpi eq, %283, %586 : vector<8x6xi32>
    %588 = arith.extui %587 : vector<8x6xi1> to vector<8x6xi32>
    %589 = arith.sitofp %588 : vector<8x6xi32> to vector<8x6xf32>
    %590 = vector.extract_strided_slice %275 {offsets = [7, 0], sizes = [1, 8], strides = [1, 1]} : vector<8x8xf32> to vector<1x8xf32>
    %591 = vector.shape_cast %590 : vector<1x8xf32> to vector<8xf32>
    %592 = vector.shape_cast %591 : vector<8xf32> to vector<8x1xf32>
    %593 = vector.shape_cast %278 : vector<6x6xf32> to vector<1x6x6xf32>
    %594 = vector.shape_cast %543 : vector<8x6xf32> to vector<8x1x6xf32>
    %595 = vector.broadcast %593 : vector<1x6x6xf32> to vector<8x6x6xf32>
    %596 = vector.broadcast %594 : vector<8x1x6xf32> to vector<8x6x6xf32>
    %597 = arith.mulf %595, %596 : vector<8x6x6xf32>
    %cst_104 = arith.constant dense<0.000000e+00> : vector<8x6xf32>
    %598 = vector.multi_reduction <add>, %597, %cst_104 [2] : vector<8x6x6xf32> to vector<8x6xf32>
    %599 = arith.addf %598, %273 : vector<8x6xf32>
    %600 = arith.mulf %589, %599 : vector<8x6xf32>
    %cst_105 = arith.constant dense<0.000000e+00> : vector<8xf32>
    %601 = vector.multi_reduction <add>, %600, %cst_105 [1] : vector<8x6xf32> to vector<8xf32>
    %602 = vector.shape_cast %601 : vector<8xf32> to vector<8x1xf32>
    %603 = arith.mulf %592, %602 : vector<8x1xf32>
    %604 = arith.addf %567, %603 : vector<8x1xf32>
    %c8_i32 = arith.constant 8 : i32
    %605 = vector.broadcast %c8_i32 : i32 to vector<8x1xi32>
    %606 = arith.cmpi eq, %282, %605 : vector<8x1xi32>
    %607 = vector.broadcast %277 : vector<1x6xf32> to vector<8x6xf32>
    %608 = arith.mulf %589, %607 : vector<8x6xf32>
    %cst_106 = arith.constant dense<0.000000e+00> : vector<8xf32>
    %609 = vector.multi_reduction <add>, %608, %cst_106 [1] : vector<8x6xf32> to vector<8xf32>
    %610 = vector.shape_cast %609 : vector<8xf32> to vector<8x1xf32>
    %cst_107 = arith.constant 0.000000e+00 : f32
    %611 = vector.broadcast %cst_107 : f32 to vector<8x1xf32>
    %612 = arith.select %606, %610, %611 : vector<8x1xi1>, vector<8x1xf32>
    %613 = arith.addf %604, %612 : vector<8x1xf32>
    %cst_108 = arith.constant dense<0xFF800000> : vector<8xf32>
    %614 = vector.multi_reduction <maximumf>, %582, %cst_108 [1] : vector<8x6xf32> to vector<8xf32>
    %615 = vector.shape_cast %614 : vector<8xf32> to vector<8x1xf32>
    %616 = vector.broadcast %615 : vector<8x1xf32> to vector<8x6xf32>
    %617 = arith.subf %582, %616 : vector<8x6xf32>
    %618 = math.exp %617 : vector<8x6xf32>
    %cst_109 = arith.constant dense<0.000000e+00> : vector<8x6xf32>
    %619 = tpu.matmul %618, %279, %cst_109 {dimension_numbers = #tpu.dot_dimension_numbers<[1], [0], [0], [1], [0, 0, 1, 1], [], []>} : vector<8x6xf32>, vector<6x6xf32>, vector<8x6xf32> -> vector<8x6xf32>
    %620 = math.log %619 : vector<8x6xf32>
    %621 = vector.broadcast %615 : vector<8x1xf32> to vector<8x6xf32>
    %622 = arith.addf %621, %620 : vector<8x6xf32>
    %cst_110 = arith.constant 0.000000e+00 : f32
    %623 = vector.broadcast %cst_110 : f32 to vector<8x1xf32>
    %624 = arith.cmpf ogt, %592, %623 : vector<8x1xf32>
    %625 = arith.addf %622, %273 : vector<8x6xf32>
    %626 = vector.shape_cast %624 : vector<8x1xi1> to vector<8x1xi1>
    %627 = vector.broadcast %626 : vector<8x1xi1> to vector<8x6xi1>
    %628 = arith.select %627, %625, %582 : vector<8x6xi1>, vector<8x6xf32>
    %629 = vector.broadcast %277 : vector<1x6xf32> to vector<8x6xf32>
    %630 = arith.addf %628, %629 : vector<8x6xf32>
    %cst_111 = arith.constant dense<0xFF800000> : vector<8xf32>
    %631 = vector.multi_reduction <maximumf>, %630, %cst_111 [1] : vector<8x6xf32> to vector<8xf32>
    %632 = vector.shape_cast %631 : vector<8xf32> to vector<8x1xf32>
    %633 = vector.broadcast %632 : vector<8x1xf32> to vector<8x6xf32>
    %634 = arith.subf %630, %633 : vector<8x6xf32>
    %635 = math.exp %634 : vector<8x6xf32>
    %cst_112 = arith.constant dense<0.000000e+00> : vector<8xf32>
    %636 = vector.multi_reduction <add>, %635, %cst_112 [1] : vector<8x6xf32> to vector<8xf32>
    %637 = vector.shape_cast %636 : vector<8xf32> to vector<8x1xf32>
    %638 = math.log %637 : vector<8x1xf32>
    %639 = arith.addf %632, %638 : vector<8x1xf32>
    %640 = arith.subf %613, %639 : vector<8x1xf32>
    %c0_113 = arith.constant 0 : index
    %c0_114 = arith.constant 0 : index
    %641 = vector.load %arg3[%c0_113, %c0_114] : memref<8x1xf32, #tpu.memory_space<vmem>>, vector<8x1xf32>
    %642 = arith.mulf %640, %641 : vector<8x1xf32>
    %643 = vector.shape_cast %642 : vector<8x1xf32> to vector<1x8x1xf32>
    %cst_115 = arith.constant dense<0.000000e+00> : vector<1xf32>
    %644 = vector.multi_reduction <add>, %643, %cst_115 [1, 2] : vector<1x8x1xf32> to vector<1xf32>
    %645 = vector.shape_cast %644 : vector<1xf32> to vector<1x1x1xf32>
    %646 = vector.extract %645[0, 0, 0] : f32 from vector<1x1x1xf32>
    %cst_116 = arith.constant 0.000000e+00 : f32
    %647 = arith.subf %cst_116, %646 : f32
    %648 = vector.broadcast %647 : f32 to vector<1x1xf32>
    %c0_117 = arith.constant 0 : index
    %c0_118 = arith.constant 0 : index
    %649 = vector.load %arg13[%c0_117, %c0_118] : memref<1x1xf32, #tpu.memory_space<vmem>>, vector<1x1xf32>
    tpu.vector_store %arg13[%c0_117, %c0_118], %648 {strides = array<i32>} : memref<1x1xf32, #tpu.memory_space<vmem>>, vector<1x1xf32>,
    return
  }
}

</mosaic_0001>

<bundles_post_ra>
// kernel: tpu_custom_call.1
= control target key start
LH: loop header
LB: loop body
LE: loop exit
PB: predicated region body
PF: predicated region fallthrough
CT: control target
= control target key end

     0   :  { %18 = vsyncpa [#allocation3], 0  ;;  %s6249_s0 = inlined_call_operand.vmem [shape: bf16[64,32], index: 0, kind: input, shape index: {}]   ;;  %s6250_s1 = inlined_call_operand.vmem [shape: s32[8,8], index: 1, kind: input, shape index: {}]   ;;  %s6251_s2 = inlined_call_operand.vmem [shape: f32[8,8], index: 2, kind: input, shape index: {}]   ;;  %s6252_s3 = inlined_call_operand.vmem [shape: f32[8,1], index: 3, kind: input, shape index: {}]   ;;  %s6253_s4 = inlined_call_operand.vmem [shape: bf16[32,512], index: 4, kind: input, shape index: {}]   ;;  %s6254_s5 = inlined_call_operand.hbm [shape: bf16[64,512], index: 5, kind: input, shape index: {}]   ;;  %s6255_s6 = inlined_call_operand.hbm [shape: f32[1,512], index: 6, kind: input, shape index: {}]   ;;  %s6256_s7 = inlined_call_operand.vmem [shape: bf16[64,6], index: 7, kind: input, shape index: {}]   ;;  %s6257_s8 = inlined_call_operand.vmem [shape: f32[1,6], index: 8, kind: input, shape index: {}]   ;;  %s6258_s9 = inlined_call_operand.vmem [shape: f32[1,6], index: 9, kind: input, shape index: {}]   ;;  %s6259_s10 = inlined_call_operand.vmem [shape: f32[1,6], index: 10, kind: input, shape index: {}]   ;;  %s6260_s11 = inlined_call_operand.vmem [shape: f32[6,6], index: 11, kind: input, shape index: {}]   ;;  %s6261_s12 = inlined_call_operand.vmem [shape: f32[6,6], index: 12, kind: input, shape index: {}]   ;;  %s6262_s13 = inlined_call_operand.hbm [shape: f32[1,1], index: 13, kind: output, shape index: {}]  }
   0x1   :  { %19 = vsyncpa [#allocation6], 0 }
   0x2   :  { %20 = vsyncpa [#allocation4], 0  ;;  %s4707_s25 = smov [#allocation2]  }
   0x3   :  { %s36_s26 = sshll.u32 %s4707_s25, 4  ;;  %s37_s26 = int_to_ptr.vmem [resolvable:$true] %s36_s26 }
   0x4   :  { %s4649_s27 = scalar_lea.vmem %s37_s26, 2048  ;;  %p4654_p1 = scmp.lt.s32.totalorder %s37_s26, %s37_s26 }
   0x5   :  { %p4650_p0 = scmp.ne.s32.totalorder %s37_s26, %s4649_s27  ;;  %p4655_p2 = scmp.lt.s32.totalorder %s4649_s27, %s4649_s27 }
   0x7   :  { %p4656_p3 = por %p4655_p2, %p4654_p1 }
   0x9   :  { %p4657_p4 = pnand %p4656_p3, %p4650_p0 }
   0xb   :  { %4660 = shalt.err (!%p4657_p4)
}
   0xc   :  { %s4708_s28 = smov 256   ;;  %s4709_s29 = smov 16  }
   0xd   :  { %42 = dma.hbm_to_vmem [thread:$0]  %s6254_s5, 2048, %s37_s26, [#allocation3], %s4708_s28, %s4708_s28, %s4709_s29  }
   0xe   :  { %s4710_s15 = smov [#allocation5]  }
   0xf   :  { %s49_s16 = sshll.u32 %s4710_s15, 4  ;;  %s50_s16 = int_to_ptr.vmem [resolvable:$true] %s49_s16 }
  0x10   :  { %s4669_s17 = scalar_lea.vmem %s50_s16, 64  ;;  %p4674_p6 = scmp.lt.s32.totalorder %s50_s16, %s50_s16 }
  0x11   :  { %p4670_p5 = scmp.ne.s32.totalorder %s50_s16, %s4669_s17  ;;  %p4675_p7 = scmp.lt.s32.totalorder %s4669_s17, %s4669_s17 }
  0x13   :  { %p4676_p8 = por %p4675_p7, %p4674_p6 }
  0x15   :  { %p4677_p9 = pnand %p4676_p8, %p4670_p5 }
  0x17   :  { %4680 = shalt.err (!%p4677_p9)
}
  0x18   :  { %52 = dma.hbm_to_vmem [thread:$0]  %s6255_s6, 64, %s50_s16, [#allocation6]  }
  0x19   :  { %4701 = dma.done.wait [#allocation3], 2048  }
  0x1a   :  { %4702 = vsyncadd [#allocation3], 4294965248 }
  0x1b   :  { %4703 = dma.done.wait [#allocation6], 64  }
  0x1c   :  { %4704 = vsyncadd [#allocation6], 4294967232  ;;  %v6264_v0 = vmov 0   ;;  %v4430_v1 = vld [vmem:[%s6253_s4 + $0x24] ss:$16 sps:$4 sm:$0xff]   ;;  %vm170_vm0 = vcmask 261120   ;;  %v6263_v29 = vlaneseq }
  0x1d   :  { %215 = vmatprep.mubr.bf16.mxu0 %v6264_v0  ;;  %288 = vmatprep.mubr.bf16.mxu1 %v6264_v0  ;;  %v4432_v2 = vld [vmem:[%s6253_s4 + $0x2c] ss:$16 sps:$4 sm:$0xff]   ;;  %v4434_v3 = vld [vmem:[%s6253_s4 + $0x20] ss:$16 sps:$4 sm:$0xff]   ;;  %v4435_v4 = vld [vmem:[%s6253_s4 + $0x28] ss:$16 sps:$4 sm:$0xff]  }
  0x1e   :  { %4429 = vset.pattern.permute.xlu1 %v6264_v0  ;;  %4428 = vset.pattern.permute.xlu0 %v6264_v0  ;;  %v4436_v5 = vld [vmem:[%s6253_s4 + $0x4] ss:$16 sps:$4 sm:$0xff]   ;;  %v4438_v6 = vld [vmem:[%s6253_s4 + $0xc] ss:$16 sps:$4 sm:$0xff]   ;;  %v4440_v7 = vld [vmem:[%s6253_s4] ss:$16 sps:$4 sm:$0xff]  }
  0x1f   :  { %195 = vmatprep.subr.bf16.mxu0 %v4430_v1  ;;  %268 = vmatprep.subr.bf16.mxu1 %v4432_v2  ;;  %v4441_v8 = vld [vmem:[%s6253_s4 + $0x8] ss:$16 sps:$4 sm:$0xff]   ;;  %v4442_v9 = vld [vmem:[%s6249_s0] sm:$0xff]   ;;  %v4836_v14 = vld [vmem:[#allocation2 + $0x6c] ss:$16 sps:$4 sm:$0xff]   ;;  %v4919_v30 = vshrl.u32 %v6263_v29, 7 }
  0x20   :  { %196 = vmatpush1.bf16.msra.mxu0 %v4434_v3  ;;  %269 = vmatpush1.bf16.msra.mxu1 %v4435_v4  ;;  %v4823_v10 = vld [vmem:[#allocation2 + $0x64] ss:$16 sps:$4 sm:$0xff]   ;;  %v4825_v11 = vld [vmem:[#allocation2 + $0x60] ss:$16 sps:$4 sm:$0xff]   ;;  %v4842_v16 = vld [vmem:[#allocation2 + $0x68] ss:$16 sps:$4 sm:$0xff]  }
  0x21   :  { %197 = vmatprep.subr.bf16.mxu0 %v4436_v5  ;;  %270 = vmatprep.subr.bf16.mxu1 %v4438_v6  ;;  %v4828_v12 = vld [vmem:[#allocation2 + $0x44] ss:$16 sps:$4 sm:$0xff]   ;;  %v4832_v13 = vld [vmem:[#allocation2 + $0x40] ss:$16 sps:$4 sm:$0xff]   ;;  %v4845_v17 = vld [vmem:[#allocation2 + $0x4c] ss:$16 sps:$4 sm:$0xff]  }
  0x22   :  { %v4840_v15 = vld [vmem:[#allocation2 + $0x24] ss:$16 sps:$4 sm:$0xff]   ;;  %v4446_v18 = vld [vmem:[%s6249_s0 + $0x8] sm:$0xff]   ;;  %v4852_v19 = vld [vmem:[#allocation2 + $0x20] ss:$16 sps:$4 sm:$0xff]   ;;  %6284 = vst [vmem:[#allocation11_spill] sm:$0xff] %v4919_v30 }
  0x23   :  { %v4856_v20 = vld [vmem:[#allocation2 + $0x48] ss:$16 sps:$4 sm:$0xff]   ;;  %v4858_v21 = vld [vmem:[#allocation2 + $0x4] ss:$16 sps:$4 sm:$0xff]   ;;  %v4860_v22 = vld [vmem:[#allocation2 + $0x2c] ss:$16 sps:$4 sm:$0xff]  }
  0x24   :  { %198 = vmatpush1.bf16.msra.mxu0 %v4440_v7  ;;  %271 = vmatpush1.bf16.msra.mxu1 %v4441_v8  ;;  %v4864_v23 = vld [vmem:[#allocation2] ss:$16 sps:$4 sm:$0xff]   ;;  %v4866_v24 = vld [vmem:[#allocation2 + $0x28] ss:$16 sps:$4 sm:$0xff]   ;;  %v4870_v25 = vld [vmem:[#allocation2 + $0xc] ss:$16 sps:$4 sm:$0xff]  }
  0x25   :  { %437 = vmatprep.subr.bf16.mxu0 %v4823_v10  ;;  %478 = vmatprep.subr.bf16.mxu1 %v4836_v14  ;;  %v4450_v26 = vld [vmem:[%s6249_s0 + $0x10] sm:$0xff]   ;;  %v4881_v27 = vld [vmem:[#allocation2 + $0x8] ss:$16 sps:$4 sm:$0xff]   ;;  %v4922_v31 = vsub.s32 2, %v4919_v30  ;;  %v4925_v32 = vsub.s32 0, %v4919_v30  ;;  %v4928_v33 = vsub.s32 3, %v4919_v30 }
  0x26   :  { %v4460_v28 = vld [vmem:[%s6249_s0 + $0x18] sm:$0xff]   ;;  %v88_v34 = vld [vmem:[#allocation5] sm:$0xf]  ;;  %v4938_v38 = vsub.s32 1, %v4919_v30  ;;  %vm425_vm1 = vcmask 523264   ;;  %vm1471_vm2 = vcmask 48128  }
  0x27   :  { %4247 = vmatmul.mubr.msk.bf16.vlgmr.msra.gmra.mxu0 %vm170_vm0, %v4442_v9  ;;  %4251 = vmatmul.mubr.msk.bf16.vlgmr.msra.gmra.mxu1 %vm170_vm0, %v4442_v9  ;;  %6285 = vst [vmem:[#allocation12_spill] sm:$0xff] %v4922_v31  ;;  %6286 = vst [vmem:[#allocation13_spill] sm:$0xff] %v4925_v32  ;;  %v4935_v37 = vrot.slane %v88_v34, %v4922_v31  ;;  %v93_v41 = vrot.slane %v88_v34, %v4925_v32  ;;  %vm1802_vm3 = vcmask 1045504   ;;  %vm4713_vm4 = vmmov 0   ;;  %s4715_s24 = smov [#allocation7]  }
  0x28   :  { %438 = vmatpush1.bf16.msra.mxu0 %v4825_v11  ;;  %225 = vmatprep.mubr.bf16.mxu0 %v6264_v0  ;;  %6287 = vst [vmem:[#allocation14_spill] sm:$0xff] %v4928_v33  ;;  %6288 = vst [vmem:[#allocation15_spill] sm:$0xff] %v4938_v38  ;;  %v4946_v42 = vrot.slane %v88_v34, %v4928_v33  ;;  %v97_v45 = vrot.slane %v88_v34, %v4938_v38  ;;  %vm1439_vm8 = vcmask 64512   ;;  %vm1603_vm11 = vcmask 46080   ;;  %s4225_s25 = sshll.u32 %s4715_s24, 4  ;;  %s4226_s25 = int_to_ptr.vmem [resolvable:$true] %s4225_s25 }
  0x29   :  { %298 = vmatprep.mubr.bf16.mxu1 %v6264_v0  ;;  %439 = vmatprep.subr.bf16.mxu0 %v4828_v12  ;;  %vm1765_vm13 = vcmask 1041409   ;;  %vm1767_vm14 = vcmask 1042434   ;;  %vm1769_vm15 = vcmask 1043459   ;;  %s4685_s28 = scalar_lea.vmem %s4226_s25, 32  ;;  %p4686_p11 = scmp.lt.s32.totalorder %s4226_s25, %s4226_s25 }
  0x2a   :  { %479 = vmatpush1.bf16.msra.mxu1 %v4842_v16 }
  0x2b   :  { %480 = vmatprep.subr.bf16.mxu1 %v4845_v17 }
  0x2c   :  { %440 = vmatpush1.bf16.msra.mxu0 %v4832_v13 }
  0x2d   :  { %441 = vmatprep.subr.bf16.mxu0 %v4840_v15 }
  0x2e   :  { %481 = vmatpush1.bf16.msra.mxu1 %v4856_v20 }
  0x2f   :  { %4248 = vmatmul.mubr.msk.bf16.gmra.mxu0 %vm170_vm0, %v4446_v18  ;;  %4252 = vmatmul.mubr.msk.bf16.gmra.mxu1 %vm170_vm0, %v4446_v18 }
  0x30   :  { %235 = vmatprep.mubr.bf16.mxu0 %v6264_v0  ;;  %308 = vmatprep.mubr.bf16.mxu1 %v6264_v0 }
  0x31   :  { %442 = vmatpush1.bf16.msra.mxu0 %v4852_v19  ;;  %482 = vmatprep.subr.bf16.mxu1 %v4860_v22 }
  0x32   :  { %443 = vmatprep.subr.bf16.mxu0 %v4858_v21  ;;  %483 = vmatpush1.bf16.msra.mxu1 %v4866_v24 }
  0x33   :  { %484 = vmatprep.subr.bf16.mxu1 %v4870_v25 }
  0x35   :  { %444 = vmatpush1.bf16.msra.mxu0 %v4864_v23 }
  0x36   :  { %547 = vmatprep.subr.bf16.mxu0 %v4823_v10  ;;  %485 = vmatpush1.bf16.msra.mxu1 %v4881_v27 }
  0x37   :  { %4249 = vmatmul.mubr.msk.bf16.gmra.mxu0 %vm170_vm0, %v4450_v26  ;;  %4253 = vmatmul.mubr.msk.bf16.gmra.mxu1 %vm170_vm0, %v4450_v26 }
  0x38   :  { %245 = vmatprep.mubr.bf16.mxu0 %v6264_v0  ;;  %318 = vmatprep.mubr.bf16.mxu1 %v6264_v0 }
  0x39   :  { %588 = vmatprep.subr.bf16.mxu1 %v4836_v14 }
  0x3f   :  { %4250 = vmatmul.mubr.msk.bf16.gmra.mxu0 %vm170_vm0, %v4460_v28  ;;  %4254 = vmatmul.mubr.msk.bf16.gmra.mxu1 %vm170_vm0, %v4460_v28 }
  0x40   :  { %461 = vmatprep.mubr.bf16.mxu0 %v6264_v0  ;;  %502 = vmatprep.mubr.bf16.mxu1 %v6264_v0 }
  0x47   :  { %462 = vmatmul.mubr.bf16.vlgmr.msra.gmra.mxu0 %v6264_v0  ;;  %503 = vmatmul.mubr.bf16.vlgmr.msra.gmra.mxu1 %v6264_v0 }
  0x48   :  { %548 = vmatpush1.bf16.msra.mxu0 %v4825_v11  ;;  %589 = vmatpush1.bf16.msra.mxu1 %v4842_v16 }
  0x49   :  { %549 = vmatprep.subr.bf16.mxu0 %v4828_v12  ;;  %590 = vmatprep.subr.bf16.mxu1 %v4845_v17 }
  0x4a   :  { %571 = vmatprep.mubr.bf16.mxu0 %v6264_v0  ;;  %612 = vmatprep.mubr.bf16.mxu1 %v6264_v0 }
  0x4c   :  { %550 = vmatpush1.bf16.msra.mxu0 %v4832_v13  ;;  %591 = vmatpush1.bf16.msra.mxu1 %v4856_v20 }
  0x4d   :  { %551 = vmatprep.subr.bf16.mxu0 %v4840_v15  ;;  %592 = vmatprep.subr.bf16.mxu1 %v4860_v22 }
  0x50   :  { %552 = vmatpush1.bf16.msra.mxu0 %v4852_v19  ;;  %593 = vmatpush1.bf16.msra.mxu1 %v4866_v24 }
  0x51   :  { %553 = vmatprep.subr.bf16.mxu0 %v4858_v21  ;;  %594 = vmatprep.subr.bf16.mxu1 %v4870_v25 }
  0x54   :  { %554 = vmatpush1.bf16.msra.mxu0 %v4864_v23  ;;  %595 = vmatpush1.bf16.msra.mxu1 %v4881_v27 }
  0x55   :  { %657 = vmatprep.subr.bf16.mxu0 %v4823_v10  ;;  %698 = vmatprep.subr.bf16.mxu1 %v4836_v14 }
  0xe7   :  { %v4930_v35 = vpop.f32.mrf.mxu0  ;;  %v4932_v36 = vpop.f32.mrf.mxu1 }
  0xe8   :  { %v218_v29 = vadd.f32 %v4930_v35, %v93_v41 }
  0xe9   :  { %v4940_v39 = vpop.f32.mrf.mxu0  ;;  %v4942_v40 = vpop.f32.mrf.mxu1 }
  0xeb   :  { %v221_v43 = vpop.f32.mrf.mxu0  ;;  %v294_v44 = vpop.f32.mrf.mxu1 }
  0xec   :  { %v4949_v46 = vadd.f32 %v221_v43, %v93_v41  ;;  %v4952_v47 = vadd.f32 %v294_v44, %v4935_v37 }
  0xed   :  { %v223_v48 = vpop.f32.mrf.mxu0  ;;  %v296_v49 = vpop.f32.mrf.mxu1 }
  0xee   :  { %v4954_v50 = vadd.f32 %v223_v48, %v97_v45  ;;  %v4957_v51 = vadd.f32 %v296_v49, %v4946_v42 }
  0xef   :  { %v227_v52 = vpop.f32.mrf.mxu0  ;;  %v300_v53 = vpop.f32.mrf.mxu1 }
  0xf0   :  { %v4959_v54 = vadd.f32 %v227_v52, %v93_v41  ;;  %v4962_v55 = vadd.f32 %v300_v53, %v4935_v37 }
  0xf1   :  { %v229_v56 = vpop.f32.mrf.mxu0  ;;  %v302_v57 = vpop.f32.mrf.mxu1 }
  0xf2   :  { %v4964_v58 = vadd.f32 %v229_v56, %v97_v45  ;;  %v4967_v59 = vadd.f32 %v302_v57, %v4946_v42 }
  0xf3   :  { %v231_v60 = vpop.f32.mrf.mxu0  ;;  %v304_v61 = vpop.f32.mrf.mxu1 }
  0xf4   :  { %v4969_v62 = vadd.f32 %v231_v60, %v93_v41  ;;  %v4972_v63 = vadd.f32 %v304_v61, %v4935_v37 }
  0xf5   :  { %v233_v1 = vpop.f32.mrf.mxu0  ;;  %v306_v2 = vpop.f32.mrf.mxu1 }
  0xf6   :  { %v4974_v3 = vadd.f32 %v233_v1, %v97_v45  ;;  %v4977_v4 = vadd.f32 %v306_v2, %v4946_v42 }
  0xf7   :  { %v237_v5 = vpop.f32.mrf.mxu0  ;;  %v310_v6 = vpop.f32.mrf.mxu1 }
  0xf8   :  { %v4979_v7 = vadd.f32 %v237_v5, %v93_v41  ;;  %v4982_v8 = vadd.f32 %v310_v6, %v4935_v37 }
  0xf9   :  { %v239_v9 = vpop.f32.mrf.mxu0  ;;  %v312_v18 = vpop.f32.mrf.mxu1 }
  0xfa   :  { %v4984_v26 = vadd.f32 %v239_v9, %v97_v45  ;;  %v4987_v28 = vadd.f32 %v312_v18, %v4946_v42 }
  0xfb   :  { %v241_v34 = vpop.f32.mrf.mxu0  ;;  %v314_v43 = vpop.f32.mrf.mxu1 }
  0xfc   :  { %v4989_v44 = vadd.f32 %v241_v34, %v93_v41  ;;  %v4992_v48 = vadd.f32 %v314_v43, %v4935_v37 }
  0xfd   :  { %v243_v49 = vpop.f32.mrf.mxu0  ;;  %v316_v52 = vpop.f32.mrf.mxu1 }
  0xfe   :  { %v4994_v53 = vadd.f32 %v243_v49, %v97_v45  ;;  %v4997_v56 = vadd.f32 %v316_v52, %v4946_v42 }
  0xff   :  { %v247_v57 = vpop.f32.mrf.mxu0  ;;  %v320_v60 = vpop.f32.mrf.mxu1 }
 0x100   :  { %v4999_v61 = vadd.f32 %v247_v57, %v93_v41  ;;  %v5002_v1 = vadd.f32 %v320_v60, %v4935_v37 }
 0x101   :  { %v249_v2 = vpop.f32.mrf.mxu0  ;;  %v322_v5 = vpop.f32.mrf.mxu1 }
 0x102   :  { %6289 = vst [vmem:[#allocation16_spill] sm:$0xff] %v5002_v1  ;;  %v5004_v6 = vadd.f32 %v249_v2, %v97_v45  ;;  %v5007_v9 = vadd.f32 %v322_v5, %v4946_v42  ;;  %v220_v5 = vadd.f32 %v4940_v39, %v97_v45 }
 0x103   :  { %v251_v18 = vpop.f32.mrf.mxu0  ;;  %v324_v34 = vpop.f32.mrf.mxu1 }
 0x104   :  { %v5009_v43 = vadd.f32 %v251_v18, %v93_v41  ;;  %v5012_v49 = vadd.f32 %v324_v34, %v4935_v37  ;;  %v293_v41 = vadd.f32 %v4942_v40, %v4946_v42 }
 0x105   :  { %v253_v52 = vpop.f32.mrf.mxu0  ;;  %v326_v57 = vpop.f32.mrf.mxu1 }
 0x106   :  { %6290 = vst [vmem:[#allocation17_spill] sm:$0xff] %v5009_v43  ;;  %6291 = vst [vmem:[#allocation18_spill] sm:$0xff] %v5012_v49  ;;  %v5015_v60 = vadd.f32 %v253_v52, %v97_v45  ;;  %v5018_v0 = vadd.f32 %v326_v57, %v4946_v42  ;;  %v291_v57 = vadd.f32 %v4932_v36, %v4935_v37 }
 0x107   :  { %v463_v2 = vpop.f32.mrf.mxu0  ;;  %v504_v32 = vpop.f32.mrf.mxu1 }
 0x108   :  { %v464_v30 = vadd.f32 %v463_v2, %v218_v29  ;;  %v505_v45 = vadd.f32 %v504_v32, %v291_v57 }
 0x109   :  { %v465_v33 = vpop.f32.mrf.mxu0  ;;  %v506_v18 = vpop.f32.mrf.mxu1 }
 0x10a   :  { %v4271_v31 = vmul.f32 -1.442695, %v464_v30  ;;  %v466_v38 = vadd.f32 %v465_v33, %v220_v5  ;;  %v507_v52 = vadd.f32 %v506_v18, %v293_v41 }
 0x10b   :  { %v467_v34 = vpop.f32.mrf.mxu0  ;;  %v508_v49 = vpop.f32.mrf.mxu1 }
 0x10c   :  { %4474 = vpow2.f32 %v4271_v31  ;;  %v4272_v43 = vmul.f32 -1.442695, %v466_v38  ;;  %v4273_v39 = vmul.f32 -1.442695, %v507_v52  ;;  %v6292_v34 = vmov 0  }
 0x10d   :  { %v468_v1 = vpop.f32.mrf.mxu0  ;;  %v509_v35 = vpop.f32.mrf.mxu1 }
 0x10e   :  { %4476 = vpow2.f32 %v4272_v43 }
 0x10f   :  { %4478 = vpow2.f32 %v4273_v39 }
 0x119   :  { %v4475_v29 = vpop.eup %4474 }
 0x11a   :  { %v514_v2 = vadd.f32 1.0, %v4475_v29 }
 0x11b   :  { %v4477_v30 = vpop.eup %4476 }
 0x11c   :  { %4480 = vrcp.f32 %v514_v2  ;;  %v520_v33 = vadd.f32 1.0, %v4477_v30  ;;  %v4479_v31 = vpop.eup %4478 }
 0x11d   :  { %4482 = vtanh.f32 %v505_v45  ;;  %v527_v49 = vadd.f32 1.0, %v4479_v31 }
 0x11e   :  { %4484 = vrcp.f32 %v520_v33 }
 0x11f   :  { %4486 = vrcp.f32 %v527_v49 }
 0x129   :  { %v4481_v38 = vpop.eup %4480 }
 0x12a   :  { %v4483_v1 = vpop.eup %4482 }
 0x12b   :  { %v4485_v43 = vpop.eup %4484  ;;  %v531_v42 = vmul.f32 %v4483_v1, %v4481_v38 }
 0x12c   :  { %v530_v40 = vmul.f32 0.0, %v4485_v43  ;;  %v4487_v36 = vpop.eup %4486 }
 0x12e   :  { %v532_v5 = vadd.f32 %v531_v42, %v530_v40 }
 0x130   :  { %4488 = vtanh.f32 %v532_v5 }
 0x13d   :  { %v4489_v37 = vpop.eup %4488 }
 0x13e   :  { %v5025_v32 = vmul.f32 %v4489_v37, %v4487_v36 }
 0x140   :  { %v535_v18 = vpack.c.bf16 %v5025_v32, %v5025_v32 }
 0x142   :  { %4274 = vmatmul.mubr.msk.bf16.vlgmr.msra.gmra.mxu0 %vm425_vm1, %v535_v18  ;;  %4275 = vmatmul.mubr.msk.bf16.vlgmr.msra.gmra.mxu1 %vm425_vm1, %v535_v18 }
 0x143   :  { %658 = vmatpush1.bf16.msra.mxu0 %v4825_v11  ;;  %699 = vmatpush1.bf16.msra.mxu1 %v4842_v16 }
 0x144   :  { %659 = vmatprep.subr.bf16.mxu0 %v4828_v12  ;;  %700 = vmatprep.subr.bf16.mxu1 %v4845_v17 }
 0x145   :  { %681 = vmatprep.mubr.bf16.mxu0 %v6292_v34  ;;  %722 = vmatprep.mubr.bf16.mxu1 %v6292_v34 }
 0x147   :  { %660 = vmatpush1.bf16.msra.mxu0 %v4832_v13  ;;  %701 = vmatpush1.bf16.msra.mxu1 %v4856_v20 }
 0x148   :  { %661 = vmatprep.subr.bf16.mxu0 %v4840_v15  ;;  %702 = vmatprep.subr.bf16.mxu1 %v4860_v22 }
 0x14b   :  { %662 = vmatpush1.bf16.msra.mxu0 %v4852_v19  ;;  %703 = vmatpush1.bf16.msra.mxu1 %v4866_v24 }
 0x14c   :  { %663 = vmatprep.subr.bf16.mxu0 %v4858_v21  ;;  %704 = vmatprep.subr.bf16.mxu1 %v4870_v25 }
 0x14f   :  { %664 = vmatpush1.bf16.msra.mxu0 %v4864_v23  ;;  %705 = vmatpush1.bf16.msra.mxu1 %v4881_v27 }
 0x150   :  { %767 = vmatprep.subr.bf16.mxu0 %v4823_v10  ;;  %808 = vmatprep.subr.bf16.mxu1 %v4836_v14 }
 0x202   :  { %v573_v35 = vpop.f32.mrf.mxu0  ;;  %v614_v41 = vpop.f32.mrf.mxu1 }
 0x203   :  { %v574_v52 = vadd.f32 %v573_v35, %v4949_v46  ;;  %v615_v43 = vadd.f32 %v614_v41, %v4952_v47 }
 0x204   :  { %v575_v57 = vpop.f32.mrf.mxu0  ;;  %v616_v39 = vpop.f32.mrf.mxu1 }
 0x205   :  { %v4276_v29 = vmul.f32 -1.442695, %v574_v52  ;;  %v576_v45 = vadd.f32 %v575_v57, %v4954_v50  ;;  %v617_v1 = vadd.f32 %v616_v39, %v4957_v51 }
 0x206   :  { %v577_v2 = vpop.f32.mrf.mxu0  ;;  %v618_v30 = vpop.f32.mrf.mxu1 }
 0x207   :  { %4490 = vpow2.f32 %v4276_v29  ;;  %v4277_v33 = vmul.f32 -1.442695, %v576_v45  ;;  %v4278_v49 = vmul.f32 -1.442695, %v617_v1 }
 0x208   :  { %v578_v31 = vpop.f32.mrf.mxu0  ;;  %v619_v38 = vpop.f32.mrf.mxu1 }
 0x209   :  { %4492 = vpow2.f32 %v4277_v33 }
 0x20a   :  { %4494 = vtanh.f32 %v615_v43 }
 0x20b   :  { %4496 = vpow2.f32 %v4278_v49 }
 0x214   :  { %v4491_v40 = vpop.eup %4490 }
 0x215   :  { %v624_v42 = vadd.f32 1.0, %v4491_v40 }
 0x216   :  { %v4493_v46 = vpop.eup %4492 }
 0x217   :  { %4498 = vrcp.f32 %v624_v42  ;;  %v630_v36 = vadd.f32 1.0, %v4493_v46  ;;  %v4495_v50 = vpop.eup %4494 }
 0x218   :  { %v4497_v37 = vpop.eup %4496 }
 0x219   :  { %4500 = vrcp.f32 %v630_v36  ;;  %v637_v57 = vadd.f32 1.0, %v4497_v37 }
 0x21b   :  { %4502 = vrcp.f32 %v637_v57 }
 0x224   :  { %v4499_v18 = vpop.eup %4498 }
 0x225   :  { %v641_v35 = vmul.f32 %v4499_v18, %v4495_v50 }
 0x226   :  { %v4501_v52 = vpop.eup %4500 }
 0x227   :  { %v640_v29 = vmul.f32 %v4501_v52, %v532_v5 }
 0x228   :  { %v4503_v47 = vpop.eup %4502 }
 0x229   :  { %v642_v45 = vadd.f32 %v641_v35, %v640_v29 }
 0x22b   :  { %4504 = vtanh.f32 %v642_v45 }
 0x238   :  { %v4505_v51 = vpop.eup %4504 }
 0x239   :  { %v5053_v41 = vmul.f32 %v4505_v51, %v4503_v47 }
 0x23b   :  { %v645_v39 = vpack.c.bf16 %v5053_v41, %v5053_v41 }
 0x23d   :  { %4279 = vmatmul.mubr.msk.bf16.vlgmr.msra.gmra.mxu0 %vm425_vm1, %v645_v39  ;;  %4280 = vmatmul.mubr.msk.bf16.vlgmr.msra.gmra.mxu1 %vm425_vm1, %v645_v39 }
 0x23e   :  { %768 = vmatpush1.bf16.msra.mxu0 %v4825_v11  ;;  %809 = vmatpush1.bf16.msra.mxu1 %v4842_v16 }
 0x23f   :  { %769 = vmatprep.subr.bf16.mxu0 %v4828_v12  ;;  %810 = vmatprep.subr.bf16.mxu1 %v4845_v17 }
 0x240   :  { %791 = vmatprep.mubr.bf16.mxu0 %v6292_v34  ;;  %832 = vmatprep.mubr.bf16.mxu1 %v6292_v34 }
 0x242   :  { %770 = vmatpush1.bf16.msra.mxu0 %v4832_v13  ;;  %811 = vmatpush1.bf16.msra.mxu1 %v4856_v20 }
 0x243   :  { %771 = vmatprep.subr.bf16.mxu0 %v4840_v15  ;;  %812 = vmatprep.subr.bf16.mxu1 %v4860_v22 }
 0x246   :  { %772 = vmatpush1.bf16.msra.mxu0 %v4852_v19  ;;  %813 = vmatpush1.bf16.msra.mxu1 %v4866_v24 }
 0x247   :  { %773 = vmatprep.subr.bf16.mxu0 %v4858_v21  ;;  %814 = vmatprep.subr.bf16.mxu1 %v4870_v25 }
 0x24a   :  { %774 = vmatpush1.bf16.msra.mxu0 %v4864_v23  ;;  %815 = vmatpush1.bf16.msra.mxu1 %v4881_v27 }
 0x24b   :  { %877 = vmatprep.subr.bf16.mxu0 %v4823_v10  ;;  %918 = vmatprep.subr.bf16.mxu1 %v4836_v14 }
 0x2fd   :  { %v683_v5 = vpop.f32.mrf.mxu0  ;;  %v724_v2 = vpop.f32.mrf.mxu1 }
 0x2fe   :  { %v684_v30 = vadd.f32 %v683_v5, %v4959_v54  ;;  %v725_v50 = vadd.f32 %v724_v2, %v4962_v55 }
 0x2ff   :  { %v685_v33 = vpop.f32.mrf.mxu0  ;;  %v726_v31 = vpop.f32.mrf.mxu1 }
 0x300   :  { %v4281_v38 = vmul.f32 -1.442695, %v684_v30  ;;  %v686_v1 = vadd.f32 %v685_v33, %v4964_v58  ;;  %v727_v36 = vadd.f32 %v726_v31, %v4967_v59 }
 0x301   :  { %v687_v43 = vpop.f32.mrf.mxu0  ;;  %v728_v49 = vpop.f32.mrf.mxu1 }
 0x302   :  { %4506 = vpow2.f32 %v4281_v38  ;;  %v4282_v40 = vmul.f32 -1.442695, %v686_v1  ;;  %v4283_v37 = vmul.f32 -1.442695, %v727_v36 }
 0x303   :  { %v688_v42 = vpop.f32.mrf.mxu0  ;;  %v729_v46 = vpop.f32.mrf.mxu1 }
 0x304   :  { %4508 = vpow2.f32 %v4282_v40 }
 0x305   :  { %4510 = vtanh.f32 %v725_v50 }
 0x306   :  { %4512 = vpow2.f32 %v4283_v37 }
 0x30f   :  { %v4507_v18 = vpop.eup %4506 }
 0x310   :  { %v734_v35 = vadd.f32 1.0, %v4507_v18 }
 0x311   :  { %v4509_v54 = vpop.eup %4508 }
 0x312   :  { %4514 = vrcp.f32 %v734_v35  ;;  %v740_v52 = vadd.f32 1.0, %v4509_v54  ;;  %v4511_v58 = vpop.eup %4510 }
 0x313   :  { %v4513_v57 = vpop.eup %4512 }
 0x314   :  { %4516 = vrcp.f32 %v740_v52  ;;  %v747_v39 = vadd.f32 1.0, %v4513_v57 }
 0x316   :  { %4518 = vrcp.f32 %v747_v39 }
 0x31f   :  { %v4515_v29 = vpop.eup %4514 }
 0x320   :  { %v751_v47 = vmul.f32 %v4515_v29, %v4511_v58 }
 0x321   :  { %v4517_v51 = vpop.eup %4516 }
 0x322   :  { %v750_v5 = vmul.f32 %v4517_v51, %v642_v45 }
 0x323   :  { %v4519_v55 = vpop.eup %4518 }
 0x324   :  { %v752_v30 = vadd.f32 %v751_v47, %v750_v5 }
 0x326   :  { %4520 = vtanh.f32 %v752_v30 }
 0x333   :  { %v4521_v59 = vpop.eup %4520 }
 0x334   :  { %v5081_v2 = vmul.f32 %v4521_v59, %v4519_v55 }
 0x336   :  { %v755_v33 = vpack.c.bf16 %v5081_v2, %v5081_v2 }
 0x338   :  { %4284 = vmatmul.mubr.msk.bf16.vlgmr.msra.gmra.mxu0 %vm425_vm1, %v755_v33  ;;  %4285 = vmatmul.mubr.msk.bf16.vlgmr.msra.gmra.mxu1 %vm425_vm1, %v755_v33 }
 0x339   :  { %878 = vmatpush1.bf16.msra.mxu0 %v4825_v11  ;;  %919 = vmatpush1.bf16.msra.mxu1 %v4842_v16 }
 0x33a   :  { %879 = vmatprep.subr.bf16.mxu0 %v4828_v12  ;;  %920 = vmatprep.subr.bf16.mxu1 %v4845_v17 }
 0x33b   :  { %901 = vmatprep.mubr.bf16.mxu0 %v6292_v34  ;;  %942 = vmatprep.mubr.bf16.mxu1 %v6292_v34 }
 0x33d   :  { %880 = vmatpush1.bf16.msra.mxu0 %v4832_v13  ;;  %921 = vmatpush1.bf16.msra.mxu1 %v4856_v20 }
 0x33e   :  { %881 = vmatprep.subr.bf16.mxu0 %v4840_v15  ;;  %922 = vmatprep.subr.bf16.mxu1 %v4860_v22 }
 0x341   :  { %882 = vmatpush1.bf16.msra.mxu0 %v4852_v19  ;;  %923 = vmatpush1.bf16.msra.mxu1 %v4866_v24 }
 0x342   :  { %883 = vmatprep.subr.bf16.mxu0 %v4858_v21  ;;  %924 = vmatprep.subr.bf16.mxu1 %v4870_v25 }
 0x345   :  { %884 = vmatpush1.bf16.msra.mxu0 %v4864_v23  ;;  %925 = vmatpush1.bf16.msra.mxu1 %v4881_v27 }
 0x346   :  { %987 = vmatprep.subr.bf16.mxu0 %v4823_v10  ;;  %1028 = vmatprep.subr.bf16.mxu1 %v4836_v14 }
 0x3f8   :  { %v793_v45 = vpop.f32.mrf.mxu0  ;;  %v834_v31 = vpop.f32.mrf.mxu1 }
 0x3f9   :  { %v794_v38 = vadd.f32 %v793_v45, %v4969_v62  ;;  %v835_v35 = vadd.f32 %v834_v31, %v4972_v63 }
 0x3fa   :  { %v795_v1 = vpop.f32.mrf.mxu0  ;;  %v836_v43 = vpop.f32.mrf.mxu1 }
 0x3fb   :  { %v4286_v49 = vmul.f32 -1.442695, %v794_v38  ;;  %v796_v40 = vadd.f32 %v795_v1, %v4974_v3  ;;  %v837_v18 = vadd.f32 %v836_v43, %v4977_v4 }
 0x3fc   :  { %v797_v42 = vpop.f32.mrf.mxu0  ;;  %v838_v46 = vpop.f32.mrf.mxu1 }
 0x3fd   :  { %4522 = vpow2.f32 %v4286_v49  ;;  %v4287_v36 = vmul.f32 -1.442695, %v796_v40  ;;  %v4288_v54 = vmul.f32 -1.442695, %v837_v18 }
 0x3fe   :  { %v798_v50 = vpop.f32.mrf.mxu0  ;;  %v839_v37 = vpop.f32.mrf.mxu1 }
 0x3ff   :  { %4524 = vpow2.f32 %v4287_v36 }
 0x400   :  { %4526 = vtanh.f32 %v835_v35 }
 0x401   :  { %4528 = vpow2.f32 %v4288_v54 }
 0x40a   :  { %v4523_v52 = vpop.eup %4522 }
 0x40b   :  { %v844_v58 = vadd.f32 1.0, %v4523_v52 }
 0x40c   :  { %v4525_v62 = vpop.eup %4524 }
 0x40d   :  { %4530 = vrcp.f32 %v844_v58  ;;  %v850_v57 = vadd.f32 1.0, %v4525_v62  ;;  %v4527_v3 = vpop.eup %4526 }
 0x40e   :  { %v4529_v29 = vpop.eup %4528 }
 0x40f   :  { %4532 = vrcp.f32 %v850_v57  ;;  %v857_v5 = vadd.f32 1.0, %v4529_v29 }
 0x411   :  { %4534 = vrcp.f32 %v857_v5 }
 0x41a   :  { %v4531_v47 = vpop.eup %4530 }
 0x41b   :  { %v861_v51 = vmul.f32 %v4531_v47, %v4527_v3 }
 0x41c   :  { %v4533_v39 = vpop.eup %4532 }
 0x41d   :  { %v860_v55 = vmul.f32 %v4533_v39, %v752_v30 }
 0x41e   :  { %v4535_v63 = vpop.eup %4534 }
 0x41f   :  { %v862_v59 = vadd.f32 %v861_v51, %v860_v55 }
 0x421   :  { %4536 = vtanh.f32 %v862_v59 }
 0x42e   :  { %v4537_v4 = vpop.eup %4536 }
 0x42f   :  { %v5109_v33 = vmul.f32 %v4537_v4, %v4535_v63 }
 0x431   :  { %v865_v45 = vpack.c.bf16 %v5109_v33, %v5109_v33 }
 0x433   :  { %4289 = vmatmul.mubr.msk.bf16.vlgmr.msra.gmra.mxu0 %vm425_vm1, %v865_v45  ;;  %4290 = vmatmul.mubr.msk.bf16.vlgmr.msra.gmra.mxu1 %vm425_vm1, %v865_v45 }
 0x434   :  { %988 = vmatpush1.bf16.msra.mxu0 %v4825_v11  ;;  %1029 = vmatpush1.bf16.msra.mxu1 %v4842_v16 }
 0x435   :  { %989 = vmatprep.subr.bf16.mxu0 %v4828_v12  ;;  %1030 = vmatprep.subr.bf16.mxu1 %v4845_v17 }
 0x436   :  { %1011 = vmatprep.mubr.bf16.mxu0 %v6292_v34  ;;  %1052 = vmatprep.mubr.bf16.mxu1 %v6292_v34 }
 0x438   :  { %990 = vmatpush1.bf16.msra.mxu0 %v4832_v13  ;;  %1031 = vmatpush1.bf16.msra.mxu1 %v4856_v20 }
 0x439   :  { %991 = vmatprep.subr.bf16.mxu0 %v4840_v15  ;;  %1032 = vmatprep.subr.bf16.mxu1 %v4860_v22 }
 0x43c   :  { %992 = vmatpush1.bf16.msra.mxu0 %v4852_v19  ;;  %1033 = vmatpush1.bf16.msra.mxu1 %v4866_v24 }
 0x43d   :  { %993 = vmatprep.subr.bf16.mxu0 %v4858_v21  ;;  %1034 = vmatprep.subr.bf16.mxu1 %v4870_v25 }
 0x440   :  { %994 = vmatpush1.bf16.msra.mxu0 %v4864_v23  ;;  %1035 = vmatpush1.bf16.msra.mxu1 %v4881_v27 }
 0x441   :  { %1097 = vmatprep.subr.bf16.mxu0 %v4823_v10  ;;  %1138 = vmatprep.subr.bf16.mxu1 %v4836_v14 }
 0x4f3   :  { %v903_v30 = vpop.f32.mrf.mxu0  ;;  %v944_v31 = vpop.f32.mrf.mxu1 }
 0x4f4   :  { %v904_v38 = vadd.f32 %v903_v30, %v4979_v7  ;;  %v945_v35 = vadd.f32 %v944_v31, %v4982_v8 }
 0x4f5   :  { %v905_v1 = vpop.f32.mrf.mxu0  ;;  %v946_v43 = vpop.f32.mrf.mxu1 }
 0x4f6   :  { %v4291_v49 = vmul.f32 -1.442695, %v904_v38  ;;  %v906_v40 = vadd.f32 %v905_v1, %v4984_v26  ;;  %v947_v18 = vadd.f32 %v946_v43, %v4987_v28 }
 0x4f7   :  { %v907_v42 = vpop.f32.mrf.mxu0  ;;  %v948_v46 = vpop.f32.mrf.mxu1 }
 0x4f8   :  { %4538 = vpow2.f32 %v4291_v49  ;;  %v4292_v36 = vmul.f32 -1.442695, %v906_v40  ;;  %v4293_v54 = vmul.f32 -1.442695, %v947_v18 }
 0x4f9   :  { %v908_v50 = vpop.f32.mrf.mxu0  ;;  %v949_v37 = vpop.f32.mrf.mxu1 }
 0x4fa   :  { %4540 = vpow2.f32 %v4292_v36 }
 0x4fb   :  { %4542 = vtanh.f32 %v945_v35 }
 0x4fc   :  { %4544 = vpow2.f32 %v4293_v54 }
 0x505   :  { %v4539_v52 = vpop.eup %4538 }
 0x506   :  { %v954_v58 = vadd.f32 1.0, %v4539_v52 }
 0x507   :  { %v4541_v7 = vpop.eup %4540 }
 0x508   :  { %4546 = vrcp.f32 %v954_v58  ;;  %v960_v62 = vadd.f32 1.0, %v4541_v7  ;;  %v4543_v26 = vpop.eup %4542 }
 0x509   :  { %v4545_v57 = vpop.eup %4544 }
 0x50a   :  { %4548 = vrcp.f32 %v960_v62  ;;  %v967_v51 = vadd.f32 1.0, %v4545_v57 }
 0x50c   :  { %4550 = vrcp.f32 %v967_v51 }
 0x515   :  { %v4547_v3 = vpop.eup %4546 }
 0x516   :  { %v971_v29 = vmul.f32 %v4547_v3, %v4543_v26 }
 0x517   :  { %v4549_v47 = vpop.eup %4548 }
 0x518   :  { %v970_v39 = vmul.f32 %v4549_v47, %v862_v59 }
 0x519   :  { %v4551_v8 = vpop.eup %4550 }
 0x51a   :  { %v972_v5 = vadd.f32 %v971_v29, %v970_v39  ;;  %v4634_v39 = vld [vmem:[#allocation2 + $0x60] ss:$16 sps:$4 sm:$0xff]  }
 0x51c   :  { %4552 = vtanh.f32 %v972_v5 }
 0x529   :  { %v4553_v28 = vpop.eup %4552 }
 0x52a   :  { %v5137_v55 = vmul.f32 %v4553_v28, %v4551_v8 }
 0x52c   :  { %v975_v63 = vpack.c.bf16 %v5137_v55, %v5137_v55  ;;  %v5171_v62 = vsel %vm170_vm0, %v5109_v33, %v5137_v55  ;;  %v5180_v3 = vsel %vm170_vm0, %v5137_v55, %v5109_v33  ;;  %v4635_v33 = vld [vmem:[#allocation2 + $0x44] ss:$16 sps:$4 sm:$0xff]  }
 0x52e   :  { %4294 = vmatmul.mubr.msk.bf16.vlgmr.msra.gmra.mxu0 %vm425_vm1, %v975_v63  ;;  %4295 = vmatmul.mubr.msk.bf16.vlgmr.msra.gmra.mxu1 %vm425_vm1, %v975_v63 }
 0x52f   :  { %1098 = vmatpush1.bf16.msra.mxu0 %v4825_v11  ;;  %1139 = vmatpush1.bf16.msra.mxu1 %v4842_v16 }
 0x530   :  { %1099 = vmatprep.subr.bf16.mxu0 %v4828_v12  ;;  %1140 = vmatprep.subr.bf16.mxu1 %v4845_v17 }
 0x531   :  { %1121 = vmatprep.mubr.bf16.mxu0 %v6292_v34  ;;  %1162 = vmatprep.mubr.bf16.mxu1 %v6292_v34 }
 0x533   :  { %1100 = vmatpush1.bf16.msra.mxu0 %v4832_v13  ;;  %1141 = vmatpush1.bf16.msra.mxu1 %v4856_v20 }
 0x534   :  { %1101 = vmatprep.subr.bf16.mxu0 %v4840_v15  ;;  %1142 = vmatprep.subr.bf16.mxu1 %v4860_v22 }
 0x537   :  { %1102 = vmatpush1.bf16.msra.mxu0 %v4852_v19  ;;  %1143 = vmatpush1.bf16.msra.mxu1 %v4866_v24 }
 0x538   :  { %1103 = vmatprep.subr.bf16.mxu0 %v4858_v21  ;;  %1144 = vmatprep.subr.bf16.mxu1 %v4870_v25 }
 0x53b   :  { %1104 = vmatpush1.bf16.msra.mxu0 %v4864_v23  ;;  %1145 = vmatpush1.bf16.msra.mxu1 %v4881_v27 }
 0x53c   :  { %1207 = vmatprep.subr.bf16.mxu0 %v4823_v10  ;;  %1248 = vmatprep.subr.bf16.mxu1 %v4836_v14 }
 0x5ee   :  { %v1013_v11 = vpop.f32.mrf.mxu0  ;;  %v1054_v12 = vpop.f32.mrf.mxu1 }
 0x5ef   :  { %v1014_v13 = vadd.f32 %v1013_v11, %v4989_v44  ;;  %v1055_v14 = vadd.f32 %v1054_v12, %v4992_v48 }
 0x5f0   :  { %v1015_v59 = vpop.f32.mrf.mxu0  ;;  %v1056_v4 = vpop.f32.mrf.mxu1 }
 0x5f1   :  { %v4296_v45 = vmul.f32 -1.442695, %v1014_v13  ;;  %v1016_v30 = vadd.f32 %v1015_v59, %v4994_v53  ;;  %v1057_v10 = vadd.f32 %v1056_v4, %v4997_v56 }
 0x5f2   :  { %v1017_v31 = vpop.f32.mrf.mxu0  ;;  %v1058_v38 = vpop.f32.mrf.mxu1 }
 0x5f3   :  { %4554 = vpow2.f32 %v4296_v45  ;;  %v4297_v1 = vmul.f32 -1.442695, %v1016_v30  ;;  %v4298_v40 = vmul.f32 -1.442695, %v1057_v10  ;;  %v4470_v10 = vld [vmem:[%s6256_s7 + $0x18] sm:$0xff]  }
 0x5f4   :  { %v1018_v43 = vpop.f32.mrf.mxu0  ;;  %v1059_v49 = vpop.f32.mrf.mxu1 }
 0x5f5   :  { %4556 = vpow2.f32 %v4297_v1 }
 0x5f6   :  { %4558 = vtanh.f32 %v1055_v14  ;;  %v4471_v14 = vld [vmem:[%s6256_s7 + $0x10] sm:$0xff]  }
 0x5f7   :  { %4560 = vpow2.f32 %v4298_v40  ;;  %v4472_v40 = vld [vmem:[%s6256_s7 + $0x8] sm:$0xff]  }
 0x600   :  { %v4555_v42 = vpop.eup %4554 }
 0x601   :  { %v1064_v46 = vadd.f32 1.0, %v4555_v42  ;;  %v4473_v42 = vld [vmem:[%s6256_s7] sm:$0xff]  }
 0x602   :  { %v4557_v44 = vpop.eup %4556 }
 0x603   :  { %4562 = vrcp.f32 %v1064_v46  ;;  %v1070_v36 = vadd.f32 1.0, %v4557_v44  ;;  %v4559_v53 = vpop.eup %4558 }
 0x604   :  { %v4561_v50 = vpop.eup %4560 }
 0x605   :  { %4564 = vrcp.f32 %v1070_v36  ;;  %v1077_v54 = vadd.f32 1.0, %v4561_v50  ;;  %v6294_v36 = vld [vmem:[#allocation17_spill] sm:$0xff] }
 0x607   :  { %4566 = vrcp.f32 %v1077_v54 }
 0x610   :  { %v4563_v37 = vpop.eup %4562 }
 0x611   :  { %v1081_v18 = vmul.f32 %v4563_v37, %v4559_v53 }
 0x612   :  { %v4565_v35 = vpop.eup %4564 }
 0x613   :  { %v1080_v52 = vmul.f32 %v4565_v35, %v972_v5 }
 0x614   :  { %v4567_v48 = vpop.eup %4566 }
 0x615   :  { %v5165_v58 = vadd.f32 %v1081_v18, %v1080_v52 }
 0x617   :  { %4568 = vtanh.f32 %v5165_v58 }
 0x624   :  { %v4569_v56 = vpop.eup %4568 }
 0x625   :  { %v1084_v7 = vmul.f32 %v4569_v56, %v4567_v48 }
 0x627   :  { %v1085_v26 = vpack.c.bf16 %v1084_v7, %v1084_v7  ;;  %v5175_v57 = vsel %vm170_vm0, %v5081_v2, %v1084_v7  ;;  %v5184_v29 = vsel %vm170_vm0, %v1084_v7, %v5081_v2  ;;  %v4636_v2 = vld [vmem:[#allocation2 + $0x40] ss:$16 sps:$4 sm:$0xff]  }
 0x628   :  { %v1314_v47 = vpack.c.bf16 %v5171_v62, %v5175_v57  ;;  %v1315_v51 = vpack.c.bf16 %v5184_v29, %v5180_v3  ;;  %v4319_v62 = vld [vmem:[%s6258_s9] ss:$0 sm:$0xff] }
 0x629   :  { %4299 = vmatmul.mubr.msk.bf16.vlgmr.msra.gmra.mxu0 %vm425_vm1, %v1085_v26  ;;  %4300 = vmatmul.mubr.msk.bf16.vlgmr.msra.gmra.mxu1 %vm425_vm1, %v1085_v26  ;;  %v6295_v26 = vld [vmem:[#allocation18_spill] sm:$0xff] }
 0x62a   :  { %1208 = vmatpush1.bf16.msra.mxu0 %v4634_v39  ;;  %1249 = vmatpush1.bf16.msra.mxu1 %v4842_v16 }
 0x62b   :  { %1209 = vmatprep.subr.bf16.mxu0 %v4635_v33  ;;  %1250 = vmatprep.subr.bf16.mxu1 %v4845_v17 }
 0x62c   :  { %1231 = vmatprep.mubr.bf16.mxu0 %v6292_v34  ;;  %1272 = vmatprep.mubr.bf16.mxu1 %v6292_v34 }
 0x62e   :  { %1210 = vmatpush1.bf16.msra.mxu0 %v4636_v2  ;;  %1251 = vmatpush1.bf16.msra.mxu1 %v4856_v20 }
 0x62f   :  { %1211 = vmatprep.subr.bf16.mxu0 %v4840_v15  ;;  %1252 = vmatprep.subr.bf16.mxu1 %v4860_v22 }
 0x632   :  { %1212 = vmatpush1.bf16.msra.mxu0 %v4852_v19  ;;  %1253 = vmatpush1.bf16.msra.mxu1 %v4866_v24 }
 0x633   :  { %1213 = vmatprep.subr.bf16.mxu0 %v4858_v21  ;;  %1254 = vmatprep.subr.bf16.mxu1 %v4870_v25  ;;  %v6293_v25 = vld [vmem:[#allocation16_spill] sm:$0xff] }
 0x636   :  { %1214 = vmatpush1.bf16.msra.mxu0 %v4864_v23  ;;  %1255 = vmatpush1.bf16.msra.mxu1 %v4881_v27 }
 0x637   :  { %4364 = vmatprep.subr.bf16.mxu0 %v4470_v10 }
 0x6e9   :  { %v1123_v16 = vpop.f32.mrf.mxu0  ;;  %v1164_v17 = vpop.f32.mrf.mxu1 }
 0x6ea   :  { %v1124_v20 = vadd.f32 %v1123_v16, %v4999_v61  ;;  %v1165_v27 = vadd.f32 %v1164_v17, %v6293_v25 }
 0x6eb   :  { %v1125_v34 = vpop.f32.mrf.mxu0  ;;  %v1166_v15 = vpop.f32.mrf.mxu1 }
 0x6ec   :  { %v4301_v5 = vmul.f32 -1.442695, %v1124_v20  ;;  %v1126_v22 = vadd.f32 %v1125_v34, %v5004_v6  ;;  %v1167_v23 = vadd.f32 %v1166_v15, %v5007_v9 }
 0x6ed   :  { %v1127_v19 = vpop.f32.mrf.mxu0  ;;  %v1168_v8 = vpop.f32.mrf.mxu1 }
 0x6ee   :  { %4570 = vpow2.f32 %v4301_v5  ;;  %v4302_v24 = vmul.f32 -1.442695, %v1126_v22  ;;  %v4303_v55 = vmul.f32 -1.442695, %v1167_v23 }
 0x6ef   :  { %v1128_v21 = vpop.f32.mrf.mxu0  ;;  %v1169_v28 = vpop.f32.mrf.mxu1 }
 0x6f0   :  { %4572 = vpow2.f32 %v4302_v24 }
 0x6f1   :  { %4574 = vtanh.f32 %v1165_v27 }
 0x6f2   :  { %4576 = vpow2.f32 %v4303_v55 }
 0x6fb   :  { %v4571_v63 = vpop.eup %4570 }
 0x6fc   :  { %v1174_v11 = vadd.f32 1.0, %v4571_v63 }
 0x6fd   :  { %v4573_v61 = vpop.eup %4572 }
 0x6fe   :  { %4578 = vrcp.f32 %v1174_v11  ;;  %v1180_v12 = vadd.f32 1.0, %v4573_v61  ;;  %v4575_v6 = vpop.eup %4574 }
 0x6ff   :  { %v4577_v13 = vpop.eup %4576 }
 0x700   :  { %4580 = vrcp.f32 %v1180_v12  ;;  %v1187_v30 = vadd.f32 1.0, %v4577_v13 }
 0x702   :  { %4582 = vrcp.f32 %v1187_v30 }
 0x70b   :  { %v4579_v59 = vpop.eup %4578 }
 0x70c   :  { %v1191_v4 = vmul.f32 %v4579_v59, %v4575_v6 }
 0x70d   :  { %v4581_v45 = vpop.eup %4580 }
 0x70e   :  { %v1190_v31 = vmul.f32 %v4581_v45, %v5165_v58 }
 0x70f   :  { %v4583_v38 = vpop.eup %4582 }
 0x710   :  { %v1192_v9 = vadd.f32 %v1191_v4, %v1190_v31  ;;  %v5276_v31 = vld [vmem:[%s6261_s12] sm:$0x3f] }
 0x712   :  { %4584 = vtanh.f32 %v1192_v9 }
 0x71f   :  { %v4585_v1 = vpop.eup %4584 }
 0x720   :  { %v1194_v43 = vmul.f32 %v4585_v1, %v4583_v38  ;;  %v5292_v38 = vld [vmem:[%s6251_s2] sm:$0xff] }
 0x721   :  { %v6296_v1 = vld [vmem:[#allocation15_spill] sm:$0xff] }
 0x722   :  { %v1195_v49 = vpack.c.bf16 %v1194_v43, %v1194_v43  ;;  %v1306_v25 = vsel %vm170_vm0, %v5053_v41, %v1194_v43  ;;  %v1311_v27 = vsel %vm170_vm0, %v1194_v43, %v5053_v41  ;;  %v1501_v43 = vrot.slane %v5292_v38, %v6296_v1 }
 0x724   :  { %4304 = vmatmul.mubr.msk.bf16.vlgmr.msra.gmra.mxu0 %vm425_vm1, %v1195_v49  ;;  %4305 = vmatmul.mubr.msk.bf16.vlgmr.msra.gmra.mxu1 %vm425_vm1, %v1195_v49 }
 0x725   :  { %4365 = vmatpush3.bf16.msra.mxu0 %v4470_v10 }
 0x726   :  { %4366 = vmatprep.subr.bf16.mxu0 %v4471_v14 }
 0x729   :  { %4367 = vmatpush3.bf16.msra.mxu0 %v4471_v14 }
 0x72a   :  { %4368 = vmatprep.subr.bf16.mxu0 %v4472_v40 }
 0x72d   :  { %4369 = vmatpush3.bf16.msra.mxu0 %v4472_v40 }
 0x72e   :  { %4370 = vmatprep.subr.bf16.mxu0 %v4473_v42 }
 0x731   :  { %4371 = vmatpush3.bf16.msra.mxu0 %v4473_v42 }
 0x7e4   :  { %v1233_v46 = vpop.f32.mrf.mxu0  ;;  %v1274_v44 = vpop.f32.mrf.mxu1 }
 0x7e5   :  { %v1234_v53 = vadd.f32 %v1233_v46, %v6294_v36  ;;  %v1275_v39 = vadd.f32 %v1274_v44, %v6295_v26 }
 0x7e6   :  { %v1235_v50 = vpop.f32.mrf.mxu0  ;;  %v1276_v37 = vpop.f32.mrf.mxu1 }
 0x7e7   :  { %v4306_v18 = vmul.f32 -1.442695, %v1234_v53  ;;  %v1236_v35 = vadd.f32 %v1235_v50, %v5015_v60  ;;  %v1277_v7 = vadd.f32 %v1276_v37, %v5018_v0 }
 0x7e8   :  { %v1237_v54 = vpop.f32.mrf.mxu0  ;;  %v1278_v52 = vpop.f32.mrf.mxu1 }
 0x7e9   :  { %4586 = vpow2.f32 %v4306_v18  ;;  %v4307_v58 = vmul.f32 -1.442695, %v1236_v35  ;;  %v4308_v33 = vmul.f32 -1.442695, %v1277_v7  ;;  %v6298_v52 = vld [vmem:[#allocation12_spill] sm:$0xff] }
 0x7ea   :  { %v1238_v48 = vpop.f32.mrf.mxu0  ;;  %v1279_v56 = vpop.f32.mrf.mxu1 }
 0x7eb   :  { %4588 = vpow2.f32 %v4307_v58  ;;  %v1897_v58 = vrot.slane %v5292_v38, %v6298_v52 }
 0x7ec   :  { %4590 = vtanh.f32 %v1275_v39 }
 0x7ed   :  { %4592 = vpow2.f32 %v4308_v33 }
 0x7f6   :  { %v4587_v2 = vpop.eup %4586 }
 0x7f7   :  { %v1284_v16 = vadd.f32 1.0, %v4587_v2 }
 0x7f8   :  { %v4589_v17 = vpop.eup %4588 }
 0x7f9   :  { %4594 = vrcp.f32 %v1284_v16  ;;  %v1290_v20 = vadd.f32 1.0, %v4589_v17  ;;  %v4591_v60 = vpop.eup %4590 }
 0x7fa   :  { %v4593_v34 = vpop.eup %4592 }
 0x7fb   :  { %4596 = vrcp.f32 %v1290_v20  ;;  %v1297_v19 = vadd.f32 1.0, %v4593_v34 }
 0x7fd   :  { %4598 = vrcp.f32 %v1297_v19 }
 0x806   :  { %v4595_v15 = vpop.eup %4594 }
 0x807   :  { %v1301_v5 = vmul.f32 %v4595_v15, %v4591_v60 }
 0x808   :  { %v4597_v22 = vpop.eup %4596 }
 0x809   :  { %v1300_v8 = vmul.f32 %v4597_v22, %v1192_v9  ;;  %v6276_v9 = vmov 0.0  }
 0x80a   :  { %v4599_v0 = vpop.eup %4598  ;;  %4380 = vmatprep.subr.mxu1 %v6276_v9  ;;  %4382 = vmatprep.mubr.msk.f32.mxu1 %vm4713_vm4, %v6276_v9 }
 0x80b   :  { %v1302_v24 = vadd.f32 %v1301_v5, %v1300_v8  ;;  %4381 = vmatpush3.msk.msra.mxu1 %vm1802_vm3, %v5276_v31  ;;  %4410 = vmatprep.subr.mxu0 %v6276_v9  ;;  %v6300_v5 = vld [vmem:[#allocation14_spill] sm:$0xff] }
 0x80c   :  { %4385 = vmatprep.subr.mxu1 %v6276_v9  ;;  %v2281_v22 = vrot.slane %v5292_v38, %v6300_v5 }
 0x80d   :  { %4600 = vtanh.f32 %v1302_v24 }
 0x81a   :  { %v4601_v21 = vpop.eup %4600 }
 0x81b   :  { %v1304_v28 = vmul.f32 %v4601_v21, %v4599_v0 }
 0x81d   :  { %v1305_v23 = vsel %vm170_vm0, %v5025_v32, %v1304_v28  ;;  %v1312_v55 = vsel %vm170_vm0, %v1304_v28, %v5025_v32  ;;  %v5249_v32 = vld [vmem:[%s6257_s8] ss:$0 sm:$0xff]  ;;  %vm1771_vm0 = vcmask 1044484  }
 0x81e   :  { %v1313_v63 = vpack.c.bf16 %v1306_v25, %v1305_v23  ;;  %v1316_v11 = vpack.c.bf16 %v1312_v55, %v1311_v27 }
 0x820   :  { %4372 = vmatprep.mubr.msk.bf16.mxu0 %vm425_vm1, %v1313_v63 }
 0x821   :  { %4373 = vmatmul.mubr.msk.bf16.vlgmr.msra.gmra.mxu0 %vm425_vm1, %v1314_v47 }
 0x822   :  { %4376 = vmatprep.mubr.msk.bf16.mxu0 %vm425_vm1, %v1315_v51  ;;  %4411 = vmatpush3.msk.msra.mxu0 %vm1802_vm3, %v5276_v31 }
 0x829   :  { %4377 = vmatmul.mubr.msk.bf16.gmra.mxu0 %vm425_vm1, %v1316_v11  ;;  %vm1773_vm1 = vcmask 1045509  }
 0x82a   :  { %4412 = vmatprep.mubr.msk.f32.mxu0 %vm4713_vm4, %v6276_v9 }
 0x8e1   :  { %v4374_v41 = vpop.f32.mrf.mxu0 }
 0x8e2   :  { %v5252_v61 = vadd.f32 %v4374_v41, %v5249_v32 }
 0x8e3   :  { %v1402_v12 = vpop.f32.mrf.mxu0 }
 0x8e4   :  { %v1403_v57 = vadd.f32 %v5249_v32, %v1402_v12  ;;  %v6302_v12 = vld [vmem:[#allocation11_spill] sm:$0xff] }
 0x8e5   :  { %v4375_v3 = vpop.f32.mrf.mxu0 }
 0x8e6   :  { %v5258_v29 = vadd.f32 %v4319_v62, %v1403_v57  ;;  %v5261_v47 = vadd.f32 %v4375_v3, %v5249_v32  ;;  %v5339_v62 = vsub.s32 4, %v6302_v12 }
 0x8e7   :  { %v1405_v51 = vpop.f32.mrf.mxu0 }
 0x8e8   :  { %v1793_v6 = vsel %vm1471_vm2, %v5258_v29, -inf  ;;  %v5306_v50 = vadd.f32 %v5249_v32, %v1405_v51  ;;  %v2665_v57 = vrot.slane %v5292_v38, %v5339_v62 }
 0x8e9   :  { %v4378_v13 = vpop.f32.mrf.mxu0  ;;  %1794 = vmax.xlane.f32.xlu0 %v1793_v6 }
 0x8ea   :  { %v5266_v59 = vadd.f32 %v4378_v13, %v5249_v32 }
 0x8eb   :  { %v5268_v4 = vpop.f32.mrf.mxu0 }
 0x8ed   :  { %v4379_v45 = vpop.f32.mrf.mxu0 }
 0x8ee   :  { %v5271_v30 = vadd.f32 %v4379_v45, %v5249_v32 }
 0x8ff   :  { %1503 = vbcast.lane.b32.xlu0 %v1501_v43, 256 }
 0x903   :  { %2283 = vbcast.lane.b32.xlu0 %v2281_v22, 256 }
 0x972   :  { %v1795_v49 = vpop.xlane.xlu0 %1794 }
 0x973   :  { %v1796_v10 = vsub.f32 %v5258_v29, %v1795_v49 }
 0x975   :  { %v1797_v14 = vmul.f32 1.442695, %v1796_v10  ;;  %v1440_v10 = vsel %vm1439_vm8, %v5292_v38, 0.0 }
 0x976   :  { %v5303_v53 = vpop.permute.xlu0 %1503 }
 0x977   :  { %4602 = vpow2.f32 %v1797_v14  ;;  %6297 = vst [vmem:[#allocation16_spill] sm:$0xff] %v5303_v53  ;;  %vm1879_vm5 = vcmp.gt.f32.partialorder %v5303_v53, 0.0 }
 0x97a   :  { %v5333_v27 = vpop.permute.xlu0 %2283 }
 0x97b   :  { %6301 = vst [vmem:[#allocation18_spill] sm:$0xff] %v5333_v27  ;;  %vm2647_vm7 = vcmp.gt.f32.partialorder %v5333_v27, 0.0 }
 0x984   :  { %v4603_v40 = vpop.eup %4602 }
 0x985   :  { %4383 = vmatmul.mubr.msk.f32.vlgmr.msra.gmra.mxu1 %vm1471_vm2, %v4603_v40 }
 0x986   :  { %4386 = vmatpush3.msk.msra.mxu1 %vm1802_vm3, %v5276_v31  ;;  %4387 = vmatprep.mubr.msk.f32.mxu1 %vm4713_vm4, %v6276_v9 }
 0x987   :  { %4390 = vmatprep.subr.mxu1 %v6276_v9 }
 0xa45   :  { %v1872_v42 = vpop.f32.mrf.mxu1 }
 0xa46   :  { %4604 = vlog2.f32 %v1872_v42  ;;  %v5354_v42 = vadd.f32 %v5249_v32, %v5268_v4  ;;  %v5363_v4 = vsub.s32 5, %v6302_v12 }
 0xa47   :  { %v4384_v46 = vpop.f32.mrf.mxu1 }
 0xa53   :  { %v4605_v44 = vpop.eup %4604 }
 0xa54   :  { %v1877_v36 = vmul.f32 0.6931472, %v4605_v44  ;;  %v1441_v44 = vrot.slane %v1440_v10, 4 }
 0xa56   :  { %v1878_v37 = vadd.f32 %v1877_v36, %v1795_v49 }
 0xa58   :  { %v1880_v18 = vadd.f32 %v1878_v37, %v5306_v50 }
 0xa5a   :  { %v1883_v35 = vsel %vm1879_vm5, %v1880_v18, %v5258_v29  ;;  %v1442_v18 = vadd.f32 %v1441_v44, %v1440_v10  ;;  %v5417_v10 = vsub.s32 6, %v6302_v12 }
 0xa5b   :  { %v2181_v54 = vsel %vm1471_vm2, %v1883_v35, -inf }
 0xa5c   :  { %2182 = vmax.xlane.f32.xlu1 %v2181_v54  ;;  %v1443_v54 = vrot.slane %v1442_v18, 2 }
 0xa6d   :  { %1899 = vbcast.lane.b32.xlu1 %v1897_v58, 256  ;;  %v1444_v58 = vadd.f32 %v1443_v54, %v1442_v18 }
 0xae5   :  { %v2183_v48 = vpop.xlane.xlu1 %2182 }
 0xae6   :  { %v2184_v56 = vsub.f32 %v1883_v35, %v2183_v48 }
 0xae8   :  { %v2185_v7 = vmul.f32 1.442695, %v2184_v56 }
 0xae9   :  { %v5320_v17 = vpop.permute.xlu1 %1899 }
 0xaea   :  { %4606 = vpow2.f32 %v2185_v7  ;;  %6299 = vst [vmem:[#allocation17_spill] sm:$0xff] %v5320_v17  ;;  %vm2263_vm6 = vcmp.gt.f32.partialorder %v5320_v17, 0.0  ;;  %v3049_v7 = vrot.slane %v5292_v38, %v5363_v4  ;;  %v3577_v17 = vrot.slane %v5266_v59, %v6298_v52 }
 0xaf7   :  { %v4607_v26 = vpop.eup %4606 }
 0xaf8   :  { %4388 = vmatmul.mubr.msk.f32.vlgmr.msra.gmra.mxu1 %vm1471_vm2, %v4607_v26 }
 0xaf9   :  { %4391 = vmatpush3.msk.msra.mxu1 %vm1802_vm3, %v5276_v31  ;;  %4392 = vmatprep.mubr.msk.f32.mxu1 %vm4713_vm4, %v6276_v9 }
 0xafa   :  { %4395 = vmatprep.subr.mxu1 %v6276_v9 }
 0xbb8   :  { %v2256_v39 = vpop.f32.mrf.mxu1 }
 0xbb9   :  { %4608 = vlog2.f32 %v2256_v39 }
 0xbba   :  { %v4389_v33 = vpop.f32.mrf.mxu1 }
 0xbbb   :  { %v5370_v33 = vld [vmem:[%s6250_s1] sm:$0xff] }
 0xbc6   :  { %v4609_v2 = vpop.eup %4608 }
 0xbc7   :  { %v2261_v16 = vmul.f32 0.6931472, %v4609_v2  ;;  %v6304_v2 = vld [vmem:[#allocation13_spill] sm:$0xff] }
 0xbc9   :  { %v2262_v20 = vadd.f32 %v2261_v16, %v2183_v48  ;;  %v1445_v48 = vrot.slane %v1444_v58, 1  ;;  %v1456_v16 = vrot.slane %v5370_v33, %v6304_v2 }
 0xbcb   :  { %v2264_v60 = vadd.f32 %v2262_v20, %v5252_v61  ;;  %v1446_v56 = vadd.f32 %v1445_v48, %v1444_v58 }
 0xbcd   :  { %v2267_v34 = vsel %vm2263_vm6, %v2264_v60, %v1883_v35  ;;  %v4415_v26 = vtrunc.f32 %v1446_v56 }
 0xbce   :  { %v2565_v15 = vsel %vm1471_vm2, %v2267_v34, -inf }
 0xbcf   :  { %2566 = vmax.xlane.f32.xlu1 %v2565_v15  ;;  %v4416_v39 = vcvt.f32.s32 %v4415_v26  ;;  %v4714_v15 = vmov 1966171168  }
 0xbd0   :  { %v1508_v22 = vunpack.c.l.s4 %v4714_v15 }
 0xbe0   :  { %2667 = vbcast.lane.b32.xlu1 %v2665_v57, 256 }
 0xc58   :  { %v2567_v19 = vpop.xlane.xlu1 %2566 }
 0xc59   :  { %v2568_v8 = vsub.f32 %v2267_v34, %v2567_v19 }
 0xc5b   :  { %v2569_v24 = vmul.f32 1.442695, %v2568_v8  ;;  %v1509_v8 = vunpack.c.0.s8 %v1508_v22 }
 0xc5c   :  { %v5350_v40 = vpop.permute.xlu1 %2667 }
 0xc5d   :  { %4610 = vpow2.f32 %v2569_v24  ;;  %6303 = vst [vmem:[#allocation15_spill] sm:$0xff] %v5350_v40  ;;  %vm3031_vm9 = vcmp.gt.f32.partialorder %v5350_v40, 0.0 }
 0xc6a   :  { %v4611_v0 = vpop.eup %4610 }
 0xc6b   :  { %4393 = vmatmul.mubr.msk.f32.vlgmr.msra.gmra.mxu1 %vm1471_vm2, %v4611_v0  ;;  %v6307_v0 = vlaneseq }
 0xc6c   :  { %4396 = vmatpush3.msk.msra.mxu1 %vm1802_vm3, %v5276_v31  ;;  %4397 = vmatprep.mubr.msk.f32.mxu1 %vm4713_vm4, %v6276_v9 }
 0xc6d   :  { %4400 = vmatprep.subr.mxu1 %v6276_v9 }
 0xd2b   :  { %v2640_v21 = vpop.f32.mrf.mxu1 }
 0xd2c   :  { %4612 = vlog2.f32 %v2640_v21  ;;  %v5383_v21 = vand.u32 127, %v6307_v0 }
 0xd2d   :  { %v4394_v28 = vpop.f32.mrf.mxu1 }
 0xd2e   :  { %v5386_v28 = vsub.s32 %v1509_v8, %v6302_v12 }
 0xd39   :  { %v4613_v23 = vpop.eup %4612 }
 0xd3a   :  { %v2645_v25 = vmul.f32 0.6931472, %v4613_v23 }
 0xd3c   :  { %v2646_v55 = vadd.f32 %v2645_v25, %v2567_v19  ;;  %v5391_v25 = vld [vmem:[%s6259_s10] ss:$0 sm:$0xff] }
 0xd3e   :  { %v2648_v63 = vadd.f32 %v2646_v55, %v5261_v47 }
 0xd40   :  { %v2651_v11 = vsel %vm2647_vm7, %v2648_v63, %v2267_v34 }
 0xd41   :  { %v2949_v41 = vsel %vm1471_vm2, %v2651_v11, -inf }
 0xd42   :  { %2950 = vmax.xlane.f32.xlu0 %v2949_v41 }
 0xdcb   :  { %v2951_v3 = vpop.xlane.xlu0 %2950 }
 0xdcc   :  { %v2952_v51 = vsub.f32 %v2651_v11, %v2951_v3 }
 0xdce   :  { %v2953_v6 = vmul.f32 1.442695, %v2952_v51 }
 0xdd0   :  { %4614 = vpow2.f32 %v2953_v6 }
 0xddd   :  { %v4615_v13 = vpop.eup %4614 }
 0xdde   :  { %4398 = vmatmul.mubr.msk.f32.vlgmr.msra.gmra.mxu1 %vm1471_vm2, %v4615_v13  ;;  %v5404_v13 = vld [vmem:[%s6260_s11] sm:$0x3f] }
 0xddf   :  { %4401 = vmatpush3.msk.msra.mxu1 %vm1802_vm3, %v5276_v31  ;;  %4402 = vmatprep.mubr.msk.f32.mxu1 %vm4713_vm4, %v6276_v9 }
 0xde0   :  { %4405 = vmatprep.subr.mxu1 %v6276_v9 }
 0xe9e   :  { %v3024_v45 = vpop.f32.mrf.mxu1 }
 0xe9f   :  { %4616 = vlog2.f32 %v3024_v45 }
 0xea0   :  { %v4399_v43 = vpop.f32.mrf.mxu1 }
 0xeac   :  { %v4617_v49 = vpop.eup %4616 }
 0xead   :  { %v3029_v14 = vmul.f32 0.6931472, %v4617_v49  ;;  %v1491_v49 = vrot.slane %v5370_v33, %v6296_v1 }
 0xeaf   :  { %v3030_v46 = vadd.f32 %v3029_v14, %v2951_v3  ;;  %v3433_v14 = vrot.slane %v5292_v38, %v5417_v10 }
 0xeb1   :  { %v3032_v36 = vadd.f32 %v3030_v46, %v5354_v42 }
 0xeb3   :  { %v5358_v37 = vsel %vm3031_vm9, %v3032_v36, %v2651_v11 }
 0xeb4   :  { %v3333_v35 = vsel %vm1471_vm2, %v5358_v37, -inf }
 0xeb5   :  { %3334 = vmax.xlane.f32.xlu0 %v3333_v35 }
 0xecb   :  { %3051 = vbcast.lane.b32.xlu0 %v3049_v7, 256 }
 0xecf   :  { %1449 = vbcast.lane.b32.xlu0 %v4416_v39, 256 }
 0xed3   :  { %1458 = vbcast.lane.b32.xlu0 %v1456_v16, 256 }
 0xf3e   :  { %v5374_v20 = vpop.xlane.xlu0 %3334 }
 0xf3f   :  { %v3336_v60 = vsub.f32 %v5358_v37, %v5374_v20 }
 0xf41   :  { %v3337_v34 = vmul.f32 1.442695, %v3336_v60 }
 0xf42   :  { %v5378_v19 = vpop.permute.xlu0 %3051 }
 0xf43   :  { %6305 = vst [vmem:[#allocation12_spill] sm:$0xff] %v5378_v19  ;;  %4618 = vpow2.f32 %v3337_v34  ;;  %vm3415_vm5 = vcmp.gt.f32.partialorder %v5378_v19, 0.0 }
 0xf46   :  { %v5380_v24 = vpop.permute.xlu0 %1449 }
 0xf47   :  { %6306 = vst [vmem:[#allocation14_spill] sm:$0xff] %v5380_v24 }
 0xf4a   :  { %v1459_v23 = vpop.permute.xlu0 %1458 }
 0xf4b   :  { %vm1460_vm10 = vcmp.eq.s32.totalorder %v5383_v21, %v1459_v23 }
 0xf4c   :  { %v4318_v55 = vsel %vm1460_vm10, 1.0, %v6276_v9 }
 0xf4d   :  { %v1513_v63 = vrot.slane %v4318_v55, %v5386_v28  ;;  %v1482_v11 = vmul.f32 %v5391_v25, %v4318_v55  ;;  %v1470_v41 = vmul.f32 %v4318_v55, %v5258_v29 }
 0xf4f   :  { %v1483_v57 = vsel %vm1471_vm2, %v1482_v11, 0.0  ;;  %v1472_v3 = vsel %vm1471_vm2, %v1470_v41, 0.0  ;;  %v1529_v51 = vrot.slane %v1513_v63, %v5386_v28  ;;  %v1521_v46 = vcombine.high %v1513_v63, %v1513_v63 }
 0xf50   :  { %v4619_v6 = vpop.eup %4618  ;;  %1484 = vadd.xlane.f32.xlu1 %v1483_v57  ;;  %1473 = vadd.xlane.f32.xlu0 %v1472_v3 }
 0xf51   :  { %4403 = vmatmul.mubr.msk.f32.vlgmr.msra.gmra.mxu1 %vm1471_vm2, %v4619_v6  ;;  %v1558_v45 = vrot.slane %v1529_v51, %v6304_v2  ;;  %v1543_v36 = vrot.slane %v1521_v46, %v5386_v28  ;;  %v1551_v58 = vcombine.high %v1529_v51, %v1529_v51  ;;  %v1653_v46 = vrot.slane %v5306_v50, %v6300_v5 }
 0xf52   :  { %4406 = vmatpush3.msk.msra.mxu1 %vm1802_vm3, %v5276_v31  ;;  %4407 = vmatprep.mubr.msk.f32.mxu1 %vm4713_vm4, %v6276_v9  ;;  %v1506_v31 = vcombine.high %v4318_v55, %v4318_v55  ;;  %vm1775_vm3 = vcmask 1046534   ;;  %vm1777_vm4 = vcmask 1047559  }
 0xf53   :  { %v1595_v29 = vmul.f32 %v1558_v45, %v5404_v13  ;;  %v1562_v35 = vrot.slane %v1543_v36, %v6304_v2  ;;  %v1553_v54 = vcombine.high %v1543_v36, %v1543_v36  ;;  %v1566_v26 = vrot.slane %v1551_v58, %v6304_v2 }
 0xf54   :  { %v1520_v44 = vrot.slane %v1506_v31, %v5386_v28  ;;  %v1646_v31 = vrot.slane %v5306_v50, %v6298_v52  ;;  %v1667_v36 = vrot.slane %v5306_v50, %v5363_v4 }
 0xf55   :  { %v1604_v43 = vsel %vm1603_vm11, %v1595_v29, 0.0  ;;  %v1596_v56 = vmul.f32 %v1562_v35, %v5404_v13  ;;  %v1570_v7 = vrot.slane %v1553_v54, %v6304_v2  ;;  %v1597_v15 = vmul.f32 %v1566_v26, %v5404_v13 }
 0xf56   :  { %1605 = vadd.xlane.f32.xlu0 %v1604_v43  ;;  %v1522_v18 = vcombine.high %v1520_v44, %v1520_v44  ;;  %v1536_v38 = vrot.slane %v1520_v44, %v5386_v28  ;;  %v1639_v43 = vrot.slane %v5306_v50, %v6296_v1  ;;  %v1660_v44 = vrot.slane %v5306_v50, %v5339_v62 }
 0xf57   :  { %v1607_v16 = vsel %vm1603_vm11, %v1596_v56, 0.0  ;;  %v1598_v60 = vmul.f32 %v1570_v7, %v5404_v13  ;;  %v1610_v63 = vsel %vm1603_vm11, %v1597_v15, 0.0 }
 0xf58   :  { %v1550_v48 = vrot.slane %v1522_v18, %v5386_v28  ;;  %v1574_v34 = vrot.slane %v1536_v38, %v6304_v2  ;;  %v1552_v55 = vcombine.high %v1536_v38, %v1536_v38  ;;  %v5461_v18 = vsub.s32 7, %v6302_v12 }
 0xf59   :  { %v1613_v8 = vsel %vm1603_vm11, %v1598_v60, 0.0 }
 0xf5a   :  { %v1554_v39 = vcombine.high %v1550_v48, %v1550_v48  ;;  %v1599_v0 = vmul.f32 %v1574_v34, %v5404_v13  ;;  %v1578_v23 = vrot.slane %v1550_v48, %v6304_v2  ;;  %v1582_v3 = vrot.slane %v1552_v55, %v6304_v2 }
 0xf5b   :  { %v1681_v35 = vrot.slane %v5306_v50, %v5461_v18 }
 0xf5c   :  { %v1586_v22 = vrot.slane %v1554_v39, %v6304_v2  ;;  %v1616_v41 = vsel %vm1603_vm11, %v1599_v0, 0.0  ;;  %v1600_v57 = vmul.f32 %v1578_v23, %v5404_v13  ;;  %v1601_v45 = vmul.f32 %v1582_v3, %v5404_v13 }
 0xf5e   :  { %v1602_v11 = vmul.f32 %v1586_v22, %v5404_v13  ;;  %v1619_v6 = vsel %vm1603_vm11, %v1600_v57, 0.0  ;;  %v1622_v29 = vsel %vm1603_vm11, %v1601_v45, 0.0 }
 0xf60   :  { %v1625_v51 = vsel %vm1603_vm11, %v1602_v11, 0.0 }
 0xf61   :  { %1493 = vbcast.lane.b32.xlu1 %v1491_v49, 256  ;;  %v1632_v49 = vrot.slane %v5306_v50, %v6304_v2 }
 0xf6c   :  { %3435 = vbcast.lane.b32.xlu0 %v3433_v14, 256  ;;  %v1674_v14 = vrot.slane %v5306_v50, %v5417_v10 }
 0xf85   :  { %1608 = vadd.xlane.f32.xlu1 %v1607_v16 }
 0xf89   :  { %1614 = vadd.xlane.f32.xlu1 %v1613_v8 }
 0xf8b   :  { %1611 = vadd.xlane.f32.xlu0 %v1610_v63 }
 0xf8d   :  { %1617 = vadd.xlane.f32.xlu1 %v1616_v41 }
 0xf8f   :  { %1626 = vadd.xlane.f32.xlu0 %v1625_v51 }
 0xf91   :  { %1620 = vadd.xlane.f32.xlu1 %v1619_v6 }
 0xf95   :  { %1623 = vadd.xlane.f32.xlu1 %v1622_v29 }
 0xfa5   :  { %1641 = vbcast.lane.b32.xlu0 %v1639_v43, 256 }
 0xfa6   :  { %1634 = vbcast.lane.b32.xlu1 %v1632_v49, 256 }
 0xfa9   :  { %1676 = vbcast.lane.b32.xlu0 %v1674_v14, 256 }
 0xfaa   :  { %1648 = vbcast.lane.b32.xlu1 %v1646_v31, 256 }
 0xfae   :  { %1655 = vbcast.lane.b32.xlu1 %v1653_v46, 256 }
 0xfb2   :  { %1662 = vbcast.lane.b32.xlu1 %v1660_v44, 256 }
 0xfb6   :  { %1669 = vbcast.lane.b32.xlu1 %v1667_v36, 256  ;;  %v1887_v36 = vrot.slane %v5370_v33, %v6298_v52 }
 0xfba   :  { %1683 = vbcast.lane.b32.xlu1 %v1681_v35, 256 }
 0xfd9   :  { %v5465_v54 = vpop.xlane.xlu1 %1484  ;;  %v5467_v58 = vpop.xlane.xlu0 %1473 }
 0xfda   :  { %6308 = vst [vmem:[#allocation11_spill] sm:$0xff] %v5465_v54  ;;  %6309 = vst [vmem:[#allocation13_spill] sm:$0xff] %v5467_v58 }
 0xfdd   :  { %v1494_v48 = vpop.permute.xlu1 %1493 }
 0xfde   :  { %vm1495_vm12 = vcmp.eq.s32.totalorder %v5383_v21, %v1494_v48 }
 0xfdf   :  { %v1606_v56 = vpop.xlane.xlu0 %1605  ;;  %v4321_v31 = vsel %vm1495_vm12, 1.0, %v6276_v9 }
 0xfe0   :  { %v1787_v46 = vmul.f32 %v4321_v31, %v5391_v25  ;;  %v1902_v35 = vcombine.high %v4321_v31, %v4321_v31 }
 0xfe2   :  { %v1788_v44 = vsel %vm1471_vm2, %v1787_v46, 0.0 }
 0xfe3   :  { %v5469_v38 = vpop.permute.xlu0 %3435 }
 0xfe4   :  { %6310 = vst [vmem:[#allocation19_spill] sm:$0xff] %v5469_v38  ;;  %vm3799_vm12 = vcmp.gt.f32.partialorder %v5469_v38, 0.0  ;;  %v2460_v38 = vrot.slane %v5261_v47, %v5461_v18 }
0x100e   :  { %v1609_v7 = vpop.xlane.xlu1 %1608 }
0x1011   :  { %v5471_v26 = vpop.f32.mrf.mxu1 }
0x1012   :  { %v1615_v39 = vpop.xlane.xlu1 %1614  ;;  %4620 = vlog2.f32 %v5471_v26  ;;  %v2048_v26 = vrot.slane %v5252_v61, %v6300_v5 }
0x1013   :  { %v4404_v16 = vpop.f32.mrf.mxu1 }
0x1014   :  { %v1612_v60 = vpop.xlane.xlu0 %1611 }
0x1016   :  { %v1618_v34 = vpop.xlane.xlu1 %1617 }
0x1018   :  { %v1627_v15 = vpop.xlane.xlu0 %1626 }
0x101a   :  { %v1621_v22 = vpop.xlane.xlu1 %1620 }
0x101c   :  { %v1642_v8 = vpop.permute.xlu0 %1641 }
0x101d   :  { %v1694_v50 = vadd.f32 %v1642_v8, %v1609_v7 }
0x101e   :  { %v1624_v0 = vpop.xlane.xlu1 %1623 }
0x101f   :  { %1713 = vperm.xlu1 %4429, %v1694_v50   ;;  %v5491_v50 = vsub.s32 %v5383_v21, %v6302_v12 }
0x1020   :  { %v1677_v6 = vpop.permute.xlu0 %1676 }
0x1021   :  { %v1699_v29 = vadd.f32 %v1677_v6, %v1624_v0 }
0x1022   :  { %v1635_v23 = vpop.permute.xlu1 %1634 }
0x1023   :  { %v1693_v55 = vadd.f32 %v1635_v23, %v1606_v56  ;;  %v1916_v56 = vrot.slane %v1902_v35, %v5386_v28 }
0x1025   :  { %1710 = vperm.xlu0 %4428, %v1693_v55   ;;  %v1918_v7 = vcombine.high %v1916_v56, %v1916_v56 }
0x1026   :  { %v1649_v63 = vpop.permute.xlu1 %1648 }
0x1027   :  { %v1695_v11 = vadd.f32 %v1649_v63, %v1612_v60 }
0x1029   :  { %1716 = vperm.xlu1 %4429, %v1695_v11  }
0x102a   :  { %v1656_v41 = vpop.permute.xlu1 %1655 }
0x102b   :  { %v1696_v57 = vadd.f32 %v1656_v41, %v1615_v39  ;;  %v5481_v39 = vrot.slane %v1918_v7, %v5386_v28 }
0x102d   :  { %1719 = vperm.xlu0 %4428, %v1696_v57   ;;  %v1974_v48 = vrot.slane %v5481_v39, %v6304_v2  ;;  %v1909_v57 = vrot.slane %v4321_v31, %v5386_v28 }
0x102e   :  { %v1663_v3 = vpop.permute.xlu1 %1662 }
0x102f   :  { %v1697_v51 = vadd.f32 %v1663_v3, %v1618_v34  ;;  %v1996_v16 = vmul.f32 %v1974_v48, %v5404_v13  ;;  %v2041_v34 = vrot.slane %v5252_v61, %v6298_v52  ;;  %v1925_v46 = vrot.slane %v1909_v57, %v5386_v28 }
0x1031   :  { %1722 = vperm.xlu1 %4429, %v1697_v51   ;;  %v2014_v60 = vsel %vm1603_vm11, %v1996_v16, 0.0  ;;  %v1954_v16 = vrot.slane %v1925_v46, %v6304_v2 }
0x1032   :  { %v1670_v45 = vpop.permute.xlu1 %1669 }
0x1033   :  { %v1698_v43 = vadd.f32 %v1670_v45, %v1621_v22 }
0x1035   :  { %1725 = vperm.xlu0 %4428, %v1698_v43   ;;  %1728 = vperm.xlu1 %4429, %v1699_v29  }
0x1036   :  { %v1684_v49 = vpop.permute.xlu1 %1683 }
0x1037   :  { %v1700_v14 = vadd.f32 %v1684_v49, %v1627_v15 }
0x1039   :  { %1731 = vperm.xlu0 %4428, %v1700_v14  }
0x1058   :  { %1789 = vadd.xlane.f32.xlu0 %v1788_v44  ;;  %v1917_v44 = vcombine.high %v1909_v57, %v1909_v57 }
0x106e   :  { %1889 = vbcast.lane.b32.xlu0 %v1887_v36, 256 }
0x108d   :  { %2015 = vadd.xlane.f32.xlu0 %v2014_v60  ;;  %v1939_v60 = vrot.slane %v1917_v44, %v5386_v28 }
0x109a   :  { %v1714_v15 = vpop.permute.xlu1 %1713 }
0x109b   :  { %v1740_v11 = vrot.slane %v1714_v15, %v5491_v50 }
0x10a0   :  { %v1711_v22 = vpop.permute.xlu0 %1710 }
0x10a1   :  { %v1736_v23 = vrot.slane %v1711_v22, %v5491_v50 }
0x10a3   :  { %2043 = vbcast.lane.b32.xlu0 %v2041_v34, 256  ;;  %v1766_v12 = vsel %vm1765_vm13, %v1740_v11, %v1736_v23  ;;  %v1947_v23 = vcombine.high %v1925_v46, %v1925_v46  ;;  %v1950_v46 = vcombine.high %v5481_v39, %v5481_v39  ;;  %v2034_v39 = vrot.slane %v5252_v61, %v6296_v1 }
0x10a4   :  { %v1717_v8 = vpop.permute.xlu1 %1716 }
0x10a5   :  { %v1744_v55 = vrot.slane %v1717_v8, %v5491_v50  ;;  %v1991_v8 = vmul.f32 %v1954_v16, %v5404_v13  ;;  %v1962_v11 = vrot.slane %v1947_v23, %v6304_v2  ;;  %v2027_v16 = vrot.slane %v5252_v61, %v6304_v2 }
0x10a7   :  { %v1768_v51 = vsel %vm1767_vm14, %v1744_v55, %v1766_v12  ;;  %v1999_v55 = vsel %vm1603_vm11, %v1991_v8, 0.0  ;;  %v1932_v12 = vrot.slane %v1916_v56, %v5386_v28 }
0x10a8   :  { %v1720_v0 = vpop.permute.xlu0 %1719 }
0x10a9   :  { %v1748_v41 = vrot.slane %v1720_v0, %v5491_v50  ;;  %v1958_v0 = vrot.slane %v1939_v60, %v6304_v2 }
0x10ab   :  { %v1770_v29 = vsel %vm1769_vm15, %v1748_v41, %v1768_v51  ;;  %v1949_v41 = vcombine.high %v1939_v60, %v1939_v60  ;;  %v4621_v60 = vpop.eup %4620 }
0x10ac   :  { %v1723_v63 = vpop.permute.xlu1 %1722 }
0x10ad   :  { %v1752_v3 = vrot.slane %v1723_v63, %v5491_v50  ;;  %v1992_v63 = vmul.f32 %v1958_v0, %v5404_v13 }
0x10af   :  { %v1772_v49 = vsel %vm1771_vm0, %v1752_v3, %v1770_v29  ;;  %v2002_v57 = vsel %vm1603_vm11, %v1992_v63, 0.0  ;;  %v1966_v3 = vrot.slane %v1949_v41, %v6304_v2  ;;  %v1948_v29 = vcombine.high %v1932_v12, %v1932_v12 }
0x10b0   :  { %v1729_v6 = vpop.permute.xlu1 %1728  ;;  %v1726_v45 = vpop.permute.xlu0 %1725  ;;  %v2076_v63 = vrot.slane %v5252_v61, %v5461_v18 }
0x10b1   :  { %v1756_v43 = vrot.slane %v1726_v45, %v5491_v50  ;;  %v1760_v14 = vrot.slane %v1729_v6, %v5491_v50  ;;  %v1994_v6 = vmul.f32 %v1966_v3, %v5404_v13  ;;  %v1970_v45 = vrot.slane %v1932_v12, %v6304_v2 }
0x10b3   :  { %v1774_v36 = vsel %vm1773_vm1, %v1756_v43, %v1772_v49  ;;  %v2008_v43 = vsel %vm1603_vm11, %v1994_v6, 0.0  ;;  %v1995_v49 = vmul.f32 %v1970_v45, %v5404_v13 }
0x10b4   :  { %v1732_v35 = vpop.permute.xlu0 %1731  ;;  %v1776_v48 = vsel %vm1775_vm3, %v1760_v14, %v1774_v36  ;;  %v1978_v14 = vrot.slane %v1948_v29, %v6304_v2  ;;  %v1982_v36 = vrot.slane %v1950_v46, %v6304_v2 }
0x10b5   :  { %v1764_v7 = vrot.slane %v1732_v35, %v5491_v50  ;;  %v2011_v56 = vsel %vm1603_vm11, %v1995_v49, 0.0 }
0x10b6   :  { %v1997_v44 = vmul.f32 %v1978_v14, %v5404_v13 }
0x10b7   :  { %v1778_v34 = vsel %vm1777_vm4, %v1764_v7, %v1776_v48  ;;  %v1998_v7 = vmul.f32 %v1982_v36, %v5404_v13 }
0x10b8   :  { %v1780_v15 = vmul.f32 %v4321_v31, %v1778_v34  ;;  %v1993_v31 = vmul.f32 %v1962_v11, %v5404_v13  ;;  %v2017_v35 = vsel %vm1603_vm11, %v1997_v44, 0.0  ;;  %v3413_v34 = vmul.f32 0.6931472, %v4621_v60 }
0x10b9   :  { %v2020_v48 = vsel %vm1603_vm11, %v1998_v7, 0.0 }
0x10ba   :  { %v1781_v22 = vsel %vm1471_vm2, %v1780_v15, 0.0  ;;  %v2005_v51 = vsel %vm1603_vm11, %v1993_v31, 0.0  ;;  %v1421_v15 = vpop.f32.mrf.mxu0 }
0x10bb   :  { %1782 = vadd.xlane.f32.xlu1 %v1781_v22  ;;  %v3414_v22 = vadd.f32 %v3413_v34, %v5374_v20  ;;  %v5543_v8 = vadd.f32 %v5249_v32, %v1421_v15  ;;  %v2055_v20 = vrot.slane %v5252_v61, %v5339_v62  ;;  %v2062_v32 = vrot.slane %v5252_v61, %v5363_v4 }
0x10bc   :  { %v2271_v34 = vrot.slane %v5370_v33, %v6300_v5 }
0x10bd   :  { %v3416_v0 = vadd.f32 %v3414_v22, %v5543_v8 }
0x10bf   :  { %2000 = vadd.xlane.f32.xlu1 %v1999_v55  ;;  %v5548_v23 = vsel %vm3415_vm5, %v3416_v0, %v5358_v37  ;;  %v2069_v37 = vrot.slane %v5252_v61, %v5417_v10  ;;  %v2655_v0 = vrot.slane %v5370_v33, %v5339_v62 }
0x10c0   :  { %v3717_v55 = vsel %vm1471_vm2, %v5548_v23, -inf }
0x10c3   :  { %2003 = vadd.xlane.f32.xlu1 %v2002_v57 }
0x10c7   :  { %2006 = vadd.xlane.f32.xlu1 %v2005_v51 }
0x10cb   :  { %2009 = vadd.xlane.f32.xlu1 %v2008_v43 }
0x10cf   :  { %2012 = vadd.xlane.f32.xlu1 %v2011_v56 }
0x10d3   :  { %2018 = vadd.xlane.f32.xlu1 %v2017_v35 }
0x10d7   :  { %2021 = vadd.xlane.f32.xlu1 %v2020_v48 }
0x10e1   :  { %v5564_v12 = vpop.xlane.xlu0 %1789 }
0x10e2   :  { %6312 = vst [vmem:[#allocation21_spill] sm:$0xff] %v5564_v12 }
0x10e5   :  { %v1890_v6 = vpop.permute.xlu0 %1889 }
0x10e6   :  { %vm1891_vm6 = vcmp.eq.s32.totalorder %v5383_v21, %v1890_v6 }
0x10e8   :  { %2029 = vbcast.lane.b32.xlu1 %v2027_v16, 256 }
0x10ec   :  { %2036 = vbcast.lane.b32.xlu1 %v2034_v39, 256 }
0x1110   :  { %3718 = vmax.xlane.f32.xlu1 %v3717_v55 }
0x1116   :  { %v2016_v43 = vpop.xlane.xlu0 %2015 }
0x111a   :  { %v2044_v46 = vpop.permute.xlu0 %2043 }
0x1121   :  { %2050 = vbcast.lane.b32.xlu1 %v2048_v26, 256 }
0x1125   :  { %2057 = vbcast.lane.b32.xlu1 %v2055_v20, 256 }
0x1129   :  { %2064 = vbcast.lane.b32.xlu1 %v2062_v32, 256  ;;  %v3039_v32 = vrot.slane %v5370_v33, %v5363_v4 }
0x112d   :  { %2071 = vbcast.lane.b32.xlu1 %v2069_v37, 256  ;;  %v3423_v37 = vrot.slane %v5370_v33, %v5417_v10 }
0x1131   :  { %2078 = vbcast.lane.b32.xlu1 %v2076_v63, 256 }
0x1144   :  { %v5562_v11 = vpop.xlane.xlu1 %1782 }
0x1145   :  { %6311 = vst [vmem:[#allocation20_spill] sm:$0xff] %v5562_v11 }
0x1148   :  { %v2001_v41 = vpop.xlane.xlu1 %2000 }
0x114c   :  { %v2004_v57 = vpop.xlane.xlu1 %2003 }
0x1150   :  { %v2007_v31 = vpop.xlane.xlu1 %2006 }
0x1151   :  { %v2090_v61 = vadd.f32 %v2044_v46, %v2007_v31 }
0x1154   :  { %v2010_v3 = vpop.xlane.xlu1 %2009 }
0x1158   :  { %v2013_v51 = vpop.xlane.xlu1 %2012 }
0x115c   :  { %v2019_v45 = vpop.xlane.xlu1 %2018 }
0x1160   :  { %v2022_v29 = vpop.xlane.xlu1 %2021 }
0x1164   :  { %v2030_v49 = vpop.permute.xlu1 %2029 }
0x1165   :  { %v2088_v14 = vadd.f32 %v2030_v49, %v2001_v41 }
0x1167   :  { %2105 = vperm.xlu1 %4429, %v2088_v14  }
0x1168   :  { %v2037_v56 = vpop.permute.xlu1 %2036 }
0x1169   :  { %v2089_v44 = vadd.f32 %v2037_v56, %v2004_v57  ;;  %v5581_v57 = vsel %vm1891_vm6, 1.0, %v6276_v9  ;;  %vm4204_vm6 = vcmask 7168  }
0x116a   :  { %v2293_v31 = vrot.slane %v5581_v57, %v5386_v28  ;;  %v2175_v33 = vmul.f32 %v5581_v57, %v5391_v25 }
0x116b   :  { %2108 = vperm.xlu0 %4428, %v2089_v44   ;;  %2111 = vperm.xlu1 %4429, %v2090_v61  }
0x116c   :  { %v2176_v6 = vsel %vm1471_vm2, %v2175_v33, 0.0 }
0x1199   :  { %v5566_v36 = vpop.xlane.xlu1 %3718 }
0x119a   :  { %v3720_v35 = vsub.f32 %v5548_v23, %v5566_v36 }
0x119c   :  { %v3721_v7 = vmul.f32 1.442695, %v3720_v35 }
0x119d   :  { %v2051_v48 = vpop.permute.xlu1 %2050 }
0x119e   :  { %4622 = vpow2.f32 %v3721_v7  ;;  %v2091_v16 = vadd.f32 %v2051_v48, %v2010_v3  ;;  %v2286_v3 = vcombine.high %v5581_v57, %v5581_v57 }
0x11a0   :  { %2114 = vperm.xlu0 %4428, %v2091_v16  }
0x11a1   :  { %v2058_v39 = vpop.permute.xlu1 %2057 }
0x11a2   :  { %v2092_v60 = vadd.f32 %v2058_v39, %v2013_v51  ;;  %v2309_v51 = vrot.slane %v2293_v31, %v5386_v28 }
0x11a4   :  { %2117 = vperm.xlu1 %4429, %v2092_v60  }
0x11a5   :  { %v2065_v15 = vpop.permute.xlu1 %2064 }
0x11a6   :  { %v2093_v22 = vadd.f32 %v2065_v15, %v2016_v43  ;;  %v5592_v43 = vrot.slane %v2286_v3, %v5386_v28  ;;  %v2425_v15 = vrot.slane %v5261_v47, %v6298_v52 }
0x11a8   :  { %2273 = vbcast.lane.b32.xlu1 %v2271_v34, 256  ;;  %2120 = vperm.xlu0 %4428, %v2093_v22   ;;  %v2316_v46 = vrot.slane %v5592_v43, %v5386_v28  ;;  %v2411_v34 = vrot.slane %v5261_v47, %v6304_v2 }
0x11a9   :  { %v2072_v55 = vpop.permute.xlu1 %2071 }
0x11aa   :  { %v2094_v26 = vadd.f32 %v2072_v55, %v2019_v45  ;;  %v2338_v45 = vrot.slane %v2309_v51, %v6304_v2  ;;  %v2354_v61 = vrot.slane %v2316_v46, %v6304_v2  ;;  %v2332_v44 = vcombine.high %v2316_v46, %v2316_v46 }
0x11ab   :  { %v4623_v20 = vpop.eup %4622 }
0x11ac   :  { %4408 = vmatmul.mubr.msk.f32.vlgmr.msra.gmra.mxu1 %vm1471_vm2, %v4623_v20  ;;  %2657 = vbcast.lane.b32.xlu0 %v2655_v0, 256  ;;  %v2375_v49 = vmul.f32 %v2338_v45, %v5404_v13  ;;  %v2379_v7 = vmul.f32 %v2354_v61, %v5404_v13  ;;  %v2362_v48 = vrot.slane %v2332_v44, %v6304_v2 }
0x11ad   :  { %2123 = vperm.xlu1 %4429, %v2094_v26   ;;  %v2079_v63 = vpop.permute.xlu1 %2078 }
0x11ae   :  { %v2095_v41 = vadd.f32 %v2079_v63, %v2022_v29  ;;  %v2331_v29 = vcombine.high %v2309_v51, %v2309_v51  ;;  %v2383_v56 = vsel %vm1603_vm11, %v2375_v49, 0.0  ;;  %v2395_v16 = vsel %vm1603_vm11, %v2379_v7, 0.0 }
0x11af   :  { %v2381_v39 = vmul.f32 %v2362_v48, %v5404_v13 }
0x11b0   :  { %3041 = vbcast.lane.b32.xlu0 %v3039_v32, 256  ;;  %v2346_v14 = vrot.slane %v2331_v29, %v6304_v2 }
0x11b1   :  { %3425 = vbcast.lane.b32.xlu1 %v3423_v37, 256  ;;  %v2401_v60 = vsel %vm1603_vm11, %v2381_v39, 0.0 }
0x11b2   :  { %v2377_v25 = vmul.f32 %v2346_v14, %v5404_v13 }
0x11b4   :  { %2126 = vperm.xlu0 %4428, %v2095_v41   ;;  %v2389_v35 = vsel %vm1603_vm11, %v2377_v25, 0.0 }
0x11d3   :  { %2177 = vadd.xlane.f32.xlu0 %v2176_v6  ;;  %v2301_v6 = vcombine.high %v2293_v31, %v2293_v31 }
0x11d7   :  { %2384 = vadd.xlane.f32.xlu0 %v2383_v56 }
0x11db   :  { %2390 = vadd.xlane.f32.xlu0 %v2389_v35 }
0x11df   :  { %2396 = vadd.xlane.f32.xlu0 %v2395_v16 }
0x11e2   :  { %v2106_v22 = vpop.permute.xlu1 %2105 }
0x11e3   :  { %2402 = vadd.xlane.f32.xlu0 %v2401_v60  ;;  %v2131_v33 = vrot.slane %v2106_v22, %v5491_v50  ;;  %v2323_v60 = vrot.slane %v2301_v6, %v5386_v28 }
0x11e5   :  { %v2342_v6 = vrot.slane %v2323_v60, %v6304_v2 }
0x11e6   :  { %v2109_v0 = vpop.permute.xlu0 %2108  ;;  %v2112_v55 = vpop.permute.xlu1 %2111 }
0x11e7   :  { %v2135_v63 = vrot.slane %v2109_v0, %v5491_v50  ;;  %v2139_v45 = vrot.slane %v2112_v55, %v5491_v50 }
0x11e9   :  { %v2160_v56 = vsel %vm1765_vm13, %v2135_v63, %v2131_v33 }
0x11f9   :  { %2413 = vbcast.lane.b32.xlu0 %v2411_v34, 256 }
0x11fd   :  { %2427 = vbcast.lane.b32.xlu0 %v2425_v15, 256  ;;  %v2161_v15 = vsel %vm1767_vm14, %v2139_v45, %v2160_v56 }
0x121b   :  { %v2115_v26 = vpop.permute.xlu0 %2114 }
0x121c   :  { %v2143_v61 = vrot.slane %v2115_v26, %v5491_v50 }
0x121f   :  { %v2118_v20 = vpop.permute.xlu1 %2117 }
0x1220   :  { %v2147_v48 = vrot.slane %v2118_v20, %v5491_v50 }
0x1223   :  { %v2121_v32 = vpop.permute.xlu0 %2120  ;;  %v2274_v37 = vpop.permute.xlu1 %2273 }
0x1224   :  { %vm2275_vm7 = vcmp.eq.s32.totalorder %v5383_v21, %v2274_v37  ;;  %v2151_v22 = vrot.slane %v2121_v32, %v5491_v50 }
0x1225   :  { %v5615_v41 = vsel %vm2275_vm7, 1.0, %v6276_v9  ;;  %vm4217_vm7 = vcmask 0  }
0x1226   :  { %v2670_v3 = vcombine.high %v5615_v41, %v5615_v41  ;;  %v2677_v51 = vrot.slane %v5615_v41, %v5386_v28 }
0x1227   :  { %v2658_v29 = vpop.permute.xlu0 %2657 }
0x1228   :  { %v5624_v49 = vrot.slane %v2670_v3, %v5386_v28  ;;  %v2685_v14 = vcombine.high %v2677_v51, %v2677_v51  ;;  %vm2659_vm8 = vcmp.eq.s32.totalorder %v5383_v21, %v2658_v29  ;;  %v2693_v46 = vrot.slane %v2677_v51, %v5386_v28  ;;  %v2124_v35 = vpop.permute.xlu1 %2123 }
0x1229   :  { %v5630_v25 = vsel %vm2659_vm8, 1.0, %v6276_v9  ;;  %v2155_v26 = vrot.slane %v2124_v35, %v5491_v50  ;;  %v2162_v3 = vsel %vm1769_vm15, %v2143_v61, %v2161_v15  ;;  %v2333_v35 = vcombine.high %v2323_v60, %v2323_v60 }
0x122a   :  { %v3061_v44 = vrot.slane %v5630_v25, %v5386_v28  ;;  %v2722_v31 = vrot.slane %v2693_v46, %v6304_v2  ;;  %v2715_v7 = vcombine.high %v2693_v46, %v2693_v46  ;;  %v5638_v39 = vrot.slane %v2685_v14, %v5386_v28 }
0x122b   :  { %v3042_v16 = vpop.permute.xlu0 %3041  ;;  %v2686_v34 = vcombine.high %v5624_v49, %v5624_v49  ;;  %v2163_v32 = vsel %vm1771_vm0, %v2147_v48, %v2162_v3  ;;  %v2302_v14 = vcombine.high %v5592_v43, %v5592_v43  ;;  %v3054_v56 = vcombine.high %v5630_v25, %v5630_v25 }
0x122c   :  { %v2759_v0 = vmul.f32 %v2722_v31, %v5404_v13  ;;  %v2730_v55 = vrot.slane %v2715_v7, %v6304_v2  ;;  %v2717_v20 = vcombine.high %v5638_v39, %v5638_v39  ;;  %v3069_v63 = vcombine.high %v3061_v44, %v3061_v44 }
0x122d   :  { %v5651_v37 = vrot.slane %v2686_v34, %v5386_v28  ;;  %v2164_v46 = vsel %vm1773_vm1, %v2151_v22, %v2163_v32  ;;  %vm3043_vm9 = vcmp.eq.s32.totalorder %v5383_v21, %v3042_v16  ;;  %v5674_v22 = vrot.slane %v3061_v44, %v5386_v28 }
0x122e   :  { %v2767_v51 = vsel %vm1603_vm11, %v2759_v0, 0.0  ;;  %v2761_v33 = vmul.f32 %v2730_v55, %v5404_v13  ;;  %v2734_v29 = vrot.slane %v2717_v20, %v6304_v2  ;;  %v2165_v31 = vsel %vm1775_vm3, %v2155_v26, %v2164_v46 }
0x122f   :  { %v2127_v45 = vpop.permute.xlu0 %2126  ;;  %2768 = vadd.xlane.f32.xlu0 %v2767_v51  ;;  %v2742_v7 = vrot.slane %v5651_v37, %v6304_v2  ;;  %v3091_v48 = vrot.slane %v3069_v63, %v5386_v28  ;;  %v2376_v16 = vmul.f32 %v2342_v6, %v5404_v13  ;;  %v2330_v0 = vrot.slane %v2302_v14, %v5386_v28 }
0x1230   :  { %v2159_v61 = vrot.slane %v2127_v45, %v5491_v50  ;;  %v2773_v34 = vsel %vm1603_vm11, %v2761_v33, 0.0  ;;  %v2762_v15 = vmul.f32 %v2734_v29, %v5404_v13  ;;  %v5680_v55 = vrot.slane %v3054_v56, %v5386_v28 }
0x1231   :  { %v5683_v26 = vsel %vm3043_vm9, 1.0, %v6276_v9  ;;  %v2350_v63 = vrot.slane %v2333_v35, %v6304_v2  ;;  %v2764_v3 = vmul.f32 %v2742_v7, %v5404_v13  ;;  %v3099_v51 = vcombine.high %v5674_v22, %v5674_v22 }
0x1232   :  { %v2166_v43 = vsel %vm1777_vm4, %v2159_v61, %v2165_v31  ;;  %v2776_v44 = vsel %vm1603_vm11, %v2762_v15, 0.0  ;;  %v2358_v33 = vrot.slane %v2330_v0, %v6304_v2  ;;  %v2334_v32 = vcombine.high %v2330_v0, %v2330_v0 }
0x1233   :  { %2774 = vadd.xlane.f32.xlu0 %v2773_v34  ;;  %v2168_v60 = vmul.f32 %v5581_v57, %v2166_v43  ;;  %v3110_v57 = vrot.slane %v3091_v48, %v6304_v2  ;;  %v3445_v45 = vrot.slane %v5683_v26, %v5386_v28  ;;  %v2386_v29 = vsel %vm1603_vm11, %v2376_v16, 0.0 }
0x1234   :  { %v2378_v6 = vmul.f32 %v2350_v63, %v5404_v13  ;;  %v3070_v14 = vcombine.high %v5680_v55, %v5680_v55  ;;  %v2782_v46 = vsel %vm1603_vm11, %v2764_v3, 0.0  ;;  %v3114_v61 = vrot.slane %v3099_v51, %v6304_v2 }
0x1235   :  { %v2169_v20 = vsel %vm1471_vm2, %v2168_v60, 0.0  ;;  %v3144_v56 = vmul.f32 %v3110_v57, %v5404_v13  ;;  %v3101_v35 = vcombine.high %v3091_v48, %v3091_v48  ;;  %v2380_v7 = vmul.f32 %v2358_v33, %v5404_v13 }
0x1236   :  { %2170 = vadd.xlane.f32.xlu1 %v2169_v20  ;;  %v2392_v31 = vsel %vm1603_vm11, %v2378_v6, 0.0  ;;  %v2366_v34 = vrot.slane %v2334_v32, %v6304_v2  ;;  %v3453_v43 = vcombine.high %v3445_v45, %v3445_v45  ;;  %v3145_v60 = vmul.f32 %v3114_v61, %v5404_v13 }
0x1237   :  { %2777 = vadd.xlane.f32.xlu0 %v2776_v44  ;;  %v3154_v15 = vsel %vm1603_vm11, %v3144_v56, 0.0  ;;  %v3118_v16 = vrot.slane %v3101_v35, %v6304_v2  ;;  %v5709_v0 = vrot.slane %v3070_v14, %v5386_v28  ;;  %v2398_v48 = vsel %vm1603_vm11, %v2380_v7, 0.0 }
0x1238   :  { %v2382_v20 = vmul.f32 %v2366_v34, %v5404_v13  ;;  %v3475_v63 = vrot.slane %v3453_v43, %v5386_v28  ;;  %v3157_v44 = vsel %vm1603_vm11, %v3145_v60, 0.0  ;;  %v5719_v51 = vrot.slane %v3445_v45, %v5386_v28 }
0x1239   :  { %v3146_v3 = vmul.f32 %v3118_v16, %v5404_v13  ;;  %v3126_v57 = vrot.slane %v5709_v0, %v6304_v2  ;;  %v3438_v33 = vcombine.high %v5683_v26, %v5683_v26 }
0x123a   :  { %2387 = vadd.xlane.f32.xlu1 %v2386_v29  ;;  %v2404_v32 = vsel %vm1603_vm11, %v2382_v20, 0.0  ;;  %v3494_v14 = vrot.slane %v3475_v63, %v6304_v2  ;;  %v3485_v56 = vcombine.high %v3475_v63, %v3475_v63  ;;  %v2418_v20 = vrot.slane %v5261_v47, %v6296_v1 }
0x123b   :  { %2783 = vadd.xlane.f32.xlu0 %v2782_v46  ;;  %v3160_v29 = vsel %vm1603_vm11, %v3146_v3, 0.0  ;;  %v3148_v6 = vmul.f32 %v3126_v57, %v5404_v13  ;;  %v3483_v46 = vcombine.high %v5719_v51, %v5719_v51  ;;  %v4637_v3 = vld [vmem:[%s6251_s2] sm:$0xff] }
0x123c   :  { %v3528_v61 = vmul.f32 %v3494_v14, %v5404_v13  ;;  %v3502_v43 = vrot.slane %v3485_v56, %v6304_v2  ;;  %v3817_v57 = vrot.slane %v4637_v3, %v5461_v18  ;;  %v2446_v14 = vrot.slane %v5261_v47, %v5363_v4 }
0x123d   :  { %v3166_v45 = vsel %vm1603_vm11, %v3148_v6, 0.0  ;;  %v3498_v35 = vrot.slane %v3483_v46, %v6304_v2  ;;  %v3426_v46 = vpop.permute.xlu1 %3425  ;;  %v2726_v56 = vrot.slane %v5638_v39, %v6304_v2 }
0x123e   :  { %2393 = vadd.xlane.f32.xlu1 %v2392_v31  ;;  %v5733_v31 = vrot.slane %v3438_v33, %v5386_v28  ;;  %v3538_v7 = vsel %vm1603_vm11, %v3528_v61, 0.0  ;;  %v3530_v16 = vmul.f32 %v3502_v43, %v5404_v13  ;;  %vm3427_vm10 = vcmp.eq.s32.totalorder %v5383_v21, %v3426_v46 }
0x123f   :  { %3155 = vadd.xlane.f32.xlu0 %v3154_v15  ;;  %v3529_v34 = vmul.f32 %v3498_v35, %v5404_v13  ;;  %v2700_v61 = vrot.slane %v5624_v49, %v5386_v28 }
0x1240   :  { %v5740_v15 = vrot.slane %v5733_v31, %v5386_v28  ;;  %v3544_v63 = vsel %vm1603_vm11, %v3530_v16, 0.0  ;;  %v3106_v16 = vrot.slane %v5674_v22, %v6304_v2 }
0x1241   :  { %v3541_v60 = vsel %vm1603_vm11, %v3529_v34, 0.0  ;;  %v2738_v34 = vrot.slane %v2700_v61, %v6304_v2 }
0x1242   :  { %2399 = vadd.xlane.f32.xlu1 %v2398_v48  ;;  %v3506_v48 = vrot.slane %v5740_v15, %v6304_v2  ;;  %v3143_v3 = vmul.f32 %v3106_v16, %v5404_v13 }
0x1243   :  { %3158 = vadd.xlane.f32.xlu0 %v3157_v44  ;;  %v2763_v39 = vmul.f32 %v2738_v34, %v5404_v13 }
0x1244   :  { %v3531_v44 = vmul.f32 %v3506_v48, %v5404_v13  ;;  %v2716_v48 = vcombine.high %v2700_v61, %v2700_v61 }
0x1246   :  { %2405 = vadd.xlane.f32.xlu1 %v2404_v32  ;;  %v3547_v33 = vsel %vm1603_vm11, %v3531_v44, 0.0  ;;  %v2432_v32 = vrot.slane %v5261_v47, %v6300_v5  ;;  %v2779_v44 = vsel %vm1603_vm11, %v2763_v39, 0.0 }
0x1247   :  { %3161 = vadd.xlane.f32.xlu0 %v3160_v29 }
0x124b   :  { %3167 = vadd.xlane.f32.xlu0 %v3166_v45  ;;  %v5763_v45 = vsel %vm3427_vm10, 1.0, %v6276_v9 }
0x124c   :  { %v3829_v35 = vrot.slane %v5763_v45, %v5386_v28 }
0x124e   :  { %v5772_v43 = vrot.slane %v3829_v35, %v5386_v28  ;;  %v3837_v49 = vcombine.high %v3829_v35, %v3829_v35 }
0x124f   :  { %3539 = vadd.xlane.f32.xlu0 %v3538_v7  ;;  %v2760_v7 = vmul.f32 %v2726_v56, %v5404_v13  ;;  %v3084_v56 = vrot.slane %v5680_v55, %v5386_v28 }
0x1253   :  { %3542 = vadd.xlane.f32.xlu0 %v3541_v60  ;;  %v2770_v60 = vsel %vm1603_vm11, %v2760_v7, 0.0 }
0x1257   :  { %3545 = vadd.xlane.f32.xlu0 %v3544_v63  ;;  %2420 = vbcast.lane.b32.xlu1 %v2418_v20, 256  ;;  %v3874_v63 = vrot.slane %v5772_v43, %v6304_v2 }
0x125b   :  { %3548 = vadd.xlane.f32.xlu0 %v3547_v33  ;;  %3819 = vbcast.lane.b32.xlu1 %v3817_v57, 256  ;;  %v2746_v57 = vrot.slane %v2716_v48, %v6304_v2  ;;  %v2718_v33 = vcombine.high %v5651_v37, %v5651_v37 }
0x125d   :  { %v2750_v46 = vrot.slane %v2718_v33, %v6304_v2  ;;  %v3102_v33 = vcombine.high %v5709_v0, %v5709_v0  ;;  %v5825_v0 = vpop.xlane.xlu0 %2177 }
0x125e   :  { %6313 = vst [vmem:[#allocation22_spill] sm:$0xff] %v5825_v0 }
0x125f   :  { %2434 = vbcast.lane.b32.xlu1 %v2432_v32, 256  ;;  %v5786_v32 = vrot.slane %v3837_v49, %v5386_v28  ;;  %v2766_v34 = vmul.f32 %v2750_v46, %v5404_v13  ;;  %v3100_v49 = vcombine.high %v3084_v56, %v3084_v56 }
0x1261   :  { %v3878_v37 = vrot.slane %v5786_v32, %v6304_v2  ;;  %v2788_v55 = vsel %vm1603_vm11, %v2766_v34, 0.0  ;;  %v2802_v34 = vrot.slane %v5354_v42, %v6296_v1 }
0x1263   :  { %v3912_v39 = vmul.f32 %v3878_v37, %v5404_v13  ;;  %v2809_v37 = vrot.slane %v5354_v42, %v6298_v52 }
0x126c   :  { %v3792_v29 = vpop.f32.mrf.mxu1 }
0x126d   :  { %4624 = vlog2.f32 %v3792_v29  ;;  %v3911_v29 = vmul.f32 %v3874_v63, %v5404_v13 }
0x126e   :  { %v4409_v6 = vpop.f32.mrf.mxu1 }
0x126f   :  { %v3151_v6 = vsel %vm1603_vm11, %v3143_v3, 0.0  ;;  %v3919_v35 = vsel %vm1603_vm11, %v3911_v29, 0.0 }
0x1271   :  { %2448 = vbcast.lane.b32.xlu0 %v2446_v14, 256  ;;  %v2765_v14 = vmul.f32 %v2746_v57, %v5404_v13  ;;  %v3130_v57 = vrot.slane %v3100_v49, %v6304_v2 }
0x1273   :  { %v2785_v7 = vsel %vm1603_vm11, %v2765_v14, 0.0  ;;  %v3149_v29 = vmul.f32 %v3130_v57, %v5404_v13 }
0x127a   :  { %v4625_v20 = vpop.eup %4624 }
0x127b   :  { %v3797_v22 = vmul.f32 0.6931472, %v4625_v20  ;;  %v3922_v20 = vsel %vm1603_vm11, %v3912_v39, 0.0  ;;  %v3867_v39 = vcombine.high %v5772_v43, %v5772_v43  ;;  %v3454_v43 = vcombine.high %v5733_v31, %v5733_v31 }
0x127d   :  { %v3798_v61 = vadd.f32 %v3797_v22, %v5566_v36  ;;  %v3490_v36 = vrot.slane %v5719_v51, %v6304_v2  ;;  %v3482_v57 = vrot.slane %v3454_v43, %v5386_v28 }
0x127f   :  { %v3800_v16 = vadd.f32 %v3798_v61, %v5266_v59  ;;  %v3527_v3 = vmul.f32 %v3490_v36, %v5404_v13  ;;  %v3486_v27 = vcombine.high %v3482_v57, %v3482_v57 }
0x1281   :  { %v5810_v63 = vsel %vm3799_vm12, %v3800_v16, %v5548_v23  ;;  %v3535_v22 = vsel %vm1603_vm11, %v3527_v3, 0.0  ;;  %v3134_v23 = vrot.slane %v3102_v33, %v6304_v2  ;;  %v3510_v33 = vrot.slane %v3482_v57, %v6304_v2 }
0x1282   :  { %v4101_v51 = vsel %vm1471_vm2, %v5810_v63, -inf }
0x1283   :  { %2771 = vadd.xlane.f32.xlu1 %v2770_v60  ;;  %v3122_v60 = vrot.slane %v3084_v56, %v6304_v2  ;;  %v3150_v14 = vmul.f32 %v3134_v23, %v5404_v13  ;;  %v5827_v56 = vpop.xlane.xlu0 %2384 }
0x1285   :  { %v3147_v48 = vmul.f32 %v3122_v60, %v5404_v13  ;;  %v3172_v46 = vsel %vm1603_vm11, %v3150_v14, 0.0  ;;  %v2795_v13 = vrot.slane %v5354_v42, %v6304_v2 }
0x1287   :  { %2780 = vadd.xlane.f32.xlu1 %v2779_v44  ;;  %v3163_v44 = vsel %vm1603_vm11, %v3147_v48, 0.0  ;;  %v5831_v61 = vpop.xlane.xlu0 %2390  ;;  %v5851_v48 = vld [vmem:[%s6260_s11] sm:$0x3f] }
0x128b   :  { %3152 = vadd.xlane.f32.xlu1 %v3151_v6  ;;  %v3169_v6 = vsel %vm1603_vm11, %v3149_v29, 0.0 }
0x128f   :  { %2786 = vadd.xlane.f32.xlu1 %v2785_v7  ;;  %v5837_v7 = vpop.xlane.xlu0 %2396 }
0x1290   :  { %3920 = vadd.xlane.f32.xlu0 %v3919_v35  ;;  %v2439_v35 = vrot.slane %v5261_v47, %v5339_v62 }
0x1293   :  { %2789 = vadd.xlane.f32.xlu1 %v2788_v55  ;;  %v5841_v60 = vpop.xlane.xlu0 %2402  ;;  %v3882_v55 = vrot.slane %v3867_v39, %v6304_v2 }
0x1294   :  { %3923 = vadd.xlane.f32.xlu0 %v3922_v20 }
0x1295   :  { %v3913_v36 = vmul.f32 %v5851_v48, %v3882_v55 }
0x1297   :  { %3164 = vadd.xlane.f32.xlu1 %v3163_v44  ;;  %v5845_v16 = vpop.permute.xlu0 %2413  ;;  %v3925_v20 = vsel %vm1603_vm11, %v3913_v36, 0.0 }
0x1298   :  { %4102 = vmax.xlane.f32.xlu0 %v4101_v51 }
0x129b   :  { %3536 = vadd.xlane.f32.xlu1 %v3535_v22  ;;  %v5854_v49 = vpop.permute.xlu0 %2427  ;;  %v3532_v22 = vmul.f32 %v5851_v48, %v3510_v33 }
0x129d   :  { %v3550_v23 = vsel %vm1603_vm11, %v3532_v22, 0.0 }
0x129f   :  { %3170 = vadd.xlane.f32.xlu1 %v3169_v6  ;;  %v2816_v6 = vrot.slane %v5354_v42, %v6300_v5 }
0x12a3   :  { %3173 = vadd.xlane.f32.xlu1 %v3172_v46  ;;  %v2453_v46 = vrot.slane %v5261_v47, %v5417_v10 }
0x12ae   :  { %2811 = vbcast.lane.b32.xlu0 %v2809_v37, 256  ;;  %v3822_v37 = vcombine.high %v5763_v45, %v5763_v45 }
0x12b4   :  { %2441 = vbcast.lane.b32.xlu1 %v2439_v35, 256 }
0x12b8   :  { %2797 = vbcast.lane.b32.xlu1 %v2795_v13, 256  ;;  %v5857_v44 = vpop.xlane.xlu0 %2768  ;;  %v5884_v13 = vrot.slane %v3822_v37, %v5386_v28 }
0x12ba   :  { %v3852_v36 = vrot.slane %v5884_v13, %v5386_v28  ;;  %v3838_v58 = vcombine.high %v5884_v13, %v5884_v13 }
0x12bc   :  { %2804 = vbcast.lane.b32.xlu1 %v2802_v34, 256  ;;  %v5861_v3 = vpop.xlane.xlu0 %2774  ;;  %v3869_v34 = vcombine.high %v5786_v32, %v5786_v32  ;;  %v3890_v33 = vrot.slane %v3852_v36, %v6304_v2  ;;  %v3866_v11 = vrot.slane %v3838_v58, %v5386_v28  ;;  %v3961_v58 = vrot.slane %v5271_v30, %v6298_v52 }
0x12be   :  { %v3886_v55 = vrot.slane %v3869_v34, %v6304_v2 }
0x12bf   :  { %v5929_v19 = vpop.xlane.xlu1 %2170 }
0x12c0   :  { %v5865_v51 = vpop.xlane.xlu0 %2777  ;;  %v3914_v43 = vmul.f32 %v5851_v48, %v3886_v55  ;;  %6314 = vst [vmem:[#allocation23_spill] sm:$0xff] %v5929_v19 }
0x12c2   :  { %v3928_v22 = vsel %vm1603_vm11, %v3914_v43, 0.0 }
0x12c3   :  { %v5932_v40 = vpop.xlane.xlu1 %2387 }
0x12c4   :  { %v5868_v29 = vpop.xlane.xlu0 %2783 }
0x12c8   :  { %v5873_v31 = vpop.xlane.xlu0 %3155 }
0x12cc   :  { %v5875_v14 = vpop.xlane.xlu0 %3158 }
0x12cd   :  { %3926 = vadd.xlane.f32.xlu0 %v3925_v20 }
0x12d0   :  { %v5881_v35 = vpop.xlane.xlu0 %3161 }
0x12d4   :  { %v5888_v39 = vpop.xlane.xlu0 %3167 }
0x12d8   :  { %v5893_v20 = vpop.xlane.xlu0 %3539 }
0x12e0   :  { %3551 = vadd.xlane.f32.xlu1 %v3550_v23  ;;  %v3915_v23 = vmul.f32 %v5851_v48, %v3890_v33 }
0x12e2   :  { %v3931_v32 = vsel %vm1603_vm11, %v3915_v23, 0.0  ;;  %v2830_v23 = vrot.slane %v5354_v42, %v5363_v4 }
0x12e3   :  { %2818 = vbcast.lane.b32.xlu0 %v2816_v6, 256  ;;  %v5899_v6 = vpop.xlane.xlu0 %3542 }
0x12e7   :  { %v5904_v37 = vpop.xlane.xlu0 %3545 }
0x12eb   :  { %v5907_v55 = vpop.xlane.xlu0 %3548 }
0x12ef   :  { %v5911_v33 = vpop.permute.xlu0 %2448 }
0x12f1   :  { %2455 = vbcast.lane.b32.xlu1 %v2453_v46, 256  ;;  %v3484_v46 = vcombine.high %v5740_v15, %v5740_v15 }
0x12f3   :  { %v3514_v34 = vrot.slane %v3484_v46, %v6304_v2 }
0x12f5   :  { %v3533_v9 = vmul.f32 %v5851_v48, %v3514_v34  ;;  %v3193_v34 = vrot.slane %v5543_v8, %v6298_v52  ;;  %v2844_v52 = vrot.slane %v5354_v42, %v5461_v18 }
0x12f7   :  { %v3553_v43 = vsel %vm1603_vm11, %v3533_v9, 0.0 }
0x1302   :  { %3929 = vadd.xlane.f32.xlu0 %v3928_v22 }
0x1306   :  { %3932 = vadd.xlane.f32.xlu0 %v3931_v32  ;;  %v2837_v32 = vrot.slane %v5354_v42, %v5417_v10 }
0x1315   :  { %3554 = vadd.xlane.f32.xlu1 %v3553_v43 }
0x1319   :  { %v5913_v22 = vpop.xlane.xlu0 %3920 }
0x131c   :  { %2832 = vbcast.lane.b32.xlu0 %v2830_v23, 256 }
0x131d   :  { %v5917_v15 = vpop.xlane.xlu0 %3923 }
0x1320   :  { %2839 = vbcast.lane.b32.xlu0 %v2837_v32, 256  ;;  %v3868_v32 = vcombine.high %v3852_v36, %v3852_v36 }
0x1321   :  { %v5921_v46 = vpop.xlane.xlu0 %4102 }
0x1322   :  { %v4104_v9 = vsub.f32 %v5810_v63, %v5921_v46  ;;  %v3898_v0 = vrot.slane %v3868_v32, %v6304_v2 }
0x1324   :  { %v4105_v43 = vmul.f32 1.442695, %v4104_v9  ;;  %3195 = vbcast.lane.b32.xlu0 %v3193_v34, 256  ;;  %v3917_v12 = vmul.f32 %v5851_v48, %v3898_v0  ;;  %v5936_v9 = vpop.xlane.xlu1 %2393  ;;  %v3518_v34 = vrot.slane %v3486_v27, %v6304_v2  ;;  %v3200_v0 = vrot.slane %v5543_v8, %v6300_v5 }
0x1325   :  { %v2823_v27 = vrot.slane %v5354_v42, %v5339_v62 }
0x1326   :  { %4626 = vpow2.f32 %v4105_v43  ;;  %2462 = vbcast.lane.b32.xlu1 %v2460_v38, 256  ;;  %v3937_v47 = vsel %vm1603_vm11, %v3917_v12, 0.0  ;;  %v3534_v38 = vmul.f32 %v5851_v48, %v3518_v34  ;;  %v3207_v12 = vrot.slane %v5543_v8, %v5339_v62 }
0x1327   :  { %v3179_v34 = vrot.slane %v5543_v8, %v6304_v2 }
0x1328   :  { %v5941_v43 = vpop.xlane.xlu1 %2399  ;;  %v3556_v36 = vsel %vm1603_vm11, %v3534_v38, 0.0  ;;  %v3214_v38 = vrot.slane %v5543_v8, %v5363_v4 }
0x1333   :  { %v4627_v23 = vpop.eup %4626 }
0x1334   :  { %4413 = vmatmul.mubr.msk.f32.vlgmr.msra.gmra.mxu0 %vm1471_vm2, %v4627_v23  ;;  %v5944_v23 = vpop.xlane.xlu1 %2405 }
0x1338   :  { %v2421_v32 = vpop.permute.xlu1 %2420 }
0x133c   :  { %v5948_v57 = vpop.permute.xlu1 %3819 }
0x1343   :  { %3938 = vadd.xlane.f32.xlu0 %v3937_v47  ;;  %v2435_v47 = vpop.permute.xlu1 %2434 }
0x134a   :  { %3557 = vadd.xlane.f32.xlu1 %v3556_v36  ;;  %v3186_v36 = vrot.slane %v5543_v8, %v6296_v1 }
0x1359   :  { %3202 = vbcast.lane.b32.xlu0 %v3200_v0, 256  ;;  %v5960_v0 = vpop.xlane.xlu1 %2771 }
0x135b   :  { %2825 = vbcast.lane.b32.xlu1 %v2823_v27, 256  ;;  %v3563_v27 = vrot.slane %v5266_v59, %v6304_v2 }
0x135d   :  { %3209 = vbcast.lane.b32.xlu0 %v3207_v12, 256  ;;  %v3570_v12 = vrot.slane %v5266_v59, %v6296_v1  ;;  %v5966_v19 = vpop.xlane.xlu1 %2780 }
0x135f   :  { %3181 = vbcast.lane.b32.xlu1 %v3179_v34, 256  ;;  %v3221_v34 = vrot.slane %v5543_v8, %v5417_v10 }
0x1361   :  { %3216 = vbcast.lane.b32.xlu0 %v3214_v38, 256  ;;  %v5970_v38 = vpop.xlane.xlu1 %3152 }
0x1363   :  { %3188 = vbcast.lane.b32.xlu1 %v3186_v36, 256  ;;  %v3228_v36 = vrot.slane %v5543_v8, %v5461_v18  ;;  %v3894_v8 = vrot.slane %v3866_v11, %v6304_v2 }
0x1365   :  { %3565 = vbcast.lane.b32.xlu0 %v3563_v27, 256  ;;  %v5976_v27 = vpop.xlane.xlu1 %2786  ;;  %v3916_v13 = vmul.f32 %v5851_v48, %v3894_v8  ;;  %v3982_v8 = vrot.slane %v5271_v30, %v5363_v4 }
0x1367   :  { %v3934_v28 = vsel %vm1603_vm11, %v3916_v13, 0.0  ;;  %v2472_v13 = vadd.f32 %v5845_v16, %v5827_v56 }
0x1369   :  { %3572 = vbcast.lane.b32.xlu0 %v3570_v12, 256  ;;  %v3591_v12 = vrot.slane %v5266_v59, %v5339_v62 }
0x136d   :  { %3223 = vbcast.lane.b32.xlu0 %v3221_v34, 256  ;;  %v5982_v34 = vpop.xlane.xlu1 %2789 }
0x1371   :  { %3579 = vbcast.lane.b32.xlu0 %v3577_v17, 256  ;;  %v3598_v17 = vrot.slane %v5266_v59, %v5363_v4  ;;  %v5990_v53 = vpop.xlane.xlu1 %3164 }
0x1375   :  { %3230 = vbcast.lane.b32.xlu0 %v3228_v36, 256  ;;  %v3947_v36 = vrot.slane %v5271_v30, %v6304_v2  ;;  %v5995_v54 = vpop.xlane.xlu1 %3536 }
0x1379   :  { %3593 = vbcast.lane.b32.xlu0 %v3591_v12, 256  ;;  %v3954_v12 = vrot.slane %v5271_v30, %v6296_v1  ;;  %v6002_v24 = vpop.xlane.xlu1 %3170 }
0x137d   :  { %3600 = vbcast.lane.b32.xlu0 %v3598_v17, 256  ;;  %v3968_v17 = vrot.slane %v5271_v30, %v6300_v5  ;;  %v6006_v1 = vpop.xlane.xlu1 %3173 }
0x1381   :  { %3949 = vbcast.lane.b32.xlu0 %v3947_v36, 256  ;;  %v3996_v36 = vrot.slane %v5271_v30, %v5461_v18 }
0x1385   :  { %3956 = vbcast.lane.b32.xlu0 %v3954_v12, 256  ;;  %v2442_v12 = vpop.permute.xlu1 %2441 }
0x1386   :  { %v2476_v56 = vadd.f32 %v2442_v12, %v5837_v7 }
0x1387   :  { %3935 = vadd.xlane.f32.xlu1 %v3934_v28  ;;  %v2473_v28 = vadd.f32 %v2421_v32, %v5932_v40  ;;  %v2477_v40 = vadd.f32 %v5911_v33, %v5941_v43 }
0x1389   :  { %3963 = vbcast.lane.b32.xlu0 %v3961_v58, 256  ;;  %v2798_v4 = vpop.permute.xlu1 %2797  ;;  %v2474_v58 = vadd.f32 %v5854_v49, %v5831_v61  ;;  %v3870_v49 = vcombine.high %v3866_v11, %v3866_v11 }
0x138a   :  { %v2856_v61 = vadd.f32 %v2798_v4, %v5857_v44 }
0x138b   :  { %v3902_v7 = vrot.slane %v3870_v49, %v6304_v2  ;;  %v3989_v49 = vrot.slane %v5271_v30, %v5417_v10 }
0x138d   :  { %3970 = vbcast.lane.b32.xlu0 %v3968_v17, 256  ;;  %v2812_v17 = vpop.permute.xlu0 %2811  ;;  %v3918_v43 = vmul.f32 %v5851_v48, %v3902_v7  ;;  %v3605_v48 = vrot.slane %v5266_v59, %v5417_v10 }
0x138f   :  { %v3940_v44 = vsel %vm1603_vm11, %v3918_v43, 0.0  ;;  %vm4183_vm11 = vcmp.gt.f32.partialorder %v5948_v57, 0.0 }
0x1391   :  { %3984 = vbcast.lane.b32.xlu0 %v3982_v8, 256  ;;  %v2475_v8 = vadd.f32 %v2435_v47, %v5936_v9  ;;  %v6018_v42 = vpop.xlane.xlu0 %3926 }
0x1395   :  { %3998 = vbcast.lane.b32.xlu0 %v3996_v36, 256  ;;  %v2805_v36 = vpop.permute.xlu1 %2804  ;;  %v2819_v32 = vpop.permute.xlu0 %2818 }
0x1396   :  { %v2857_v47 = vadd.f32 %v2805_v36, %v5960_v0  ;;  %v2859_v0 = vadd.f32 %v2819_v32, %v5865_v51  ;;  %v3975_v32 = vrot.slane %v5271_v30, %v5339_v62 }
0x1398   :  { %2846 = vbcast.lane.b32.xlu1 %v2844_v52, 256 }
0x1399   :  { %2489 = vperm.xlu0 %4428, %v2472_v13   ;;  %v6021_v16 = vpop.xlane.xlu1 %3551  ;;  %v6026_v13 = vpop.xlane.xlu0 %3929 }
0x139d   :  { %2492 = vperm.xlu0 %4428, %v2473_v28   ;;  %v2456_v52 = vpop.permute.xlu1 %2455  ;;  %v6032_v12 = vpop.xlane.xlu0 %3932 }
0x139e   :  { %v2478_v33 = vadd.f32 %v2456_v52, %v5841_v60 }
0x13a1   :  { %2495 = vperm.xlu0 %4428, %v2474_v58   ;;  %v6028_v9 = vpop.xlane.xlu1 %3554  ;;  %v2833_v4 = vpop.permute.xlu0 %2832 }
0x13a5   :  { %2498 = vperm.xlu0 %4428, %v2475_v8   ;;  %v2463_v28 = vpop.permute.xlu1 %2462  ;;  %v2840_v2 = vpop.permute.xlu0 %2839  ;;  %v3584_v8 = vrot.slane %v5266_v59, %v6300_v5 }
0x13a6   :  { %v2479_v11 = vadd.f32 %v2463_v28, %v5944_v23  ;;  %v2862_v28 = vadd.f32 %v2840_v2, %v5976_v27 }
0x13a9   :  { %2501 = vperm.xlu0 %4428, %v2476_v56   ;;  %v3196_v58 = vpop.permute.xlu0 %3195  ;;  %v3612_v56 = vrot.slane %v5266_v59, %v5461_v18  ;;  %v2858_v59 = vadd.f32 %v2812_v17, %v5861_v3 }
0x13aa   :  { %v3242_v10 = vadd.f32 %v3196_v58, %v5875_v14 }
0x13ad   :  { %2504 = vperm.xlu0 %4428, %v2477_v40  }
0x13b1   :  { %2873 = vperm.xlu0 %4428, %v2856_v61  }
0x13b5   :  { %2876 = vperm.xlu0 %4428, %v2857_v47   ;;  %v2861_v47 = vadd.f32 %v2833_v4, %v5868_v29 }
0x13b9   :  { %2507 = vperm.xlu0 %4428, %v2478_v33  }
0x13bc   :  { %3941 = vadd.xlane.f32.xlu1 %v3940_v44 }
0x13bd   :  { %2510 = vperm.xlu0 %4428, %v2479_v11  }
0x13c1   :  { %2882 = vperm.xlu0 %4428, %v2859_v0  }
0x13cc   :  { %v6041_v60 = vpop.xlane.xlu0 %3938 }
0x13cd   :  { %3586 = vbcast.lane.b32.xlu1 %v3584_v8, 256 }
0x13d0   :  { %v3203_v23 = vpop.permute.xlu0 %3202 }
0x13d1   :  { %3607 = vbcast.lane.b32.xlu1 %v3605_v48, 256  ;;  %v3243_v44 = vadd.f32 %v3203_v23, %v5881_v35 }
0x13d3   :  { %v6045_v36 = vpop.xlane.xlu1 %3557 }
0x13d4   :  { %v3210_v51 = vpop.permute.xlu0 %3209 }
0x13d5   :  { %3614 = vbcast.lane.b32.xlu1 %v3612_v56, 256 }
0x13d7   :  { %v2826_v40 = vpop.permute.xlu1 %2825 }
0x13d8   :  { %v2860_v5 = vadd.f32 %v2826_v40, %v5966_v19  ;;  %v3217_v52 = vpop.permute.xlu0 %3216 }
0x13d9   :  { %3977 = vbcast.lane.b32.xlu1 %v3975_v32, 256 }
0x13da   :  { %2885 = vperm.xlu0 %4428, %v2860_v5   ;;  %v3244_v5 = vadd.f32 %v3210_v51, %v5990_v53 }
0x13db   :  { %v3182_v61 = vpop.permute.xlu1 %3181 }
0x13dc   :  { %v3566_v7 = vpop.permute.xlu0 %3565  ;;  %v3240_v33 = vadd.f32 %v3182_v61, %v5970_v38  ;;  %v3245_v38 = vadd.f32 %v3217_v52, %v5888_v39 }
0x13dd   :  { %3991 = vbcast.lane.b32.xlu1 %v3989_v49, 256 }
0x13de   :  { %2888 = vperm.xlu0 %4428, %v2861_v47   ;;  %v3624_v47 = vadd.f32 %v3566_v7, %v5995_v54 }
0x13df   :  { %v3189_v43 = vpop.permute.xlu1 %3188 }
0x13e0   :  { %v3573_v62 = vpop.permute.xlu0 %3572  ;;  %v3241_v19 = vadd.f32 %v3189_v43, %v5873_v31 }
0x13e1   :  { %2879 = vperm.xlu1 %4429, %v2858_v59   ;;  %v3625_v4 = vadd.f32 %v3573_v62, %v5893_v20 }
0x13e2   :  { %3257 = vperm.xlu0 %4428, %v3240_v33  }
0x13e4   :  { %v3224_v11 = vpop.permute.xlu0 %3223 }
0x13e5   :  { %3260 = vperm.xlu1 %4429, %v3241_v19   ;;  %v3246_v43 = vadd.f32 %v3224_v11, %v6002_v24 }
0x13e6   :  { %2891 = vperm.xlu0 %4428, %v2862_v28  }
0x13e8   :  { %v3580_v29 = vpop.permute.xlu0 %3579 }
0x13e9   :  { %3263 = vperm.xlu1 %4429, %v3242_v10   ;;  %v3626_v2 = vadd.f32 %v3580_v29, %v5899_v6 }
0x13ec   :  { %v3231_v3 = vpop.permute.xlu0 %3230 }
0x13ed   :  { %3266 = vperm.xlu1 %4429, %v3243_v44   ;;  %v3247_v19 = vadd.f32 %v3231_v3, %v6006_v1 }
0x13f0   :  { %v3594_v17 = vpop.permute.xlu0 %3593 }
0x13f1   :  { %3272 = vperm.xlu1 %4429, %v3245_v38   ;;  %v3628_v10 = vadd.f32 %v3594_v17, %v5907_v55 }
0x13f4   :  { %v6063_v31 = vpop.f32.mrf.mxu0  ;;  %v3601_v27 = vpop.permute.xlu0 %3600 }
0x13f5   :  { %3644 = vperm.xlu1 %4429, %v3625_v4   ;;  %4628 = vlog2.f32 %v6063_v31 }
0x13f6   :  { %v4414_v0 = vpop.f32.mrf.mxu0 }
0x13f7   :  { %v3629_v0 = vadd.f32 %v3601_v27, %v6021_v16 }
0x13f8   :  { %v3950_v14 = vpop.permute.xlu0 %3949 }
0x13f9   :  { %3647 = vperm.xlu1 %4429, %v3626_v2   ;;  %v4008_v11 = vadd.f32 %v3950_v14, %v5913_v22 }
0x13fc   :  { %v3957_v58 = vpop.permute.xlu0 %3956 }
0x13fd   :  { %v4009_v2 = vadd.f32 %v3957_v58, %v5917_v15  ;;  %v4639_v15 = vld [vmem:[%s6250_s1] sm:$0xff] }
0x1400   :  { %v3964_v8 = vpop.permute.xlu0 %3963 }
0x1404   :  { %v3971_v35 = vpop.permute.xlu0 %3970 }
0x1405   :  { %v4011_v16 = vadd.f32 %v3971_v35, %v6026_v13  ;;  %v4629_v13 = vpop.eup %4628 }
0x1408   :  { %v3985_v48 = vpop.permute.xlu0 %3984 }
0x140c   :  { %v3999_v23 = vpop.permute.xlu0 %3998 }
0x1410   :  { %v3936_v56 = vpop.xlane.xlu1 %3935 }
0x1411   :  { %v4013_v27 = vadd.f32 %v3985_v48, %v3936_v56 }
0x1414   :  { %v2847_v39 = vpop.permute.xlu1 %2846  ;;  %v2490_v40 = vpop.permute.xlu0 %2489 }
0x1415   :  { %v2863_v32 = vadd.f32 %v2847_v39, %v5982_v34  ;;  %v2515_v52 = vrot.slane %v2490_v40, %v5491_v50 }
0x1417   :  { %2894 = vperm.xlu0 %4428, %v2863_v32  }
0x1418   :  { %v2493_v20 = vpop.permute.xlu0 %2492 }
0x1419   :  { %v2519_v6 = vrot.slane %v2493_v20, %v5491_v50 }
0x141b   :  { %v2544_v61 = vsel %vm1765_vm13, %v2519_v6, %v2515_v52  ;;  %3269 = vperm.xlu0 %4428, %v3244_v5  }
0x141c   :  { %v2496_v49 = vpop.permute.xlu0 %2495 }
0x141d   :  { %v2523_v59 = vrot.slane %v2496_v49, %v5491_v50 }
0x141f   :  { %v2545_v33 = vsel %vm1767_vm14, %v2523_v59, %v2544_v61  ;;  %3641 = vperm.xlu0 %4428, %v3624_v47  }
0x1420   :  { %v2499_v34 = vpop.permute.xlu0 %2498 }
0x1421   :  { %v2527_v53 = vrot.slane %v2499_v34, %v5491_v50 }
0x1423   :  { %v2546_v51 = vsel %vm1769_vm15, %v2527_v53, %v2545_v33  ;;  %3275 = vperm.xlu0 %4428, %v3246_v43  }
0x1424   :  { %v2502_v62 = vpop.permute.xlu0 %2501 }
0x1425   :  { %v2531_v28 = vrot.slane %v2502_v62, %v5491_v50 }
0x1427   :  { %v2547_v54 = vsel %vm1771_vm0, %v2531_v28, %v2546_v51  ;;  %3278 = vperm.xlu0 %4428, %v3247_v19  }
0x1428   :  { %v2505_v7 = vpop.permute.xlu0 %2504 }
0x1429   :  { %v2535_v29 = vrot.slane %v2505_v7, %v5491_v50 }
0x142b   :  { %v6083_v24 = vsel %vm1773_vm1, %v2535_v29, %v2547_v54  ;;  %3653 = vperm.xlu0 %4428, %v3628_v10  }
0x142c   :  { %v2874_v58 = vpop.permute.xlu0 %2873 }
0x142d   :  { %v2899_v49 = vrot.slane %v2874_v58, %v5491_v50 }
0x142f   :  { %4025 = vperm.xlu0 %4428, %v4008_v11  }
0x1445   :  { %v3942_v44 = vpop.xlane.xlu1 %3941 }
0x1446   :  { %v6086_v38 = vadd.f32 %v3999_v23, %v3942_v44  ;;  %v4010_v23 = vadd.f32 %v3964_v8, %v6018_v42  ;;  %v2877_v42 = vpop.permute.xlu0 %2876  ;;  %v4181_v8 = vmul.f32 0.6931472, %v4629_v13 }
0x1447   :  { %v2903_v52 = vrot.slane %v2877_v42, %v5491_v50 }
0x1448   :  { %v4182_v35 = vadd.f32 %v4181_v8, %v5921_v46 }
0x1449   :  { %v3587_v1 = vpop.permute.xlu1 %3586 }
0x144a   :  { %v3627_v3 = vadd.f32 %v3587_v1, %v5904_v37  ;;  %v4184_v32 = vadd.f32 %v4182_v35, %v5271_v30 }
0x144c   :  { %3650 = vperm.xlu1 %4429, %v3627_v3   ;;  %v4187_v56 = vsel %vm4183_vm11, %v4184_v32, %v5810_v63  ;;  %v2928_v63 = vsel %vm1765_vm13, %v2903_v52, %v2899_v49 }
0x144d   :  { %v3608_v4 = vpop.permute.xlu1 %3607 }
0x144e   :  { %v3630_v55 = vadd.f32 %v3608_v4, %v6028_v9 }
0x1450   :  { %3656 = vperm.xlu1 %4429, %v3629_v0   ;;  %3659 = vperm.xlu0 %4428, %v3630_v55  }
0x1451   :  { %v3615_v17 = vpop.permute.xlu1 %3614 }
0x1452   :  { %v3631_v22 = vadd.f32 %v3615_v17, %v6045_v36  ;;  %v3807_v36 = vrot.slane %v4639_v15, %v5461_v18  ;;  %v6111_v18 = vld [vmem:[%s6259_s10] ss:$0 sm:$0xff] }
0x1453   :  { %v2559_v31 = vmul.f32 %v6111_v18, %v5615_v41  ;;  %v6119_v46 = vadd.f32 %v6111_v18, %v4187_v56  ;;  %v3711_v35 = vmul.f32 %v6111_v18, %v5763_v45 }
0x1454   :  { %3662 = vperm.xlu0 %4428, %v3631_v22   ;;  %4028 = vperm.xlu1 %4429, %v4009_v2  }
0x1455   :  { %v3978_v14 = vpop.permute.xlu1 %3977  ;;  %v2560_v20 = vsel %vm1471_vm2, %v2559_v31, 0.0  ;;  %v4189_v6 = vsel %vm1471_vm2, %v6119_v46, -inf }
0x1456   :  { %v4012_v37 = vadd.f32 %v3978_v14, %v6032_v12  ;;  %v6102_v12 = vpop.permute.xlu0 %2507 }
0x1458   :  { %4037 = vperm.xlu0 %4428, %v4012_v37   ;;  %4031 = vperm.xlu1 %4429, %v4010_v23  }
0x1459   :  { %v3992_v39 = vpop.permute.xlu1 %3991 }
0x145a   :  { %v4014_v9 = vadd.f32 %v3992_v39, %v6041_v60  ;;  %v6104_v60 = vpop.permute.xlu0 %2510 }
0x145c   :  { %4043 = vperm.xlu0 %4428, %v4014_v9   ;;  %4034 = vperm.xlu1 %4429, %v4011_v16   ;;  %v2943_v16 = vmul.f32 %v6111_v18, %v5630_v25 }
0x145d   :  { %v2880_v5 = vpop.permute.xlu1 %2879 }
0x145e   :  { %v2883_v40 = vpop.permute.xlu0 %2882  ;;  %v2907_v61 = vrot.slane %v2880_v5, %v5491_v50  ;;  %v2543_v5 = vrot.slane %v6104_v60, %v5491_v50 }
0x145f   :  { %v2911_v34 = vrot.slane %v2883_v40, %v5491_v50 }
0x1460   :  { %3809 = vbcast.lane.b32.xlu0 %v3807_v36, 256  ;;  %4040 = vperm.xlu1 %4429, %v4013_v27   ;;  %v2929_v33 = vsel %vm1767_vm14, %v2907_v61, %v2928_v63  ;;  %v2944_v36 = vsel %vm1471_vm2, %v2943_v16, 0.0  ;;  %v3327_v27 = vmul.f32 %v6111_v18, %v5683_v26 }
0x1461   :  { %v3261_v47 = vpop.permute.xlu1 %3260  ;;  %v2930_v43 = vsel %vm1769_vm15, %v2911_v34, %v2929_v33 }
0x1462   :  { %v2886_v48 = vpop.permute.xlu0 %2885  ;;  %v3287_v29 = vrot.slane %v3261_v47, %v5491_v50 }
0x1463   :  { %v2915_v51 = vrot.slane %v2886_v48, %v5491_v50  ;;  %v3712_v48 = vsel %vm1471_vm2, %v3711_v35, 0.0 }
0x1465   :  { %v3264_v53 = vpop.permute.xlu1 %3263  ;;  %v2931_v19 = vsel %vm1771_vm0, %v2915_v51, %v2930_v43 }
0x1466   :  { %v2889_v30 = vpop.permute.xlu0 %2888  ;;  %v3291_v44 = vrot.slane %v3264_v53, %v5491_v50 }
0x1467   :  { %v2919_v28 = vrot.slane %v2889_v30, %v5491_v50 }
0x1469   :  { %v2932_v7 = vsel %vm1773_vm1, %v2919_v28, %v2931_v19  ;;  %v3267_v10 = vpop.permute.xlu1 %3266 }
0x146a   :  { %v3258_v59 = vpop.permute.xlu0 %3257  ;;  %v3295_v0 = vrot.slane %v3267_v10, %v5491_v50 }
0x146b   :  { %v3283_v3 = vrot.slane %v3258_v59, %v5491_v50 }
0x146d   :  { %v3312_v17 = vsel %vm1765_vm13, %v3287_v29, %v3283_v3  ;;  %v3273_v15 = vpop.permute.xlu1 %3272 }
0x146e   :  { %v2892_v62 = vpop.permute.xlu0 %2891  ;;  %v3313_v14 = vsel %vm1767_vm14, %v3291_v44, %v3312_v17  ;;  %v3303_v58 = vrot.slane %v3273_v15, %v5491_v50 }
0x146f   :  { %v2923_v54 = vrot.slane %v2892_v62, %v5491_v50  ;;  %v3314_v37 = vsel %vm1769_vm15, %v3295_v0, %v3313_v14 }
0x1471   :  { %v2933_v4 = vsel %vm1775_vm3, %v2923_v54, %v2932_v7  ;;  %v3645_v49 = vpop.permute.xlu1 %3644 }
0x1475   :  { %v3648_v59 = vpop.permute.xlu1 %3647 }
0x1476   :  { %v3675_v60 = vrot.slane %v3648_v59, %v5491_v50 }
0x147f   :  { %2561 = vadd.xlane.f32.xlu0 %v2560_v20  ;;  %v2539_v20 = vrot.slane %v6102_v12, %v5491_v50  ;;  %v3671_v12 = vrot.slane %v3645_v49, %v5491_v50 }
0x1481   :  { %v2549_v30 = vsel %vm1775_vm3, %v2539_v20, %v6083_v24 }
0x1482   :  { %v2550_v52 = vsel %vm1777_vm4, %v2543_v5, %v2549_v30 }
0x1484   :  { %4190 = vmax.xlane.f32.xlu1 %v4189_v6  ;;  %v2552_v6 = vmul.f32 %v5615_v41, %v2550_v52 }
0x1486   :  { %v2553_v61 = vsel %vm1471_vm2, %v2552_v6, 0.0 }
0x1492   :  { %v2895_v11 = vpop.permute.xlu0 %2894 }
0x1493   :  { %v2927_v1 = vrot.slane %v2895_v11, %v5491_v50 }
0x1495   :  { %4046 = vperm.xlu1 %4429, %v6086_v38   ;;  %v2934_v55 = vsel %vm1777_vm4, %v2927_v1, %v2933_v4 }
0x1496   :  { %v3270_v2 = vpop.permute.xlu0 %3269  ;;  %v2936_v22 = vmul.f32 %v5630_v25, %v2934_v55  ;;  %v3328_v25 = vsel %vm1471_vm2, %v3327_v27, 0.0 }
0x1497   :  { %v3299_v23 = vrot.slane %v3270_v2, %v5491_v50 }
0x1498   :  { %v2937_v39 = vsel %vm1471_vm2, %v2936_v22, 0.0 }
0x1499   :  { %v3315_v38 = vsel %vm1771_vm0, %v3299_v23, %v3314_v37  ;;  %2938 = vadd.xlane.f32.xlu0 %v2937_v39 }
0x149a   :  { %v3642_v9 = vpop.permute.xlu0 %3641  ;;  %v3316_v8 = vsel %vm1773_vm1, %v3303_v58, %v3315_v38 }
0x149b   :  { %v3667_v63 = vrot.slane %v3642_v9, %v5491_v50 }
0x149d   :  { %2945 = vadd.xlane.f32.xlu0 %v2944_v36  ;;  %v3696_v33 = vsel %vm1765_vm13, %v3671_v12, %v3667_v63  ;;  %v6317_v63 = vld [vmem:[#allocation11_spill] sm:$0xff]  ;;  %v6318_v12 = vld [vmem:[#allocation16_spill] sm:$0xff] }
0x149e   :  { %v3276_v42 = vpop.permute.xlu0 %3275  ;;  %v3697_v53 = vsel %vm1767_vm14, %v3675_v60, %v3696_v33  ;;  %v6319_v33 = vld [vmem:[#allocation20_spill] sm:$0xff] }
0x149f   :  { %v3307_v13 = vrot.slane %v3276_v42, %v5491_v50  ;;  %v6315_v42 = vmov 0.0   ;;  %v1784_v60 = vmul.f32 %v6319_v33, %v6318_v12 }
0x14a1   :  { %v3317_v40 = vsel %vm1775_vm3, %v3307_v13, %v3316_v8  ;;  %3329 = vadd.xlane.f32.xlu0 %v3328_v25 }
0x14a2   :  { %v3279_v32 = vpop.permute.xlu0 %3278 }
0x14a3   :  { %v3311_v31 = vrot.slane %v3279_v32, %v5491_v50 }
0x14a5   :  { %3713 = vadd.xlane.f32.xlu0 %v3712_v48  ;;  %v6165_v56 = vsel %vm1777_vm4, %v3311_v31, %v3317_v40 }
0x14a6   :  { %v3654_v47 = vpop.permute.xlu0 %3653  ;;  %v3320_v6 = vmul.f32 %v5683_v26, %v6165_v56  ;;  %v6320_v26 = vld [vmem:[#allocation13_spill] sm:$0xff] }
0x14a7   :  { %v3683_v41 = vrot.slane %v3654_v47, %v5491_v50  ;;  %v6316_v47 = vld [vmem:[#allocation14_spill] sm:$0xff] }
0x14aa   :  { %v4026_v34 = vpop.permute.xlu0 %4025 }
0x14ab   :  { %v4051_v2 = vrot.slane %v4026_v34, %v5491_v50 }
0x14b9   :  { %2554 = vadd.xlane.f32.xlu1 %v2553_v61  ;;  %v3321_v61 = vsel %vm1471_vm2, %v3320_v6, 0.0  ;;  %v4202_v6 = vld [vmem:[%s6252_s3] sm:$0xff]  ;;  %s4681_s3 = scalar_lea.vmem %s4226_s25, 16 }
0x14ba   :  { %p4682_p10 = scmp.ne.s32.totalorder %s4226_s25, %s4681_s3  ;;  %p4687_p12 = scmp.lt.s32.totalorder %s4685_s28, %s4681_s3 }
0x14bc   :  { %p4688_p13 = por %p4687_p12, %p4686_p11 }
0x14be   :  { %p4689_p0 = pnand %p4688_p13, %p4682_p10 }
0x14c7   :  { %v3651_v24 = vpop.permute.xlu1 %3650 }
0x14c8   :  { %v3679_v43 = vrot.slane %v3651_v24, %v5491_v50  ;;  %v6322_v24 = vld [vmem:[#allocation23_spill] sm:$0xff] }
0x14ca   :  { %v3698_v51 = vsel %vm1769_vm15, %v3679_v43, %v3697_v53 }
0x14cb   :  { %v3657_v62 = vpop.permute.xlu1 %3656  ;;  %v3699_v19 = vsel %vm1771_vm0, %v3683_v41, %v3698_v51  ;;  %v3660_v28 = vpop.permute.xlu0 %3659  ;;  %v6323_v41 = vld [vmem:[#allocation21_spill] sm:$0xff] }
0x14cc   :  { %v3687_v54 = vrot.slane %v3657_v62, %v5491_v50  ;;  %v3691_v7 = vrot.slane %v3660_v28, %v5491_v50 }
0x14ce   :  { %v3700_v10 = vsel %vm1773_vm1, %v3687_v54, %v3699_v19  ;;  %v6324_v54 = vld [vmem:[#allocation18_spill] sm:$0xff] }
0x14cf   :  { %v3701_v29 = vsel %vm1775_vm3, %v3691_v7, %v3700_v10  ;;  %v4029_v11 = vpop.permute.xlu1 %4028  ;;  %v3663_v44 = vpop.permute.xlu0 %3662  ;;  %v6325_v10 = vld [vmem:[#allocation22_spill] sm:$0xff] }
0x14d0   :  { %v3695_v1 = vrot.slane %v3663_v44, %v5491_v50  ;;  %v4055_v55 = vrot.slane %v4029_v11, %v5491_v50 }
0x14d2   :  { %v3702_v3 = vsel %vm1777_vm4, %v3695_v1, %v3701_v29  ;;  %v4080_v23 = vsel %vm1765_vm13, %v4055_v55, %v4051_v2  ;;  %vm1475_vm13 = vcmp.eq.s32.totalorder %v6316_v47, 1  ;;  %v6326_v55 = vld [vmem:[#allocation15_spill] sm:$0xff] }
0x14d3   :  { %v4032_v4 = vpop.permute.xlu1 %4031  ;;  %v4038_v0 = vpop.permute.xlu0 %4037  ;;  %v3704_v49 = vmul.f32 %v5763_v45, %v3702_v3  ;;  %v1486_v59 = vsel %vm1475_vm13, %v6317_v63, 0.0  ;;  %v6321_v45 = vld [vmem:[#allocation17_spill] sm:$0xff] }
0x14d4   :  { %v4059_v17 = vrot.slane %v4032_v4, %v5491_v50  ;;  %v4067_v16 = vrot.slane %v4038_v0, %v5491_v50  ;;  %v1487_v56 = vadd.f32 %v1486_v59, %v6320_v26  ;;  %v2172_v43 = vmul.f32 %v6322_v24, %v6321_v45 }
0x14d6   :  { %v4081_v39 = vsel %vm1767_vm14, %v4059_v17, %v4080_v23  ;;  %v1785_v34 = vadd.f32 %v1784_v60, %v1487_v56  ;;  %vm1786_vm14 = vcmp.eq.s32.totalorder %v6316_v47, 2 }
0x14d7   :  { %v4035_v22 = vpop.permute.xlu1 %4034  ;;  %v4044_v14 = vpop.permute.xlu0 %4043  ;;  %v1791_v53 = vsel %vm1786_vm14, %v6323_v41, 0.0 }
0x14d8   :  { %v4063_v37 = vrot.slane %v4035_v22, %v5491_v50  ;;  %v4075_v58 = vrot.slane %v4044_v14, %v5491_v50  ;;  %v1792_v51 = vadd.f32 %v1791_v53, %v1785_v34 }
0x14da   :  { %v4082_v38 = vsel %vm1769_vm15, %v4063_v37, %v4081_v39  ;;  %v2173_v19 = vadd.f32 %v2172_v43, %v1792_v51  ;;  %vm2558_vm15 = vcmp.eq.s32.totalorder %v6316_v47, 4 }
0x14db   :  { %v4041_v9 = vpop.permute.xlu1 %4040  ;;  %v4083_v15 = vsel %vm1771_vm0, %v4067_v16, %v4082_v38  ;;  %v3810_v36 = vpop.permute.xlu0 %3809  ;;  %vm2942_vm0 = vcmp.eq.s32.totalorder %v6316_v47, 5  ;;  %v6327_v16 = vld [vmem:[#allocation12_spill] sm:$0xff] }
0x14dc   :  { %v4071_v27 = vrot.slane %v4041_v9, %v5491_v50  ;;  %vm3811_vm5 = vcmp.eq.s32.totalorder %v5383_v21, %v3810_v36 }
0x14dd   :  { %v4339_v13 = vsel %vm3811_vm5, 1.0, %v6315_v42  ;;  %v6328_v42 = vld [vmem:[#allocation19_spill] sm:$0xff] }
0x14de   :  { %v4084_v8 = vsel %vm1773_vm1, %v4071_v27, %v4083_v15  ;;  %v4095_v25 = vmul.f32 %v6111_v18, %v4339_v13  ;;  %vm3326_vm1 = vcmp.eq.s32.totalorder %v6316_v47, 6 }
0x14df   :  { %v4085_v35 = vsel %vm1775_vm3, %v4075_v58, %v4084_v8  ;;  %vm3710_vm3 = vcmp.eq.s32.totalorder %v6316_v47, 7 }
0x14e0   :  { %v4096_v40 = vsel %vm1471_vm2, %v4095_v25, 0.0 }
0x14e1   :  { %4097 = vadd.xlane.f32.xlu0 %v4096_v40 }
0x1508   :  { %v2562_v28 = vpop.xlane.xlu0 %2561 }
0x1509   :  { %v2563_v3 = vsel %vm2558_vm15, %v2562_v28, 0.0 }
0x150d   :  { %v6208_v32 = vpop.xlane.xlu1 %4190 }
0x150e   :  { %v4192_v31 = vsub.f32 %v6119_v46, %v6208_v32  ;;  %v3705_v46 = vsel %vm1471_vm2, %v3704_v49, 0.0 }
0x1510   :  { %v4193_v48 = vmul.f32 1.442695, %v4192_v31 }
0x1511   :  { %v4047_v21 = vpop.permute.xlu1 %4046 }
0x1512   :  { %4630 = vpow2.f32 %v4193_v48  ;;  %v4079_v20 = vrot.slane %v4047_v21, %v5491_v50 }
0x1514   :  { %v4086_v5 = vsel %vm1777_vm4, %v4079_v20, %v4085_v35  ;;  %vm4094_vm4 = vcmp.eq.s32.totalorder %v6316_v47, 8 }
0x1515   :  { %v4088_v30 = vmul.f32 %v4339_v13, %v4086_v5 }
0x1517   :  { %v4089_v50 = vsel %vm1471_vm2, %v4088_v30, 0.0 }
0x151f   :  { %v4631_v52 = vpop.eup %4630 }
0x1520   :  { %v4195_v18 = vsel %vm1471_vm2, %v4631_v52, 0.0  ;;  %vm2174_vm2 = vcmp.eq.s32.totalorder %v6316_v47, 3 }
0x1521   :  { %4196 = vadd.xlane.f32.xlu1 %v4195_v18  ;;  %v2179_v29 = vsel %vm2174_vm2, %v6325_v10, 0.0 }
0x1522   :  { %v2939_v11 = vpop.xlane.xlu0 %2938  ;;  %v2180_v44 = vadd.f32 %v2179_v29, %v2173_v19 }
0x1523   :  { %v2940_v17 = vmul.f32 %v2939_v11, %v6326_v55 }
0x1525   :  { %3322 = vadd.xlane.f32.xlu1 %v3321_v61 }
0x1526   :  { %v2946_v4 = vpop.xlane.xlu0 %2945 }
0x1527   :  { %v2947_v23 = vsel %vm2942_vm0, %v2946_v4, 0.0 }
0x1529   :  { %3706 = vadd.xlane.f32.xlu1 %v3705_v46 }
0x152a   :  { %v3330_v14 = vpop.xlane.xlu0 %3329 }
0x152b   :  { %v3331_v15 = vsel %vm3326_vm1, %v3330_v14, 0.0 }
0x152d   :  { %4090 = vadd.xlane.f32.xlu1 %v4089_v50 }
0x152e   :  { %v3714_v27 = vpop.xlane.xlu0 %3713 }
0x152f   :  { %v3715_v25 = vsel %vm3710_vm3, %v3714_v27, 0.0 }
0x1542   :  { %v2555_v62 = vpop.xlane.xlu1 %2554 }
0x1543   :  { %v2556_v7 = vmul.f32 %v2555_v62, %v6324_v54 }
0x1545   :  { %v2557_v1 = vadd.f32 %v2556_v7, %v2180_v44 }
0x1547   :  { %v2564_v0 = vadd.f32 %v2563_v3, %v2557_v1 }
0x1549   :  { %v2941_v22 = vadd.f32 %v2940_v17, %v2564_v0 }
0x154b   :  { %v2948_v39 = vadd.f32 %v2947_v23, %v2941_v22 }
0x156a   :  { %v4098_v40 = vpop.xlane.xlu0 %4097 }
0x156b   :  { %v4099_v30 = vsel %vm4094_vm4, %v4098_v40, 0.0 }
0x15aa   :  { %v4197_v2 = vpop.xlane.xlu1 %4196 }
0x15ab   :  { %4632 = vlog2.f32 %v4197_v2 }
0x15ae   :  { %v3323_v37 = vpop.xlane.xlu1 %3322 }
0x15af   :  { %v3324_v38 = vmul.f32 %v3323_v37, %v6327_v16 }
0x15b1   :  { %v3325_v9 = vadd.f32 %v3324_v38, %v2948_v39 }
0x15b2   :  { %v3707_v36 = vpop.xlane.xlu1 %3706 }
0x15b3   :  { %v3332_v58 = vadd.f32 %v3331_v15, %v3325_v9  ;;  %v3708_v13 = vmul.f32 %v3707_v36, %v6328_v42 }
0x15b5   :  { %v3709_v8 = vadd.f32 %v3708_v13, %v3332_v58 }
0x15b6   :  { %v4091_v35 = vpop.xlane.xlu1 %4090 }
0x15b7   :  { %v3716_v31 = vadd.f32 %v3715_v25, %v3709_v8  ;;  %v4092_v48 = vmul.f32 %v4091_v35, %v5948_v57 }
0x15b8   :  { %v4633_v21 = vpop.eup %4632 }
0x15b9   :  { %v4199_v20 = vmul.f32 0.6931472, %v4633_v21  ;;  %v4093_v5 = vadd.f32 %v4092_v48, %v3716_v31 }
0x15bb   :  { %v4200_v52 = vadd.f32 %v4199_v20, %v6208_v32  ;;  %v4100_v18 = vadd.f32 %v4099_v30, %v4093_v5 }
0x15bd   :  { %v4201_v61 = vsub.f32 %v4100_v18, %v4200_v52 }
0x15bf   :  { %v4203_v49 = vmul.f32 %v4202_v6, %v4201_v61 }
0x15c1   :  { %v4205_v46 = vsel %vm4204_vm6, %v4203_v49, 0.0 }
0x15c2   :  { %4206 = vadd.xlane.f32.xlu1 %v4205_v46 }
0x164b   :  { %v4207_v50 = vpop.xlane.xlu1 %4206 }
0x164c   :  { %v4208_v57 = vrot.slane %v4207_v50, 4 }
0x164e   :  { %v4209_v63 = vadd.f32 %v4208_v57, %v4207_v50 }
0x1650   :  { %v4210_v59 = vrot.slane %v4209_v63, 2 }
0x1652   :  { %v4211_v47 = vadd.f32 %v4210_v59, %v4209_v63 }
0x1654   :  { %v4212_v12 = vrot.slane %v4211_v47, 1 }
0x1656   :  { %v4213_v33 = vadd.f32 %v4212_v12, %v4211_v47 }
0x1658   :  { %4417 = vpush %v4213_v33 }
0x1689   :  { %s4418_s26 = spop %4417 }
0x168a   :  { %s4215_s27 = ssub.f32 0.0, %s4418_s26 }
0x168c   :  { %v4216_v32 = vstv %s4215_s27 }
0x168d   :  { %4218 = vst.msk [vmem:[#allocation7] sm:$0x1] %vm4217_vm7, %v4216_v32 }
0x168e   :  { %4692 = shalt.err (!%p4689_p0)
}
0x168f   :  { %4228 = dma.vmem_to_hbm [thread:$0]  %s4226_s25, 16, %s6262_s13, [#allocation4]  }
0x1690   :  { %4705 = dma.done.wait [#allocation4], 16  }
0x1691   :  { %4706 = vsyncadd [#allocation4], 4294967280 }
0x1692   :  { %4232 = vsyncpa [#allocation3], 1 }
0x1693   :  { %4233 = vsyncpa [#allocation6], 1 }
0x1694   :  { %4234 = vsyncpa [#allocation4], 1 }

</bundles_post_ra>
